<compile_context>
chip_gen: v7x
topology: tpu7x:2x2x1
jax: 0.10.0
libtpu: 0.0.40
codegen_flags: <defaults>
</compile_context>

<pallas_src>
import math
import jax
import jax.numpy as jnp
from jax.experimental import pallas as pl
from jax.experimental.pallas import tpu as pltpu

# ------------------------- config -------------------------
IMG = 16            # img_size
PATCH = 4           # patch_size
IN_C = 4            # in_c
EMBED = 32          # embed_dim
DEPTH = 2           # depth
N_HEADS = 4         # n_heads
HEAD_DIM = EMBED // N_HEADS
MLP_HIDDEN = int(EMBED * 4.0)
N_CLASSES = 10
N_CLASSES_PAD = 128       # lane-dense padded head width (unmasked vst)
BATCH = 2

N_PATCHES = (IMG // PATCH) ** 2   # 16
SEQ = N_PATCHES + 1               # 17 (cls + patches)
SEQ_PAD = 24                      # per-image rows, padded to a multiple of 8
CLS_ROWS = 8                      # epilogue sublane group containing the cls row
CPP = IN_C * PATCH * PATCH        # 64
EPS = 1e-6                        # LayerNorm eps (norm_layer=LayerNorm(eps=1e-6))
SCALE = HEAD_DIM ** -0.5
NEG_INF = -1e9


# ------------------------- in-kernel helpers -------------------------
def _layernorm(x, w, b):
    mu = jnp.mean(x, axis=-1, keepdims=True)
    var = jnp.mean(jnp.square(x - mu), axis=-1, keepdims=True)
    return (x - mu) * jax.lax.rsqrt(var + EPS) * w + b


def _gelu(x):
    # TODO(synk): PyTorch nn.GELU default is the exact erf formulation; the tanh
    # approximation is used for robust Mosaic lowering (max diff ~1e-3).
    c = math.sqrt(2.0 / math.pi)
    return 0.5 * x * (1.0 + jnp.tanh(c * (x + 0.044715 * x * x * x)))


# ------------------------- fused kernel (one image per grid step) -------------------------
def vit_fused_kernel(patches_ref, pw_ref, base_ref,
                     ln1w_ref, ln1b_ref,
                     qkvw_ref, qkvb_ref,
                     pjw_ref, pjb_ref,
                     ln2w_ref, ln2b_ref,
                     f1w_ref, f1b_ref, f2w_ref, f2b_ref,
                     nw_ref, nb_ref, hw_ref, hb_ref,
                     out_ref):
    f32 = jnp.float32
    bf16 = jnp.bfloat16

    # --- patch embedding + token assembly ---
    # patches has zero rows at the cls slot and padding slots, so this matmul
    # only contributes to real patch rows; `base` carries cls_token+pos[0]
    # (row 0), pos[1:]+conv_bias (patch rows), 0 (pad rows).
    x = jnp.dot(patches_ref[...], pw_ref[...],
                preferred_element_type=f32) + base_ref[...]        # (SEQ_PAD, D)

    # additive key mask for the padded key rows (same for every query row)
    key_idx = jax.lax.broadcasted_iota(jnp.int32, (1, SEQ_PAD), 1)
    attn_bias = jnp.where(key_idx < SEQ, 0.0, NEG_INF).astype(f32)  # (1, SEQ_PAD)

    for d in range(DEPTH):                         # DEPTH=2, static unroll
        # ---------- attention branch ----------
        h = _layernorm(x, ln1w_ref[d], ln1b_ref[d]).astype(bf16)    # (SEQ_PAD, D)
        # one fused QKV matmul per layer; softmax scale folded into Q cols/bias
        qkv = jnp.dot(h, qkvw_ref[d],
                      preferred_element_type=f32) + qkvb_ref[d]     # (SEQ_PAD, 3D)
        heads = []
        for hh in range(N_HEADS):                  # static 8-lane slices per head
            q = qkv[:, hh * HEAD_DIM:(hh + 1) * HEAD_DIM]
            k = qkv[:, EMBED + hh * HEAD_DIM:EMBED + (hh + 1) * HEAD_DIM]
            v = qkv[:, 2 * EMBED + hh * HEAD_DIM:2 * EMBED + (hh + 1) * HEAD_DIM]
            s = jax.lax.dot_general(q.astype(bf16), k.astype(bf16),
                                    (((1,), (1,)), ((), ())),
                                    preferred_element_type=f32)     # (SEQ_PAD, SEQ_PAD)
            s = s + attn_bias
            s = s - jnp.max(s, axis=-1, keepdims=True)
            e = jnp.exp(s)
            p = e * pl.reciprocal(jnp.sum(e, axis=-1, keepdims=True), approx=True)
            heads.append(jnp.dot(p.astype(bf16), v.astype(bf16),
                                 preferred_element_type=f32))       # (SEQ_PAD, hd)
        # fused output projection: lane-concat heads, single matmul, bias once
        o = jnp.concatenate(heads, axis=-1).astype(bf16)            # (SEQ_PAD, D)
        x = x + jnp.dot(o, pjw_ref[d],
                        preferred_element_type=f32) + pjb_ref[d]    # residual 1

        # ---------- MLP branch ----------
        h2 = _layernorm(x, ln2w_ref[d], ln2b_ref[d]).astype(bf16)
        h2 = jnp.dot(h2, f1w_ref[d], preferred_element_type=f32) + f1b_ref[d]
        h2 = _gelu(h2).astype(bf16)
        h2 = jnp.dot(h2, f2w_ref[d], preferred_element_type=f32) + f2b_ref[d]
        x = x + h2                                                  # residual 2

    # --- final LayerNorm + head on the cls sublane group only (rows 0..7) ---
    xc = x[0:CLS_ROWS, :]
    xn = _layernorm(xc, nw_ref[...], nb_ref[...]).astype(bf16)
    out_ref[...] = jnp.dot(xn, hw_ref[...],
                           preferred_element_type=f32) + hb_ref[...]   # (8, 128)


# ------------------------- pallas_call wrapper -------------------------
def vit_forward(x, pp):
    B = x.shape[0]
    Hp = IMG // PATCH

    # unfold NCHW into patches, flattened in (c, kh, kw) order to match the
    # Conv2d(patch, stride=patch) weight layout
    patches = x.reshape(B, IN_C, Hp, PATCH, Hp, PATCH)
    patches = patches.transpose(0, 2, 4, 1, 3, 5).reshape(B, N_PATCHES, CPP)

    # pad each image to SEQ_PAD rows; row 0 (cls slot) and rows SEQ.. (padding)
    # stay zero so the patch-embed matmul leaves them to `base`
    aug = jnp.zeros((B, SEQ_PAD, CPP), jnp.float32)
    aug = aug.at[:, 1:1 + N_PATCHES, :].set(patches)
    aug = aug.astype(jnp.bfloat16)

    weights = (pp["patch_w"], pp["base"],
               pp["ln1_w"], pp["ln1_b"],
               pp["qkv_w"], pp["qkv_b"],
               pp["proj_w"], pp["proj_b"],
               pp["ln2_w"], pp["ln2_b"],
               pp["fc1_w"], pp["fc1_b"], pp["fc2_w"], pp["fc2_b"],
               pp["norm_w"], pp["norm_b"], pp["head_w"], pp["head_b"])

    def const_spec(a):
        zeros = (0,) * a.ndim
        return pl.BlockSpec(a.shape, lambda b, _z=zeros: _z)   # weights stay resident

    in_specs = ([pl.BlockSpec((None, SEQ_PAD, CPP), lambda b: (b, 0, 0))]
                + [const_spec(a) for a in weights])

    out_all = pl.pallas_call(
        vit_fused_kernel,
        out_shape=jax.ShapeDtypeStruct((B, CLS_ROWS, N_CLASSES_PAD), jnp.float32),
        grid=(B,),
        in_specs=in_specs,
        out_specs=pl.BlockSpec((None, CLS_ROWS, N_CLASSES_PAD), lambda b: (b, 0, 0)),
        compiler_params=pltpu.CompilerParams(dimension_semantics=("parallel",)),
    )(aug, *weights)

    # cls row is row 0 of each image's epilogue tile; drop the lane padding
    return out_all[:, 0, :N_CLASSES]


# ------------------------- parameter init (PyTorch-style layout) -------------------------
def init_params(key):
    std = 0.02
    keys = jax.random.split(key, 4 + DEPTH)
    conv_w = jax.random.normal(keys[0], (EMBED, IN_C, PATCH, PATCH), jnp.float32) * std
    params = {
        "patch_w": conv_w.reshape(EMBED, CPP).T,     # (CPP, D) for patches @ W
        "patch_b": jnp.zeros((EMBED,), jnp.float32),
        "cls_token": jax.random.normal(keys[1], (1, 1, EMBED), jnp.float32) * std,
        "pos_embed": jax.random.normal(keys[2], (1, SEQ, EMBED), jnp.float32) * std,
        "norm_w": jnp.ones((EMBED,), jnp.float32),
        "norm_b": jnp.zeros((EMBED,), jnp.float32),
        # NOTE: the reference init zeros the head weight; random init here keeps
        # the kernel output non-trivial (init scheme is synthetic/deterministic).
        "head_w": jax.random.normal(keys[3], (EMBED, N_CLASSES), jnp.float32) * std,
        "head_b": jnp.zeros((N_CLASSES,), jnp.float32),
        "blocks": [],
    }
    for d in range(DEPTH):
        bk = jax.random.split(keys[4 + d], 4)
        params["blocks"].append({
            "ln1_w": jnp.ones((EMBED,), jnp.float32),
            "ln1_b": jnp.zeros((EMBED,), jnp.float32),
            "qkv_w": jax.random.normal(bk[0], (EMBED, 3 * EMBED), jnp.float32) * std,
            "qkv_b": jnp.zeros((3 * EMBED,), jnp.float32),
            "proj_w": jax.random.normal(bk[1], (EMBED, EMBED), jnp.float32) * std,
            "proj_b": jnp.zeros((EMBED,), jnp.float32),
            "ln2_w": jnp.ones((EMBED,), jnp.float32),
            "ln2_b": jnp.zeros((EMBED,), jnp.float32),
            "fc1_w": jax.random.normal(bk[2], (EMBED, MLP_HIDDEN), jnp.float32) * std,
            "fc1_b": jnp.zeros((MLP_HIDDEN,), jnp.float32),
            "fc2_w": jax.random.normal(bk[3], (MLP_HIDDEN, EMBED), jnp.float32) * std,
            "fc2_b": jnp.zeros((EMBED,), jnp.float32),
        })
    return params


# ------------------------- host-side packing into kernel layout -------------------------
def pack_params(params):
    f32, bf16 = jnp.float32, jnp.bfloat16

    # base token tensor (per image): cls+pos[0] | pos[1:]+conv_bias | zero padding
    cls = params["cls_token"].reshape(1, EMBED)
    pos = params["pos_embed"].reshape(SEQ, EMBED)
    pb = params["patch_b"].reshape(1, EMBED)
    base = jnp.concatenate(
        [cls + pos[0:1],
         pos[1:] + pb,
         jnp.zeros((SEQ_PAD - SEQ, EMBED), f32)], axis=0)            # (SEQ_PAD, D)

    # softmax scale folded into the Q columns of the fused QKV weight/bias
    col_scale = jnp.concatenate(
        [jnp.full((EMBED,), SCALE, f32), jnp.ones((2 * EMBED,), f32)])

    qkvw, qkvb, pjw, pjb = [], [], [], []
    ln1w, ln1b, ln2w, ln2b = [], [], [], []
    f1w, f1b, f2w, f2b = [], [], [], []
    for blk in params["blocks"]:
        qkvw.append(blk["qkv_w"] * col_scale[None, :])               # (D, 3D)
        qkvb.append((blk["qkv_b"] * col_scale).reshape(1, 3 * EMBED))
        pjw.append(blk["proj_w"])                                    # (D, D), head-major rows
        pjb.append(blk["proj_b"].reshape(1, EMBED))
        ln1w.append(blk["ln1_w"].reshape(1, EMBED)); ln1b.append(blk["ln1_b"].reshape(1, EMBED))
        ln2w.append(blk["ln2_w"].reshape(1, EMBED)); ln2b.append(blk["ln2_b"].reshape(1, EMBED))
        f1w.append(blk["fc1_w"]); f1b.append(blk["fc1_b"].reshape(1, MLP_HIDDEN))
        f2w.append(blk["fc2_w"]); f2b.append(blk["fc2_b"].reshape(1, EMBED))

    # lane-dense head: zero-pad 10 -> 128 output columns
    head_w = jnp.zeros((EMBED, N_CLASSES_PAD), f32).at[:, :N_CLASSES].set(params["head_w"])
    head_b = jnp.zeros((1, N_CLASSES_PAD), f32).at[:, :N_CLASSES].set(
        params["head_b"].reshape(1, N_CLASSES))

    stack = lambda xs: jnp.stack(xs, axis=0)
    return {
        "patch_w": params["patch_w"].astype(bf16),                   # (CPP, D)
        "base": base,                                                # (SEQ_PAD, D)
        "ln1_w": stack(ln1w), "ln1_b": stack(ln1b),                  # (DEPTH, 1, D)
        "qkv_w": stack(qkvw).astype(bf16),                           # (DEPTH, D, 3D)
        "qkv_b": stack(qkvb),                                        # (DEPTH, 1, 3D)
        "proj_w": stack(pjw).astype(bf16),                           # (DEPTH, D, D)
        "proj_b": stack(pjb),                                        # (DEPTH, 1, D)
        "ln2_w": stack(ln2w), "ln2_b": stack(ln2b),
        "fc1_w": stack(f1w).astype(bf16), "fc1_b": stack(f1b),
        "fc2_w": stack(f2w).astype(bf16), "fc2_b": stack(f2b),
        "norm_w": params["norm_w"].reshape(1, EMBED),
        "norm_b": params["norm_b"].reshape(1, EMBED),
        "head_w": head_w.astype(bf16),                               # (D, 128)
        "head_b": head_b,                                            # (1, 128)
    }


# ------------------------- main -------------------------
if __name__ == "__main__":
    root = jax.random.PRNGKey(0)
    k_param, k_x = jax.random.split(root)

    params = init_params(k_param)
    packed = pack_params(params)
    x = jax.random.normal(k_x, (BATCH, IN_C, IMG, IMG), jnp.float32)   # NCHW

    out = jax.jit(vit_forward)(x, packed)
    out = jax.block_until_ready(out)

    assert out.shape == (BATCH, N_CLASSES), out.shape
    assert bool(jnp.all(jnp.isfinite(out)))
    print("KERNEL_OK")
</pallas_src>

<mosaic_0001>
module attributes {stable_mosaic.version = 11 : i64} {
  func.func @vit_fused_kernel(%arg0: i32, %arg1: memref<1x24x64xbf16, #tpu.memory_space<vmem>>, %arg2: memref<64x32xbf16, #tpu.memory_space<vmem>>, %arg3: memref<24x32xf32, #tpu.memory_space<vmem>>, %arg4: memref<2x1x32xf32, #tpu.memory_space<vmem>>, %arg5: memref<2x1x32xf32, #tpu.memory_space<vmem>>, %arg6: memref<2x32x96xbf16, #tpu.memory_space<vmem>>, %arg7: memref<2x1x96xf32, #tpu.memory_space<vmem>>, %arg8: memref<2x32x32xbf16, #tpu.memory_space<vmem>>, %arg9: memref<2x1x32xf32, #tpu.memory_space<vmem>>, %arg10: memref<2x1x32xf32, #tpu.memory_space<vmem>>, %arg11: memref<2x1x32xf32, #tpu.memory_space<vmem>>, %arg12: memref<2x32x128xbf16, #tpu.memory_space<vmem>>, %arg13: memref<2x1x128xf32, #tpu.memory_space<vmem>>, %arg14: memref<2x128x32xbf16, #tpu.memory_space<vmem>>, %arg15: memref<2x1x32xf32, #tpu.memory_space<vmem>>, %arg16: memref<1x32xf32, #tpu.memory_space<vmem>>, %arg17: memref<1x32xf32, #tpu.memory_space<vmem>>, %arg18: memref<32x128xbf16, #tpu.memory_space<vmem>>, %arg19: memref<1x128xf32, #tpu.memory_space<vmem>>, %arg20: memref<1x8x128xf32, #tpu.memory_space<vmem>>) attributes {dimension_semantics = [#tpu.dimension_semantics<parallel>], iteration_bounds = array<i64: 2>, scalar_prefetch = 0 : i64, scratch_operands = 0 : i64, tpu.core_type = #tpu.core_type<tc>, window_params = [{transform_indices = @transform_0, window_bounds = array<i64: 1, 24, 64>}, {pipeline_mode = #tpu.pipeline_mode<synchronous>, transform_indices = @transform_1, window_bounds = array<i64: 64, 32>}, {pipeline_mode = #tpu.pipeline_mode<synchronous>, transform_indices = @transform_2, window_bounds = array<i64: 24, 32>}, {pipeline_mode = #tpu.pipeline_mode<synchronous>, transform_indices = @transform_3, window_bounds = array<i64: 2, 1, 32>}, {pipeline_mode = #tpu.pipeline_mode<synchronous>, transform_indices = @transform_4, window_bounds = array<i64: 2, 1, 32>}, {pipeline_mode = #tpu.pipeline_mode<synchronous>, transform_indices = @transform_5, window_bounds = array<i64: 2, 32, 96>}, {pipeline_mode = #tpu.pipeline_mode<synchronous>, transform_indices = @transform_6, window_bounds = array<i64: 2, 1, 96>}, {pipeline_mode = #tpu.pipeline_mode<synchronous>, transform_indices = @transform_7, window_bounds = array<i64: 2, 32, 32>}, {pipeline_mode = #tpu.pipeline_mode<synchronous>, transform_indices = @transform_8, window_bounds = array<i64: 2, 1, 32>}, {pipeline_mode = #tpu.pipeline_mode<synchronous>, transform_indices = @transform_9, window_bounds = array<i64: 2, 1, 32>}, {pipeline_mode = #tpu.pipeline_mode<synchronous>, transform_indices = @transform_10, window_bounds = array<i64: 2, 1, 32>}, {pipeline_mode = #tpu.pipeline_mode<synchronous>, transform_indices = @transform_11, window_bounds = array<i64: 2, 32, 128>}, {pipeline_mode = #tpu.pipeline_mode<synchronous>, transform_indices = @transform_12, window_bounds = array<i64: 2, 1, 128>}, {pipeline_mode = #tpu.pipeline_mode<synchronous>, transform_indices = @transform_13, window_bounds = array<i64: 2, 128, 32>}, {pipeline_mode = #tpu.pipeline_mode<synchronous>, transform_indices = @transform_14, window_bounds = array<i64: 2, 1, 32>}, {pipeline_mode = #tpu.pipeline_mode<synchronous>, transform_indices = @transform_15, window_bounds = array<i64: 1, 32>}, {pipeline_mode = #tpu.pipeline_mode<synchronous>, transform_indices = @transform_16, window_bounds = array<i64: 1, 32>}, {pipeline_mode = #tpu.pipeline_mode<synchronous>, transform_indices = @transform_17, window_bounds = array<i64: 32, 128>}, {pipeline_mode = #tpu.pipeline_mode<synchronous>, transform_indices = @transform_18, window_bounds = array<i64: 1, 128>}, {transform_indices = @transform_19, window_bounds = array<i64: 1, 8, 128>}]} {
    %c0 = arith.constant 0 : index
    %c0_0 = arith.constant 0 : index
    %c0_1 = arith.constant 0 : index
    %0 = vector.load %arg1[%c0, %c0_0, %c0_1] : memref<1x24x64xbf16, #tpu.memory_space<vmem>>, vector<1x24x64xbf16>
    %1 = vector.shape_cast %0 : vector<1x24x64xbf16> to vector<24x64xbf16>
    %c0_2 = arith.constant 0 : index
    %c0_3 = arith.constant 0 : index
    %2 = vector.load %arg2[%c0_2, %c0_3] : memref<64x32xbf16, #tpu.memory_space<vmem>>, vector<64x32xbf16>
    %cst = arith.constant dense<0.000000e+00> : vector<24x32xf32>
    %3 = tpu.matmul %1, %2, %cst {dimension_numbers = #tpu.dot_dimension_numbers<[1], [0], [0], [1], [0, 0, 1, 1], [], []>} : vector<24x64xbf16>, vector<64x32xbf16>, vector<24x32xf32> -> vector<24x32xf32>
    %c0_4 = arith.constant 0 : index
    %c0_5 = arith.constant 0 : index
    %4 = vector.load %arg3[%c0_4, %c0_5] : memref<24x32xf32, #tpu.memory_space<vmem>>, vector<24x32xf32>
    %5 = arith.addf %3, %4 : vector<24x32xf32>
    %6 = tpu.iota {dimensions = array<i32: 1>} : vector<1x24xi32>
    %c17_i32 = arith.constant 17 : i32
    %7 = vector.broadcast %c17_i32 : i32 to vector<1x24xi32>
    %8 = arith.cmpi slt, %6, %7 : vector<1x24xi32>
    %cst_6 = arith.constant 0.000000e+00 : f32
    %cst_7 = arith.constant -1.000000e+09 : f32
    %9 = vector.broadcast %cst_6 : f32 to vector<1x24xf32>
    %10 = vector.broadcast %cst_7 : f32 to vector<1x24xf32>
    %11 = arith.select %8, %9, %10 : vector<1x24xi1>, vector<1x24xf32>
    %c0_8 = arith.constant 0 : index
    %c0_9 = arith.constant 0 : index
    %c0_10 = arith.constant 0 : index
    %12 = vector.load %arg4[%c0_8, %c0_9, %c0_10] : memref<2x1x32xf32, #tpu.memory_space<vmem>>, vector<1x1x32xf32>
    %13 = vector.shape_cast %12 : vector<1x1x32xf32> to vector<1x32xf32>
    %c0_11 = arith.constant 0 : index
    %c0_12 = arith.constant 0 : index
    %c0_13 = arith.constant 0 : index
    %14 = vector.load %arg5[%c0_11, %c0_12, %c0_13] : memref<2x1x32xf32, #tpu.memory_space<vmem>>, vector<1x1x32xf32>
    %15 = vector.shape_cast %14 : vector<1x1x32xf32> to vector<1x32xf32>
    %cst_14 = arith.constant dense<0.000000e+00> : vector<24xf32>
    %16 = vector.multi_reduction <add>, %5, %cst_14 [1] : vector<24x32xf32> to vector<24xf32>
    %17 = vector.shape_cast %16 : vector<24xf32> to vector<24x1xf32>
    %cst_15 = arith.constant 3.200000e+01 : f32
    %18 = vector.broadcast %cst_15 : f32 to vector<24x1xf32>
    %19 = arith.divf %17, %18 : vector<24x1xf32>
    %20 = vector.broadcast %19 : vector<24x1xf32> to vector<24x32xf32>
    %21 = arith.subf %5, %20 : vector<24x32xf32>
    %22 = arith.mulf %21, %21 : vector<24x32xf32>
    %cst_16 = arith.constant dense<0.000000e+00> : vector<24xf32>
    %23 = vector.multi_reduction <add>, %22, %cst_16 [1] : vector<24x32xf32> to vector<24xf32>
    %24 = vector.shape_cast %23 : vector<24xf32> to vector<24x1xf32>
    %cst_17 = arith.constant 3.200000e+01 : f32
    %25 = vector.broadcast %cst_17 : f32 to vector<24x1xf32>
    %26 = arith.divf %24, %25 : vector<24x1xf32>
    %27 = vector.broadcast %19 : vector<24x1xf32> to vector<24x32xf32>
    %28 = arith.subf %5, %27 : vector<24x32xf32>
    %cst_18 = arith.constant 9.99999997E-7 : f32
    %29 = vector.broadcast %cst_18 : f32 to vector<24x1xf32>
    %30 = arith.addf %26, %29 : vector<24x1xf32>
    %31 = math.rsqrt %30 : vector<24x1xf32>
    %32 = vector.broadcast %31 : vector<24x1xf32> to vector<24x32xf32>
    %33 = arith.mulf %28, %32 : vector<24x32xf32>
    %34 = vector.broadcast %13 : vector<1x32xf32> to vector<24x32xf32>
    %35 = arith.mulf %33, %34 : vector<24x32xf32>
    %36 = vector.broadcast %15 : vector<1x32xf32> to vector<24x32xf32>
    %37 = arith.addf %35, %36 : vector<24x32xf32>
    %38 = arith.truncf %37 : vector<24x32xf32> to vector<24x32xbf16>
    %c0_19 = arith.constant 0 : index
    %c0_20 = arith.constant 0 : index
    %c0_21 = arith.constant 0 : index
    %39 = vector.load %arg6[%c0_19, %c0_20, %c0_21] : memref<2x32x96xbf16, #tpu.memory_space<vmem>>, vector<1x32x96xbf16>
    %40 = vector.shape_cast %39 : vector<1x32x96xbf16> to vector<32x96xbf16>
    %cst_22 = arith.constant dense<0.000000e+00> : vector<24x96xf32>
    %41 = tpu.matmul %38, %40, %cst_22 {dimension_numbers = #tpu.dot_dimension_numbers<[1], [0], [0], [1], [0, 0, 1, 1], [], []>} : vector<24x32xbf16>, vector<32x96xbf16>, vector<24x96xf32> -> vector<24x96xf32>
    %c0_23 = arith.constant 0 : index
    %c0_24 = arith.constant 0 : index
    %c0_25 = arith.constant 0 : index
    %42 = vector.load %arg7[%c0_23, %c0_24, %c0_25] : memref<2x1x96xf32, #tpu.memory_space<vmem>>, vector<1x1x96xf32>
    %43 = vector.shape_cast %42 : vector<1x1x96xf32> to vector<1x96xf32>
    %44 = vector.broadcast %43 : vector<1x96xf32> to vector<24x96xf32>
    %45 = arith.addf %41, %44 : vector<24x96xf32>
    %46 = vector.extract_strided_slice %45 {offsets = [0, 0], sizes = [24, 8], strides = [1, 1]} : vector<24x96xf32> to vector<24x8xf32>
    %47 = vector.extract_strided_slice %45 {offsets = [0, 32], sizes = [24, 8], strides = [1, 1]} : vector<24x96xf32> to vector<24x8xf32>
    %48 = vector.extract_strided_slice %45 {offsets = [0, 64], sizes = [24, 8], strides = [1, 1]} : vector<24x96xf32> to vector<24x8xf32>
    %49 = arith.truncf %46 : vector<24x8xf32> to vector<24x8xbf16>
    %50 = arith.truncf %47 : vector<24x8xf32> to vector<24x8xbf16>
    %cst_26 = arith.constant dense<0.000000e+00> : vector<24x24xf32>
    %51 = tpu.matmul %49, %50, %cst_26 {dimension_numbers = #tpu.dot_dimension_numbers<[1], [1], [0], [0], [0, 0, 1, 0], [], []>} : vector<24x8xbf16>, vector<24x8xbf16>, vector<24x24xf32> -> vector<24x24xf32>
    %52 = vector.broadcast %11 : vector<1x24xf32> to vector<24x24xf32>
    %53 = arith.addf %51, %52 : vector<24x24xf32>
    %cst_27 = arith.constant dense<0xFF800000> : vector<24xf32>
    %54 = vector.multi_reduction <maximumf>, %53, %cst_27 [1] : vector<24x24xf32> to vector<24xf32>
    %55 = vector.shape_cast %54 : vector<24xf32> to vector<24x1xf32>
    %56 = vector.broadcast %55 : vector<24x1xf32> to vector<24x24xf32>
    %57 = arith.subf %53, %56 : vector<24x24xf32>
    %58 = math.exp %57 : vector<24x24xf32>
    %cst_28 = arith.constant dense<0.000000e+00> : vector<24xf32>
    %59 = vector.multi_reduction <add>, %58, %cst_28 [1] : vector<24x24xf32> to vector<24xf32>
    %60 = vector.shape_cast %59 : vector<24xf32> to vector<24x1xf32>
    %61 = tpu.reciprocal %60 {approx = true} : vector<24x1xf32> -> vector<24x1xf32>
    %62 = vector.broadcast %61 : vector<24x1xf32> to vector<24x24xf32>
    %63 = arith.mulf %58, %62 : vector<24x24xf32>
    %64 = arith.truncf %63 : vector<24x24xf32> to vector<24x24xbf16>
    %65 = arith.truncf %48 : vector<24x8xf32> to vector<24x8xbf16>
    %cst_29 = arith.constant dense<0.000000e+00> : vector<24x8xf32>
    %66 = tpu.matmul %64, %65, %cst_29 {dimension_numbers = #tpu.dot_dimension_numbers<[1], [0], [0], [1], [0, 0, 1, 1], [], []>} : vector<24x24xbf16>, vector<24x8xbf16>, vector<24x8xf32> -> vector<24x8xf32>
    %67 = vector.extract_strided_slice %45 {offsets = [0, 8], sizes = [24, 8], strides = [1, 1]} : vector<24x96xf32> to vector<24x8xf32>
    %68 = vector.extract_strided_slice %45 {offsets = [0, 40], sizes = [24, 8], strides = [1, 1]} : vector<24x96xf32> to vector<24x8xf32>
    %69 = vector.extract_strided_slice %45 {offsets = [0, 72], sizes = [24, 8], strides = [1, 1]} : vector<24x96xf32> to vector<24x8xf32>
    %70 = arith.truncf %67 : vector<24x8xf32> to vector<24x8xbf16>
    %71 = arith.truncf %68 : vector<24x8xf32> to vector<24x8xbf16>
    %cst_30 = arith.constant dense<0.000000e+00> : vector<24x24xf32>
    %72 = tpu.matmul %70, %71, %cst_30 {dimension_numbers = #tpu.dot_dimension_numbers<[1], [1], [0], [0], [0, 0, 1, 0], [], []>} : vector<24x8xbf16>, vector<24x8xbf16>, vector<24x24xf32> -> vector<24x24xf32>
    %73 = vector.broadcast %11 : vector<1x24xf32> to vector<24x24xf32>
    %74 = arith.addf %72, %73 : vector<24x24xf32>
    %cst_31 = arith.constant dense<0xFF800000> : vector<24xf32>
    %75 = vector.multi_reduction <maximumf>, %74, %cst_31 [1] : vector<24x24xf32> to vector<24xf32>
    %76 = vector.shape_cast %75 : vector<24xf32> to vector<24x1xf32>
    %77 = vector.broadcast %76 : vector<24x1xf32> to vector<24x24xf32>
    %78 = arith.subf %74, %77 : vector<24x24xf32>
    %79 = math.exp %78 : vector<24x24xf32>
    %cst_32 = arith.constant dense<0.000000e+00> : vector<24xf32>
    %80 = vector.multi_reduction <add>, %79, %cst_32 [1] : vector<24x24xf32> to vector<24xf32>
    %81 = vector.shape_cast %80 : vector<24xf32> to vector<24x1xf32>
    %82 = tpu.reciprocal %81 {approx = true} : vector<24x1xf32> -> vector<24x1xf32>
    %83 = vector.broadcast %82 : vector<24x1xf32> to vector<24x24xf32>
    %84 = arith.mulf %79, %83 : vector<24x24xf32>
    %85 = arith.truncf %84 : vector<24x24xf32> to vector<24x24xbf16>
    %86 = arith.truncf %69 : vector<24x8xf32> to vector<24x8xbf16>
    %cst_33 = arith.constant dense<0.000000e+00> : vector<24x8xf32>
    %87 = tpu.matmul %85, %86, %cst_33 {dimension_numbers = #tpu.dot_dimension_numbers<[1], [0], [0], [1], [0, 0, 1, 1], [], []>} : vector<24x24xbf16>, vector<24x8xbf16>, vector<24x8xf32> -> vector<24x8xf32>
    %88 = vector.extract_strided_slice %45 {offsets = [0, 16], sizes = [24, 8], strides = [1, 1]} : vector<24x96xf32> to vector<24x8xf32>
    %89 = vector.extract_strided_slice %45 {offsets = [0, 48], sizes = [24, 8], strides = [1, 1]} : vector<24x96xf32> to vector<24x8xf32>
    %90 = vector.extract_strided_slice %45 {offsets = [0, 80], sizes = [24, 8], strides = [1, 1]} : vector<24x96xf32> to vector<24x8xf32>
    %91 = arith.truncf %88 : vector<24x8xf32> to vector<24x8xbf16>
    %92 = arith.truncf %89 : vector<24x8xf32> to vector<24x8xbf16>
    %cst_34 = arith.constant dense<0.000000e+00> : vector<24x24xf32>
    %93 = tpu.matmul %91, %92, %cst_34 {dimension_numbers = #tpu.dot_dimension_numbers<[1], [1], [0], [0], [0, 0, 1, 0], [], []>} : vector<24x8xbf16>, vector<24x8xbf16>, vector<24x24xf32> -> vector<24x24xf32>
    %94 = vector.broadcast %11 : vector<1x24xf32> to vector<24x24xf32>
    %95 = arith.addf %93, %94 : vector<24x24xf32>
    %cst_35 = arith.constant dense<0xFF800000> : vector<24xf32>
    %96 = vector.multi_reduction <maximumf>, %95, %cst_35 [1] : vector<24x24xf32> to vector<24xf32>
    %97 = vector.shape_cast %96 : vector<24xf32> to vector<24x1xf32>
    %98 = vector.broadcast %97 : vector<24x1xf32> to vector<24x24xf32>
    %99 = arith.subf %95, %98 : vector<24x24xf32>
    %100 = math.exp %99 : vector<24x24xf32>
    %cst_36 = arith.constant dense<0.000000e+00> : vector<24xf32>
    %101 = vector.multi_reduction <add>, %100, %cst_36 [1] : vector<24x24xf32> to vector<24xf32>
    %102 = vector.shape_cast %101 : vector<24xf32> to vector<24x1xf32>
    %103 = tpu.reciprocal %102 {approx = true} : vector<24x1xf32> -> vector<24x1xf32>
    %104 = vector.broadcast %103 : vector<24x1xf32> to vector<24x24xf32>
    %105 = arith.mulf %100, %104 : vector<24x24xf32>
    %106 = arith.truncf %105 : vector<24x24xf32> to vector<24x24xbf16>
    %107 = arith.truncf %90 : vector<24x8xf32> to vector<24x8xbf16>
    %cst_37 = arith.constant dense<0.000000e+00> : vector<24x8xf32>
    %108 = tpu.matmul %106, %107, %cst_37 {dimension_numbers = #tpu.dot_dimension_numbers<[1], [0], [0], [1], [0, 0, 1, 1], [], []>} : vector<24x24xbf16>, vector<24x8xbf16>, vector<24x8xf32> -> vector<24x8xf32>
    %109 = vector.extract_strided_slice %45 {offsets = [0, 24], sizes = [24, 8], strides = [1, 1]} : vector<24x96xf32> to vector<24x8xf32>
    %110 = vector.extract_strided_slice %45 {offsets = [0, 56], sizes = [24, 8], strides = [1, 1]} : vector<24x96xf32> to vector<24x8xf32>
    %111 = vector.extract_strided_slice %45 {offsets = [0, 88], sizes = [24, 8], strides = [1, 1]} : vector<24x96xf32> to vector<24x8xf32>
    %112 = arith.truncf %109 : vector<24x8xf32> to vector<24x8xbf16>
    %113 = arith.truncf %110 : vector<24x8xf32> to vector<24x8xbf16>
    %cst_38 = arith.constant dense<0.000000e+00> : vector<24x24xf32>
    %114 = tpu.matmul %112, %113, %cst_38 {dimension_numbers = #tpu.dot_dimension_numbers<[1], [1], [0], [0], [0, 0, 1, 0], [], []>} : vector<24x8xbf16>, vector<24x8xbf16>, vector<24x24xf32> -> vector<24x24xf32>
    %115 = vector.broadcast %11 : vector<1x24xf32> to vector<24x24xf32>
    %116 = arith.addf %114, %115 : vector<24x24xf32>
    %cst_39 = arith.constant dense<0xFF800000> : vector<24xf32>
    %117 = vector.multi_reduction <maximumf>, %116, %cst_39 [1] : vector<24x24xf32> to vector<24xf32>
    %118 = vector.shape_cast %117 : vector<24xf32> to vector<24x1xf32>
    %119 = vector.broadcast %118 : vector<24x1xf32> to vector<24x24xf32>
    %120 = arith.subf %116, %119 : vector<24x24xf32>
    %121 = math.exp %120 : vector<24x24xf32>
    %cst_40 = arith.constant dense<0.000000e+00> : vector<24xf32>
    %122 = vector.multi_reduction <add>, %121, %cst_40 [1] : vector<24x24xf32> to vector<24xf32>
    %123 = vector.shape_cast %122 : vector<24xf32> to vector<24x1xf32>
    %124 = tpu.reciprocal %123 {approx = true} : vector<24x1xf32> -> vector<24x1xf32>
    %125 = vector.broadcast %124 : vector<24x1xf32> to vector<24x24xf32>
    %126 = arith.mulf %121, %125 : vector<24x24xf32>
    %127 = arith.truncf %126 : vector<24x24xf32> to vector<24x24xbf16>
    %128 = arith.truncf %111 : vector<24x8xf32> to vector<24x8xbf16>
    %cst_41 = arith.constant dense<0.000000e+00> : vector<24x8xf32>
    %129 = tpu.matmul %127, %128, %cst_41 {dimension_numbers = #tpu.dot_dimension_numbers<[1], [0], [0], [1], [0, 0, 1, 1], [], []>} : vector<24x24xbf16>, vector<24x8xbf16>, vector<24x8xf32> -> vector<24x8xf32>
    %130 = tpu.concatenate %66, %87, %108, %129 in 1 : vector<24x8xf32>, vector<24x8xf32>, vector<24x8xf32>, vector<24x8xf32> -> vector<24x32xf32>
    %131 = arith.truncf %130 : vector<24x32xf32> to vector<24x32xbf16>
    %c0_42 = arith.constant 0 : index
    %c0_43 = arith.constant 0 : index
    %c0_44 = arith.constant 0 : index
    %132 = vector.load %arg8[%c0_42, %c0_43, %c0_44] : memref<2x32x32xbf16, #tpu.memory_space<vmem>>, vector<1x32x32xbf16>
    %133 = vector.shape_cast %132 : vector<1x32x32xbf16> to vector<32x32xbf16>
    %cst_45 = arith.constant dense<0.000000e+00> : vector<24x32xf32>
    %134 = tpu.matmul %131, %133, %cst_45 {dimension_numbers = #tpu.dot_dimension_numbers<[1], [0], [0], [1], [0, 0, 1, 1], [], []>} : vector<24x32xbf16>, vector<32x32xbf16>, vector<24x32xf32> -> vector<24x32xf32>
    %135 = arith.addf %5, %134 : vector<24x32xf32>
    %c0_46 = arith.constant 0 : index
    %c0_47 = arith.constant 0 : index
    %c0_48 = arith.constant 0 : index
    %136 = vector.load %arg9[%c0_46, %c0_47, %c0_48] : memref<2x1x32xf32, #tpu.memory_space<vmem>>, vector<1x1x32xf32>
    %137 = vector.shape_cast %136 : vector<1x1x32xf32> to vector<1x32xf32>
    %138 = vector.broadcast %137 : vector<1x32xf32> to vector<24x32xf32>
    %139 = arith.addf %135, %138 : vector<24x32xf32>
    %c0_49 = arith.constant 0 : index
    %c0_50 = arith.constant 0 : index
    %c0_51 = arith.constant 0 : index
    %140 = vector.load %arg10[%c0_49, %c0_50, %c0_51] : memref<2x1x32xf32, #tpu.memory_space<vmem>>, vector<1x1x32xf32>
    %141 = vector.shape_cast %140 : vector<1x1x32xf32> to vector<1x32xf32>
    %c0_52 = arith.constant 0 : index
    %c0_53 = arith.constant 0 : index
    %c0_54 = arith.constant 0 : index
    %142 = vector.load %arg11[%c0_52, %c0_53, %c0_54] : memref<2x1x32xf32, #tpu.memory_space<vmem>>, vector<1x1x32xf32>
    %143 = vector.shape_cast %142 : vector<1x1x32xf32> to vector<1x32xf32>
    %cst_55 = arith.constant dense<0.000000e+00> : vector<24xf32>
    %144 = vector.multi_reduction <add>, %139, %cst_55 [1] : vector<24x32xf32> to vector<24xf32>
    %145 = vector.shape_cast %144 : vector<24xf32> to vector<24x1xf32>
    %cst_56 = arith.constant 3.200000e+01 : f32
    %146 = vector.broadcast %cst_56 : f32 to vector<24x1xf32>
    %147 = arith.divf %145, %146 : vector<24x1xf32>
    %148 = vector.broadcast %147 : vector<24x1xf32> to vector<24x32xf32>
    %149 = arith.subf %139, %148 : vector<24x32xf32>
    %150 = arith.mulf %149, %149 : vector<24x32xf32>
    %cst_57 = arith.constant dense<0.000000e+00> : vector<24xf32>
    %151 = vector.multi_reduction <add>, %150, %cst_57 [1] : vector<24x32xf32> to vector<24xf32>
    %152 = vector.shape_cast %151 : vector<24xf32> to vector<24x1xf32>
    %cst_58 = arith.constant 3.200000e+01 : f32
    %153 = vector.broadcast %cst_58 : f32 to vector<24x1xf32>
    %154 = arith.divf %152, %153 : vector<24x1xf32>
    %155 = vector.broadcast %147 : vector<24x1xf32> to vector<24x32xf32>
    %156 = arith.subf %139, %155 : vector<24x32xf32>
    %cst_59 = arith.constant 9.99999997E-7 : f32
    %157 = vector.broadcast %cst_59 : f32 to vector<24x1xf32>
    %158 = arith.addf %154, %157 : vector<24x1xf32>
    %159 = math.rsqrt %158 : vector<24x1xf32>
    %160 = vector.broadcast %159 : vector<24x1xf32> to vector<24x32xf32>
    %161 = arith.mulf %156, %160 : vector<24x32xf32>
    %162 = vector.broadcast %141 : vector<1x32xf32> to vector<24x32xf32>
    %163 = arith.mulf %161, %162 : vector<24x32xf32>
    %164 = vector.broadcast %143 : vector<1x32xf32> to vector<24x32xf32>
    %165 = arith.addf %163, %164 : vector<24x32xf32>
    %166 = arith.truncf %165 : vector<24x32xf32> to vector<24x32xbf16>
    %c0_60 = arith.constant 0 : index
    %c0_61 = arith.constant 0 : index
    %c0_62 = arith.constant 0 : index
    %167 = vector.load %arg12[%c0_60, %c0_61, %c0_62] : memref<2x32x128xbf16, #tpu.memory_space<vmem>>, vector<1x32x128xbf16>
    %168 = vector.shape_cast %167 : vector<1x32x128xbf16> to vector<32x128xbf16>
    %cst_63 = arith.constant dense<0.000000e+00> : vector<24x128xf32>
    %169 = tpu.matmul %166, %168, %cst_63 {dimension_numbers = #tpu.dot_dimension_numbers<[1], [0], [0], [1], [0, 0, 1, 1], [], []>} : vector<24x32xbf16>, vector<32x128xbf16>, vector<24x128xf32> -> vector<24x128xf32>
    %c0_64 = arith.constant 0 : index
    %c0_65 = arith.constant 0 : index
    %c0_66 = arith.constant 0 : index
    %170 = vector.load %arg13[%c0_64, %c0_65, %c0_66] : memref<2x1x128xf32, #tpu.memory_space<vmem>>, vector<1x1x128xf32>
    %171 = vector.shape_cast %170 : vector<1x1x128xf32> to vector<1x128xf32>
    %172 = vector.broadcast %171 : vector<1x128xf32> to vector<24x128xf32>
    %173 = arith.addf %169, %172 : vector<24x128xf32>
    %cst_67 = arith.constant 5.000000e-01 : f32
    %174 = vector.broadcast %cst_67 : f32 to vector<24x128xf32>
    %175 = arith.mulf %174, %173 : vector<24x128xf32>
    %cst_68 = arith.constant 4.471500e-02 : f32
    %176 = vector.broadcast %cst_68 : f32 to vector<24x128xf32>
    %177 = arith.mulf %176, %173 : vector<24x128xf32>
    %178 = arith.mulf %177, %173 : vector<24x128xf32>
    %179 = arith.mulf %178, %173 : vector<24x128xf32>
    %180 = arith.addf %173, %179 : vector<24x128xf32>
    %cst_69 = arith.constant 0.797884583 : f32
    %181 = vector.broadcast %cst_69 : f32 to vector<24x128xf32>
    %182 = arith.mulf %181, %180 : vector<24x128xf32>
    %183 = math.tanh %182 : vector<24x128xf32>
    %cst_70 = arith.constant 1.000000e+00 : f32
    %184 = vector.broadcast %cst_70 : f32 to vector<24x128xf32>
    %185 = arith.addf %184, %183 : vector<24x128xf32>
    %186 = arith.mulf %175, %185 : vector<24x128xf32>
    %187 = arith.truncf %186 : vector<24x128xf32> to vector<24x128xbf16>
    %c0_71 = arith.constant 0 : index
    %c0_72 = arith.constant 0 : index
    %c0_73 = arith.constant 0 : index
    %188 = vector.load %arg14[%c0_71, %c0_72, %c0_73] : memref<2x128x32xbf16, #tpu.memory_space<vmem>>, vector<1x128x32xbf16>
    %189 = vector.shape_cast %188 : vector<1x128x32xbf16> to vector<128x32xbf16>
    %cst_74 = arith.constant dense<0.000000e+00> : vector<24x32xf32>
    %190 = tpu.matmul %187, %189, %cst_74 {dimension_numbers = #tpu.dot_dimension_numbers<[1], [0], [0], [1], [0, 0, 1, 1], [], []>} : vector<24x128xbf16>, vector<128x32xbf16>, vector<24x32xf32> -> vector<24x32xf32>
    %c0_75 = arith.constant 0 : index
    %c0_76 = arith.constant 0 : index
    %c0_77 = arith.constant 0 : index
    %191 = vector.load %arg15[%c0_75, %c0_76, %c0_77] : memref<2x1x32xf32, #tpu.memory_space<vmem>>, vector<1x1x32xf32>
    %192 = vector.shape_cast %191 : vector<1x1x32xf32> to vector<1x32xf32>
    %193 = vector.broadcast %192 : vector<1x32xf32> to vector<24x32xf32>
    %194 = arith.addf %190, %193 : vector<24x32xf32>
    %195 = arith.addf %139, %194 : vector<24x32xf32>
    %c1 = arith.constant 1 : index
    %c0_78 = arith.constant 0 : index
    %c0_79 = arith.constant 0 : index
    %196 = vector.load %arg4[%c1, %c0_78, %c0_79] : memref<2x1x32xf32, #tpu.memory_space<vmem>>, vector<1x1x32xf32>
    %197 = vector.shape_cast %196 : vector<1x1x32xf32> to vector<1x32xf32>
    %c1_80 = arith.constant 1 : index
    %c0_81 = arith.constant 0 : index
    %c0_82 = arith.constant 0 : index
    %198 = vector.load %arg5[%c1_80, %c0_81, %c0_82] : memref<2x1x32xf32, #tpu.memory_space<vmem>>, vector<1x1x32xf32>
    %199 = vector.shape_cast %198 : vector<1x1x32xf32> to vector<1x32xf32>
    %cst_83 = arith.constant dense<0.000000e+00> : vector<24xf32>
    %200 = vector.multi_reduction <add>, %195, %cst_83 [1] : vector<24x32xf32> to vector<24xf32>
    %201 = vector.shape_cast %200 : vector<24xf32> to vector<24x1xf32>
    %cst_84 = arith.constant 3.200000e+01 : f32
    %202 = vector.broadcast %cst_84 : f32 to vector<24x1xf32>
    %203 = arith.divf %201, %202 : vector<24x1xf32>
    %204 = vector.broadcast %203 : vector<24x1xf32> to vector<24x32xf32>
    %205 = arith.subf %195, %204 : vector<24x32xf32>
    %206 = arith.mulf %205, %205 : vector<24x32xf32>
    %cst_85 = arith.constant dense<0.000000e+00> : vector<24xf32>
    %207 = vector.multi_reduction <add>, %206, %cst_85 [1] : vector<24x32xf32> to vector<24xf32>
    %208 = vector.shape_cast %207 : vector<24xf32> to vector<24x1xf32>
    %cst_86 = arith.constant 3.200000e+01 : f32
    %209 = vector.broadcast %cst_86 : f32 to vector<24x1xf32>
    %210 = arith.divf %208, %209 : vector<24x1xf32>
    %211 = vector.broadcast %203 : vector<24x1xf32> to vector<24x32xf32>
    %212 = arith.subf %195, %211 : vector<24x32xf32>
    %cst_87 = arith.constant 9.99999997E-7 : f32
    %213 = vector.broadcast %cst_87 : f32 to vector<24x1xf32>
    %214 = arith.addf %210, %213 : vector<24x1xf32>
    %215 = math.rsqrt %214 : vector<24x1xf32>
    %216 = vector.broadcast %215 : vector<24x1xf32> to vector<24x32xf32>
    %217 = arith.mulf %212, %216 : vector<24x32xf32>
    %218 = vector.broadcast %197 : vector<1x32xf32> to vector<24x32xf32>
    %219 = arith.mulf %217, %218 : vector<24x32xf32>
    %220 = vector.broadcast %199 : vector<1x32xf32> to vector<24x32xf32>
    %221 = arith.addf %219, %220 : vector<24x32xf32>
    %222 = arith.truncf %221 : vector<24x32xf32> to vector<24x32xbf16>
    %c1_88 = arith.constant 1 : index
    %c0_89 = arith.constant 0 : index
    %c0_90 = arith.constant 0 : index
    %223 = vector.load %arg6[%c1_88, %c0_89, %c0_90] : memref<2x32x96xbf16, #tpu.memory_space<vmem>>, vector<1x32x96xbf16>
    %224 = vector.shape_cast %223 : vector<1x32x96xbf16> to vector<32x96xbf16>
    %cst_91 = arith.constant dense<0.000000e+00> : vector<24x96xf32>
    %225 = tpu.matmul %222, %224, %cst_91 {dimension_numbers = #tpu.dot_dimension_numbers<[1], [0], [0], [1], [0, 0, 1, 1], [], []>} : vector<24x32xbf16>, vector<32x96xbf16>, vector<24x96xf32> -> vector<24x96xf32>
    %c1_92 = arith.constant 1 : index
    %c0_93 = arith.constant 0 : index
    %c0_94 = arith.constant 0 : index
    %226 = vector.load %arg7[%c1_92, %c0_93, %c0_94] : memref<2x1x96xf32, #tpu.memory_space<vmem>>, vector<1x1x96xf32>
    %227 = vector.shape_cast %226 : vector<1x1x96xf32> to vector<1x96xf32>
    %228 = vector.broadcast %227 : vector<1x96xf32> to vector<24x96xf32>
    %229 = arith.addf %225, %228 : vector<24x96xf32>
    %230 = vector.extract_strided_slice %229 {offsets = [0, 0], sizes = [24, 8], strides = [1, 1]} : vector<24x96xf32> to vector<24x8xf32>
    %231 = vector.extract_strided_slice %229 {offsets = [0, 32], sizes = [24, 8], strides = [1, 1]} : vector<24x96xf32> to vector<24x8xf32>
    %232 = vector.extract_strided_slice %229 {offsets = [0, 64], sizes = [24, 8], strides = [1, 1]} : vector<24x96xf32> to vector<24x8xf32>
    %233 = arith.truncf %230 : vector<24x8xf32> to vector<24x8xbf16>
    %234 = arith.truncf %231 : vector<24x8xf32> to vector<24x8xbf16>
    %cst_95 = arith.constant dense<0.000000e+00> : vector<24x24xf32>
    %235 = tpu.matmul %233, %234, %cst_95 {dimension_numbers = #tpu.dot_dimension_numbers<[1], [1], [0], [0], [0, 0, 1, 0], [], []>} : vector<24x8xbf16>, vector<24x8xbf16>, vector<24x24xf32> -> vector<24x24xf32>
    %236 = vector.broadcast %11 : vector<1x24xf32> to vector<24x24xf32>
    %237 = arith.addf %235, %236 : vector<24x24xf32>
    %cst_96 = arith.constant dense<0xFF800000> : vector<24xf32>
    %238 = vector.multi_reduction <maximumf>, %237, %cst_96 [1] : vector<24x24xf32> to vector<24xf32>
    %239 = vector.shape_cast %238 : vector<24xf32> to vector<24x1xf32>
    %240 = vector.broadcast %239 : vector<24x1xf32> to vector<24x24xf32>
    %241 = arith.subf %237, %240 : vector<24x24xf32>
    %242 = math.exp %241 : vector<24x24xf32>
    %cst_97 = arith.constant dense<0.000000e+00> : vector<24xf32>
    %243 = vector.multi_reduction <add>, %242, %cst_97 [1] : vector<24x24xf32> to vector<24xf32>
    %244 = vector.shape_cast %243 : vector<24xf32> to vector<24x1xf32>
    %245 = tpu.reciprocal %244 {approx = true} : vector<24x1xf32> -> vector<24x1xf32>
    %246 = vector.broadcast %245 : vector<24x1xf32> to vector<24x24xf32>
    %247 = arith.mulf %242, %246 : vector<24x24xf32>
    %248 = arith.truncf %247 : vector<24x24xf32> to vector<24x24xbf16>
    %249 = arith.truncf %232 : vector<24x8xf32> to vector<24x8xbf16>
    %cst_98 = arith.constant dense<0.000000e+00> : vector<24x8xf32>
    %250 = tpu.matmul %248, %249, %cst_98 {dimension_numbers = #tpu.dot_dimension_numbers<[1], [0], [0], [1], [0, 0, 1, 1], [], []>} : vector<24x24xbf16>, vector<24x8xbf16>, vector<24x8xf32> -> vector<24x8xf32>
    %251 = vector.extract_strided_slice %229 {offsets = [0, 8], sizes = [24, 8], strides = [1, 1]} : vector<24x96xf32> to vector<24x8xf32>
    %252 = vector.extract_strided_slice %229 {offsets = [0, 40], sizes = [24, 8], strides = [1, 1]} : vector<24x96xf32> to vector<24x8xf32>
    %253 = vector.extract_strided_slice %229 {offsets = [0, 72], sizes = [24, 8], strides = [1, 1]} : vector<24x96xf32> to vector<24x8xf32>
    %254 = arith.truncf %251 : vector<24x8xf32> to vector<24x8xbf16>
    %255 = arith.truncf %252 : vector<24x8xf32> to vector<24x8xbf16>
    %cst_99 = arith.constant dense<0.000000e+00> : vector<24x24xf32>
    %256 = tpu.matmul %254, %255, %cst_99 {dimension_numbers = #tpu.dot_dimension_numbers<[1], [1], [0], [0], [0, 0, 1, 0], [], []>} : vector<24x8xbf16>, vector<24x8xbf16>, vector<24x24xf32> -> vector<24x24xf32>
    %257 = vector.broadcast %11 : vector<1x24xf32> to vector<24x24xf32>
    %258 = arith.addf %256, %257 : vector<24x24xf32>
    %cst_100 = arith.constant dense<0xFF800000> : vector<24xf32>
    %259 = vector.multi_reduction <maximumf>, %258, %cst_100 [1] : vector<24x24xf32> to vector<24xf32>
    %260 = vector.shape_cast %259 : vector<24xf32> to vector<24x1xf32>
    %261 = vector.broadcast %260 : vector<24x1xf32> to vector<24x24xf32>
    %262 = arith.subf %258, %261 : vector<24x24xf32>
    %263 = math.exp %262 : vector<24x24xf32>
    %cst_101 = arith.constant dense<0.000000e+00> : vector<24xf32>
    %264 = vector.multi_reduction <add>, %263, %cst_101 [1] : vector<24x24xf32> to vector<24xf32>
    %265 = vector.shape_cast %264 : vector<24xf32> to vector<24x1xf32>
    %266 = tpu.reciprocal %265 {approx = true} : vector<24x1xf32> -> vector<24x1xf32>
    %267 = vector.broadcast %266 : vector<24x1xf32> to vector<24x24xf32>
    %268 = arith.mulf %263, %267 : vector<24x24xf32>
    %269 = arith.truncf %268 : vector<24x24xf32> to vector<24x24xbf16>
    %270 = arith.truncf %253 : vector<24x8xf32> to vector<24x8xbf16>
    %cst_102 = arith.constant dense<0.000000e+00> : vector<24x8xf32>
    %271 = tpu.matmul %269, %270, %cst_102 {dimension_numbers = #tpu.dot_dimension_numbers<[1], [0], [0], [1], [0, 0, 1, 1], [], []>} : vector<24x24xbf16>, vector<24x8xbf16>, vector<24x8xf32> -> vector<24x8xf32>
    %272 = vector.extract_strided_slice %229 {offsets = [0, 16], sizes = [24, 8], strides = [1, 1]} : vector<24x96xf32> to vector<24x8xf32>
    %273 = vector.extract_strided_slice %229 {offsets = [0, 48], sizes = [24, 8], strides = [1, 1]} : vector<24x96xf32> to vector<24x8xf32>
    %274 = vector.extract_strided_slice %229 {offsets = [0, 80], sizes = [24, 8], strides = [1, 1]} : vector<24x96xf32> to vector<24x8xf32>
    %275 = arith.truncf %272 : vector<24x8xf32> to vector<24x8xbf16>
    %276 = arith.truncf %273 : vector<24x8xf32> to vector<24x8xbf16>
    %cst_103 = arith.constant dense<0.000000e+00> : vector<24x24xf32>
    %277 = tpu.matmul %275, %276, %cst_103 {dimension_numbers = #tpu.dot_dimension_numbers<[1], [1], [0], [0], [0, 0, 1, 0], [], []>} : vector<24x8xbf16>, vector<24x8xbf16>, vector<24x24xf32> -> vector<24x24xf32>
    %278 = vector.broadcast %11 : vector<1x24xf32> to vector<24x24xf32>
    %279 = arith.addf %277, %278 : vector<24x24xf32>
    %cst_104 = arith.constant dense<0xFF800000> : vector<24xf32>
    %280 = vector.multi_reduction <maximumf>, %279, %cst_104 [1] : vector<24x24xf32> to vector<24xf32>
    %281 = vector.shape_cast %280 : vector<24xf32> to vector<24x1xf32>
    %282 = vector.broadcast %281 : vector<24x1xf32> to vector<24x24xf32>
    %283 = arith.subf %279, %282 : vector<24x24xf32>
    %284 = math.exp %283 : vector<24x24xf32>
    %cst_105 = arith.constant dense<0.000000e+00> : vector<24xf32>
    %285 = vector.multi_reduction <add>, %284, %cst_105 [1] : vector<24x24xf32> to vector<24xf32>
    %286 = vector.shape_cast %285 : vector<24xf32> to vector<24x1xf32>
    %287 = tpu.reciprocal %286 {approx = true} : vector<24x1xf32> -> vector<24x1xf32>
    %288 = vector.broadcast %287 : vector<24x1xf32> to vector<24x24xf32>
    %289 = arith.mulf %284, %288 : vector<24x24xf32>
    %290 = arith.truncf %289 : vector<24x24xf32> to vector<24x24xbf16>
    %291 = arith.truncf %274 : vector<24x8xf32> to vector<24x8xbf16>
    %cst_106 = arith.constant dense<0.000000e+00> : vector<24x8xf32>
    %292 = tpu.matmul %290, %291, %cst_106 {dimension_numbers = #tpu.dot_dimension_numbers<[1], [0], [0], [1], [0, 0, 1, 1], [], []>} : vector<24x24xbf16>, vector<24x8xbf16>, vector<24x8xf32> -> vector<24x8xf32>
    %293 = vector.extract_strided_slice %229 {offsets = [0, 24], sizes = [24, 8], strides = [1, 1]} : vector<24x96xf32> to vector<24x8xf32>
    %294 = vector.extract_strided_slice %229 {offsets = [0, 56], sizes = [24, 8], strides = [1, 1]} : vector<24x96xf32> to vector<24x8xf32>
    %295 = vector.extract_strided_slice %229 {offsets = [0, 88], sizes = [24, 8], strides = [1, 1]} : vector<24x96xf32> to vector<24x8xf32>
    %296 = arith.truncf %293 : vector<24x8xf32> to vector<24x8xbf16>
    %297 = arith.truncf %294 : vector<24x8xf32> to vector<24x8xbf16>
    %cst_107 = arith.constant dense<0.000000e+00> : vector<24x24xf32>
    %298 = tpu.matmul %296, %297, %cst_107 {dimension_numbers = #tpu.dot_dimension_numbers<[1], [1], [0], [0], [0, 0, 1, 0], [], []>} : vector<24x8xbf16>, vector<24x8xbf16>, vector<24x24xf32> -> vector<24x24xf32>
    %299 = vector.broadcast %11 : vector<1x24xf32> to vector<24x24xf32>
    %300 = arith.addf %298, %299 : vector<24x24xf32>
    %cst_108 = arith.constant dense<0xFF800000> : vector<24xf32>
    %301 = vector.multi_reduction <maximumf>, %300, %cst_108 [1] : vector<24x24xf32> to vector<24xf32>
    %302 = vector.shape_cast %301 : vector<24xf32> to vector<24x1xf32>
    %303 = vector.broadcast %302 : vector<24x1xf32> to vector<24x24xf32>
    %304 = arith.subf %300, %303 : vector<24x24xf32>
    %305 = math.exp %304 : vector<24x24xf32>
    %cst_109 = arith.constant dense<0.000000e+00> : vector<24xf32>
    %306 = vector.multi_reduction <add>, %305, %cst_109 [1] : vector<24x24xf32> to vector<24xf32>
    %307 = vector.shape_cast %306 : vector<24xf32> to vector<24x1xf32>
    %308 = tpu.reciprocal %307 {approx = true} : vector<24x1xf32> -> vector<24x1xf32>
    %309 = vector.broadcast %308 : vector<24x1xf32> to vector<24x24xf32>
    %310 = arith.mulf %305, %309 : vector<24x24xf32>
    %311 = arith.truncf %310 : vector<24x24xf32> to vector<24x24xbf16>
    %312 = arith.truncf %295 : vector<24x8xf32> to vector<24x8xbf16>
    %cst_110 = arith.constant dense<0.000000e+00> : vector<24x8xf32>
    %313 = tpu.matmul %311, %312, %cst_110 {dimension_numbers = #tpu.dot_dimension_numbers<[1], [0], [0], [1], [0, 0, 1, 1], [], []>} : vector<24x24xbf16>, vector<24x8xbf16>, vector<24x8xf32> -> vector<24x8xf32>
    %314 = tpu.concatenate %250, %271, %292, %313 in 1 : vector<24x8xf32>, vector<24x8xf32>, vector<24x8xf32>, vector<24x8xf32> -> vector<24x32xf32>
    %315 = arith.truncf %314 : vector<24x32xf32> to vector<24x32xbf16>
    %c1_111 = arith.constant 1 : index
    %c0_112 = arith.constant 0 : index
    %c0_113 = arith.constant 0 : index
    %316 = vector.load %arg8[%c1_111, %c0_112, %c0_113] : memref<2x32x32xbf16, #tpu.memory_space<vmem>>, vector<1x32x32xbf16>
    %317 = vector.shape_cast %316 : vector<1x32x32xbf16> to vector<32x32xbf16>
    %cst_114 = arith.constant dense<0.000000e+00> : vector<24x32xf32>
    %318 = tpu.matmul %315, %317, %cst_114 {dimension_numbers = #tpu.dot_dimension_numbers<[1], [0], [0], [1], [0, 0, 1, 1], [], []>} : vector<24x32xbf16>, vector<32x32xbf16>, vector<24x32xf32> -> vector<24x32xf32>
    %319 = arith.addf %195, %318 : vector<24x32xf32>
    %c1_115 = arith.constant 1 : index
    %c0_116 = arith.constant 0 : index
    %c0_117 = arith.constant 0 : index
    %320 = vector.load %arg9[%c1_115, %c0_116, %c0_117] : memref<2x1x32xf32, #tpu.memory_space<vmem>>, vector<1x1x32xf32>
    %321 = vector.shape_cast %320 : vector<1x1x32xf32> to vector<1x32xf32>
    %322 = vector.broadcast %321 : vector<1x32xf32> to vector<24x32xf32>
    %323 = arith.addf %319, %322 : vector<24x32xf32>
    %c1_118 = arith.constant 1 : index
    %c0_119 = arith.constant 0 : index
    %c0_120 = arith.constant 0 : index
    %324 = vector.load %arg10[%c1_118, %c0_119, %c0_120] : memref<2x1x32xf32, #tpu.memory_space<vmem>>, vector<1x1x32xf32>
    %325 = vector.shape_cast %324 : vector<1x1x32xf32> to vector<1x32xf32>
    %c1_121 = arith.constant 1 : index
    %c0_122 = arith.constant 0 : index
    %c0_123 = arith.constant 0 : index
    %326 = vector.load %arg11[%c1_121, %c0_122, %c0_123] : memref<2x1x32xf32, #tpu.memory_space<vmem>>, vector<1x1x32xf32>
    %327 = vector.shape_cast %326 : vector<1x1x32xf32> to vector<1x32xf32>
    %cst_124 = arith.constant dense<0.000000e+00> : vector<24xf32>
    %328 = vector.multi_reduction <add>, %323, %cst_124 [1] : vector<24x32xf32> to vector<24xf32>
    %329 = vector.shape_cast %328 : vector<24xf32> to vector<24x1xf32>
    %cst_125 = arith.constant 3.200000e+01 : f32
    %330 = vector.broadcast %cst_125 : f32 to vector<24x1xf32>
    %331 = arith.divf %329, %330 : vector<24x1xf32>
    %332 = vector.broadcast %331 : vector<24x1xf32> to vector<24x32xf32>
    %333 = arith.subf %323, %332 : vector<24x32xf32>
    %334 = arith.mulf %333, %333 : vector<24x32xf32>
    %cst_126 = arith.constant dense<0.000000e+00> : vector<24xf32>
    %335 = vector.multi_reduction <add>, %334, %cst_126 [1] : vector<24x32xf32> to vector<24xf32>
    %336 = vector.shape_cast %335 : vector<24xf32> to vector<24x1xf32>
    %cst_127 = arith.constant 3.200000e+01 : f32
    %337 = vector.broadcast %cst_127 : f32 to vector<24x1xf32>
    %338 = arith.divf %336, %337 : vector<24x1xf32>
    %339 = vector.broadcast %331 : vector<24x1xf32> to vector<24x32xf32>
    %340 = arith.subf %323, %339 : vector<24x32xf32>
    %cst_128 = arith.constant 9.99999997E-7 : f32
    %341 = vector.broadcast %cst_128 : f32 to vector<24x1xf32>
    %342 = arith.addf %338, %341 : vector<24x1xf32>
    %343 = math.rsqrt %342 : vector<24x1xf32>
    %344 = vector.broadcast %343 : vector<24x1xf32> to vector<24x32xf32>
    %345 = arith.mulf %340, %344 : vector<24x32xf32>
    %346 = vector.broadcast %325 : vector<1x32xf32> to vector<24x32xf32>
    %347 = arith.mulf %345, %346 : vector<24x32xf32>
    %348 = vector.broadcast %327 : vector<1x32xf32> to vector<24x32xf32>
    %349 = arith.addf %347, %348 : vector<24x32xf32>
    %350 = arith.truncf %349 : vector<24x32xf32> to vector<24x32xbf16>
    %c1_129 = arith.constant 1 : index
    %c0_130 = arith.constant 0 : index
    %c0_131 = arith.constant 0 : index
    %351 = vector.load %arg12[%c1_129, %c0_130, %c0_131] : memref<2x32x128xbf16, #tpu.memory_space<vmem>>, vector<1x32x128xbf16>
    %352 = vector.shape_cast %351 : vector<1x32x128xbf16> to vector<32x128xbf16>
    %cst_132 = arith.constant dense<0.000000e+00> : vector<24x128xf32>
    %353 = tpu.matmul %350, %352, %cst_132 {dimension_numbers = #tpu.dot_dimension_numbers<[1], [0], [0], [1], [0, 0, 1, 1], [], []>} : vector<24x32xbf16>, vector<32x128xbf16>, vector<24x128xf32> -> vector<24x128xf32>
    %c1_133 = arith.constant 1 : index
    %c0_134 = arith.constant 0 : index
    %c0_135 = arith.constant 0 : index
    %354 = vector.load %arg13[%c1_133, %c0_134, %c0_135] : memref<2x1x128xf32, #tpu.memory_space<vmem>>, vector<1x1x128xf32>
    %355 = vector.shape_cast %354 : vector<1x1x128xf32> to vector<1x128xf32>
    %356 = vector.broadcast %355 : vector<1x128xf32> to vector<24x128xf32>
    %357 = arith.addf %353, %356 : vector<24x128xf32>
    %cst_136 = arith.constant 5.000000e-01 : f32
    %358 = vector.broadcast %cst_136 : f32 to vector<24x128xf32>
    %359 = arith.mulf %358, %357 : vector<24x128xf32>
    %cst_137 = arith.constant 4.471500e-02 : f32
    %360 = vector.broadcast %cst_137 : f32 to vector<24x128xf32>
    %361 = arith.mulf %360, %357 : vector<24x128xf32>
    %362 = arith.mulf %361, %357 : vector<24x128xf32>
    %363 = arith.mulf %362, %357 : vector<24x128xf32>
    %364 = arith.addf %357, %363 : vector<24x128xf32>
    %cst_138 = arith.constant 0.797884583 : f32
    %365 = vector.broadcast %cst_138 : f32 to vector<24x128xf32>
    %366 = arith.mulf %365, %364 : vector<24x128xf32>
    %367 = math.tanh %366 : vector<24x128xf32>
    %cst_139 = arith.constant 1.000000e+00 : f32
    %368 = vector.broadcast %cst_139 : f32 to vector<24x128xf32>
    %369 = arith.addf %368, %367 : vector<24x128xf32>
    %370 = arith.mulf %359, %369 : vector<24x128xf32>
    %371 = arith.truncf %370 : vector<24x128xf32> to vector<24x128xbf16>
    %c1_140 = arith.constant 1 : index
    %c0_141 = arith.constant 0 : index
    %c0_142 = arith.constant 0 : index
    %372 = vector.load %arg14[%c1_140, %c0_141, %c0_142] : memref<2x128x32xbf16, #tpu.memory_space<vmem>>, vector<1x128x32xbf16>
    %373 = vector.shape_cast %372 : vector<1x128x32xbf16> to vector<128x32xbf16>
    %cst_143 = arith.constant dense<0.000000e+00> : vector<24x32xf32>
    %374 = tpu.matmul %371, %373, %cst_143 {dimension_numbers = #tpu.dot_dimension_numbers<[1], [0], [0], [1], [0, 0, 1, 1], [], []>} : vector<24x128xbf16>, vector<128x32xbf16>, vector<24x32xf32> -> vector<24x32xf32>
    %c1_144 = arith.constant 1 : index
    %c0_145 = arith.constant 0 : index
    %c0_146 = arith.constant 0 : index
    %375 = vector.load %arg15[%c1_144, %c0_145, %c0_146] : memref<2x1x32xf32, #tpu.memory_space<vmem>>, vector<1x1x32xf32>
    %376 = vector.shape_cast %375 : vector<1x1x32xf32> to vector<1x32xf32>
    %377 = vector.broadcast %376 : vector<1x32xf32> to vector<24x32xf32>
    %378 = arith.addf %374, %377 : vector<24x32xf32>
    %379 = arith.addf %323, %378 : vector<24x32xf32>
    %380 = vector.extract_strided_slice %379 {offsets = [0, 0], sizes = [8, 32], strides = [1, 1]} : vector<24x32xf32> to vector<8x32xf32>
    %c0_147 = arith.constant 0 : index
    %c0_148 = arith.constant 0 : index
    %381 = vector.load %arg16[%c0_147, %c0_148] : memref<1x32xf32, #tpu.memory_space<vmem>>, vector<1x32xf32>
    %c0_149 = arith.constant 0 : index
    %c0_150 = arith.constant 0 : index
    %382 = vector.load %arg17[%c0_149, %c0_150] : memref<1x32xf32, #tpu.memory_space<vmem>>, vector<1x32xf32>
    %cst_151 = arith.constant dense<0.000000e+00> : vector<8xf32>
    %383 = vector.multi_reduction <add>, %380, %cst_151 [1] : vector<8x32xf32> to vector<8xf32>
    %384 = vector.shape_cast %383 : vector<8xf32> to vector<8x1xf32>
    %cst_152 = arith.constant 3.200000e+01 : f32
    %385 = vector.broadcast %cst_152 : f32 to vector<8x1xf32>
    %386 = arith.divf %384, %385 : vector<8x1xf32>
    %387 = vector.broadcast %386 : vector<8x1xf32> to vector<8x32xf32>
    %388 = arith.subf %380, %387 : vector<8x32xf32>
    %389 = arith.mulf %388, %388 : vector<8x32xf32>
    %cst_153 = arith.constant dense<0.000000e+00> : vector<8xf32>
    %390 = vector.multi_reduction <add>, %389, %cst_153 [1] : vector<8x32xf32> to vector<8xf32>
    %391 = vector.shape_cast %390 : vector<8xf32> to vector<8x1xf32>
    %cst_154 = arith.constant 3.200000e+01 : f32
    %392 = vector.broadcast %cst_154 : f32 to vector<8x1xf32>
    %393 = arith.divf %391, %392 : vector<8x1xf32>
    %394 = vector.broadcast %386 : vector<8x1xf32> to vector<8x32xf32>
    %395 = arith.subf %380, %394 : vector<8x32xf32>
    %cst_155 = arith.constant 9.99999997E-7 : f32
    %396 = vector.broadcast %cst_155 : f32 to vector<8x1xf32>
    %397 = arith.addf %393, %396 : vector<8x1xf32>
    %398 = math.rsqrt %397 : vector<8x1xf32>
    %399 = vector.broadcast %398 : vector<8x1xf32> to vector<8x32xf32>
    %400 = arith.mulf %395, %399 : vector<8x32xf32>
    %401 = vector.broadcast %381 : vector<1x32xf32> to vector<8x32xf32>
    %402 = arith.mulf %400, %401 : vector<8x32xf32>
    %403 = vector.broadcast %382 : vector<1x32xf32> to vector<8x32xf32>
    %404 = arith.addf %402, %403 : vector<8x32xf32>
    %405 = arith.truncf %404 : vector<8x32xf32> to vector<8x32xbf16>
    %c0_156 = arith.constant 0 : index
    %c0_157 = arith.constant 0 : index
    %406 = vector.load %arg18[%c0_156, %c0_157] : memref<32x128xbf16, #tpu.memory_space<vmem>>, vector<32x128xbf16>
    %cst_158 = arith.constant dense<0.000000e+00> : vector<8x128xf32>
    %407 = tpu.matmul %405, %406, %cst_158 {dimension_numbers = #tpu.dot_dimension_numbers<[1], [0], [0], [1], [0, 0, 1, 1], [], []>} : vector<8x32xbf16>, vector<32x128xbf16>, vector<8x128xf32> -> vector<8x128xf32>
    %c0_159 = arith.constant 0 : index
    %c0_160 = arith.constant 0 : index
    %408 = vector.load %arg19[%c0_159, %c0_160] : memref<1x128xf32, #tpu.memory_space<vmem>>, vector<1x128xf32>
    %409 = vector.broadcast %408 : vector<1x128xf32> to vector<8x128xf32>
    %410 = arith.addf %407, %409 : vector<8x128xf32>
    %c0_161 = arith.constant 0 : index
    %c0_162 = arith.constant 0 : index
    %c0_163 = arith.constant 0 : index
    %411 = vector.load %arg20[%c0_161, %c0_162, %c0_163] : memref<1x8x128xf32, #tpu.memory_space<vmem>>, vector<1x8x128xf32>
    %412 = vector.shape_cast %411 : vector<1x8x128xf32> to vector<8x128xf32>
    %413 = vector.shape_cast %410 : vector<8x128xf32> to vector<1x8x128xf32>
    tpu.vector_store %arg20[%c0_161, %c0_162, %c0_163], %413 {strides = array<i32>} : memref<1x8x128xf32, #tpu.memory_space<vmem>>, vector<1x8x128xf32>,
    return
  }
  func.func @transform_0(%arg0: i32) -> (i32, i32, i32) {
    %c0_i32 = arith.constant 0 : i32
    %c0_i32_0 = arith.constant 0 : i32
    %c0_i32_1 = arith.constant 0 : i32
    return %arg0, %c0_i32, %c0_i32_0 : i32, i32, i32
  }
  func.func @transform_1(%arg0: i32) -> (i32, i32) {
    %c0_i32 = arith.constant 0 : i32
    %c0_i32_0 = arith.constant 0 : i32
    %c0_i32_1 = arith.constant 0 : i32
    return %c0_i32, %c0_i32_0 : i32, i32
  }
  func.func @transform_2(%arg0: i32) -> (i32, i32) {
    %c0_i32 = arith.constant 0 : i32
    %c0_i32_0 = arith.constant 0 : i32
    %c0_i32_1 = arith.constant 0 : i32
    return %c0_i32, %c0_i32_0 : i32, i32
  }
  func.func @transform_3(%arg0: i32) -> (i32, i32, i32) {
    %c0_i32 = arith.constant 0 : i32
    %c0_i32_0 = arith.constant 0 : i32
    %c0_i32_1 = arith.constant 0 : i32
    %c0_i32_2 = arith.constant 0 : i32
    return %c0_i32, %c0_i32_0, %c0_i32_1 : i32, i32, i32
  }
  func.func @transform_4(%arg0: i32) -> (i32, i32, i32) {
    %c0_i32 = arith.constant 0 : i32
    %c0_i32_0 = arith.constant 0 : i32
    %c0_i32_1 = arith.constant 0 : i32
    %c0_i32_2 = arith.constant 0 : i32
    return %c0_i32, %c0_i32_0, %c0_i32_1 : i32, i32, i32
  }
  func.func @transform_5(%arg0: i32) -> (i32, i32, i32) {
    %c0_i32 = arith.constant 0 : i32
    %c0_i32_0 = arith.constant 0 : i32
    %c0_i32_1 = arith.constant 0 : i32
    %c0_i32_2 = arith.constant 0 : i32
    return %c0_i32, %c0_i32_0, %c0_i32_1 : i32, i32, i32
  }
  func.func @transform_6(%arg0: i32) -> (i32, i32, i32) {
    %c0_i32 = arith.constant 0 : i32
    %c0_i32_0 = arith.constant 0 : i32
    %c0_i32_1 = arith.constant 0 : i32
    %c0_i32_2 = arith.constant 0 : i32
    return %c0_i32, %c0_i32_0, %c0_i32_1 : i32, i32, i32
  }
  func.func @transform_7(%arg0: i32) -> (i32, i32, i32) {
    %c0_i32 = arith.constant 0 : i32
    %c0_i32_0 = arith.constant 0 : i32
    %c0_i32_1 = arith.constant 0 : i32
    %c0_i32_2 = arith.constant 0 : i32
    return %c0_i32, %c0_i32_0, %c0_i32_1 : i32, i32, i32
  }
  func.func @transform_8(%arg0: i32) -> (i32, i32, i32) {
    %c0_i32 = arith.constant 0 : i32
    %c0_i32_0 = arith.constant 0 : i32
    %c0_i32_1 = arith.constant 0 : i32
    %c0_i32_2 = arith.constant 0 : i32
    return %c0_i32, %c0_i32_0, %c0_i32_1 : i32, i32, i32
  }
  func.func @transform_9(%arg0: i32) -> (i32, i32, i32) {
    %c0_i32 = arith.constant 0 : i32
    %c0_i32_0 = arith.constant 0 : i32
    %c0_i32_1 = arith.constant 0 : i32
    %c0_i32_2 = arith.constant 0 : i32
    return %c0_i32, %c0_i32_0, %c0_i32_1 : i32, i32, i32
  }
  func.func @transform_10(%arg0: i32) -> (i32, i32, i32) {
    %c0_i32 = arith.constant 0 : i32
    %c0_i32_0 = arith.constant 0 : i32
    %c0_i32_1 = arith.constant 0 : i32
    %c0_i32_2 = arith.constant 0 : i32
    return %c0_i32, %c0_i32_0, %c0_i32_1 : i32, i32, i32
  }
  func.func @transform_11(%arg0: i32) -> (i32, i32, i32) {
    %c0_i32 = arith.constant 0 : i32
    %c0_i32_0 = arith.constant 0 : i32
    %c0_i32_1 = arith.constant 0 : i32
    %c0_i32_2 = arith.constant 0 : i32
    return %c0_i32, %c0_i32_0, %c0_i32_1 : i32, i32, i32
  }
  func.func @transform_12(%arg0: i32) -> (i32, i32, i32) {
    %c0_i32 = arith.constant 0 : i32
    %c0_i32_0 = arith.constant 0 : i32
    %c0_i32_1 = arith.constant 0 : i32
    %c0_i32_2 = arith.constant 0 : i32
    return %c0_i32, %c0_i32_0, %c0_i32_1 : i32, i32, i32
  }
  func.func @transform_13(%arg0: i32) -> (i32, i32, i32) {
    %c0_i32 = arith.constant 0 : i32
    %c0_i32_0 = arith.constant 0 : i32
    %c0_i32_1 = arith.constant 0 : i32
    %c0_i32_2 = arith.constant 0 : i32
    return %c0_i32, %c0_i32_0, %c0_i32_1 : i32, i32, i32
  }
  func.func @transform_14(%arg0: i32) -> (i32, i32, i32) {
    %c0_i32 = arith.constant 0 : i32
    %c0_i32_0 = arith.constant 0 : i32
    %c0_i32_1 = arith.constant 0 : i32
    %c0_i32_2 = arith.constant 0 : i32
    return %c0_i32, %c0_i32_0, %c0_i32_1 : i32, i32, i32
  }
  func.func @transform_15(%arg0: i32) -> (i32, i32) {
    %c0_i32 = arith.constant 0 : i32
    %c0_i32_0 = arith.constant 0 : i32
    %c0_i32_1 = arith.constant 0 : i32
    return %c0_i32, %c0_i32_0 : i32, i32
  }
  func.func @transform_16(%arg0: i32) -> (i32, i32) {
    %c0_i32 = arith.constant 0 : i32
    %c0_i32_0 = arith.constant 0 : i32
    %c0_i32_1 = arith.constant 0 : i32
    return %c0_i32, %c0_i32_0 : i32, i32
  }
  func.func @transform_17(%arg0: i32) -> (i32, i32) {
    %c0_i32 = arith.constant 0 : i32
    %c0_i32_0 = arith.constant 0 : i32
    %c0_i32_1 = arith.constant 0 : i32
    return %c0_i32, %c0_i32_0 : i32, i32
  }
  func.func @transform_18(%arg0: i32) -> (i32, i32) {
    %c0_i32 = arith.constant 0 : i32
    %c0_i32_0 = arith.constant 0 : i32
    %c0_i32_1 = arith.constant 0 : i32
    return %c0_i32, %c0_i32_0 : i32, i32
  }
  func.func @transform_19(%arg0: i32) -> (i32, i32, i32) {
    %c0_i32 = arith.constant 0 : i32
    %c0_i32_0 = arith.constant 0 : i32
    %c0_i32_1 = arith.constant 0 : i32
    return %arg0, %c0_i32, %c0_i32_0 : i32, i32, i32
  }
}

</mosaic_0001>

<bundles_post_ra>
// kernel: vit_forward.1
= control target key start
LH: loop header
LB: loop body
LE: loop exit
PB: predicated region body
PF: predicated region fallthrough
CT: control target
= control target key end

     0   :  { %s4796_s0 = inlined_call_operand.vmem [shape: bf16[2,24,64], index: 0, kind: input, shape index: {}]   ;;  %s4797_s1 = inlined_call_operand.vmem [shape: bf16[64,32], index: 1, kind: input, shape index: {}]   ;;  %s4798_s2 = inlined_call_operand.vmem [shape: f32[24,32], index: 2, kind: input, shape index: {}]   ;;  %s4799_s3 = inlined_call_operand.vmem [shape: f32[2,1,32], index: 3, kind: input, shape index: {}]   ;;  %s4800_s4 = inlined_call_operand.vmem [shape: f32[2,1,32], index: 4, kind: input, shape index: {}]   ;;  %s4801_s5 = inlined_call_operand.vmem [shape: bf16[2,32,96], index: 5, kind: input, shape index: {}]   ;;  %s4802_s6 = inlined_call_operand.vmem [shape: f32[2,1,96], index: 6, kind: input, shape index: {}]   ;;  %s4803_s7 = inlined_call_operand.vmem [shape: bf16[2,32,32], index: 7, kind: input, shape index: {}]   ;;  %s4804_s8 = inlined_call_operand.vmem [shape: f32[2,1,32], index: 8, kind: input, shape index: {}]   ;;  %s4805_s9 = inlined_call_operand.vmem [shape: f32[2,1,32], index: 9, kind: input, shape index: {}]   ;;  %s4806_s10 = inlined_call_operand.vmem [shape: f32[2,1,32], index: 10, kind: input, shape index: {}]   ;;  %s4807_s11 = inlined_call_operand.vmem [shape: bf16[2,32,128], index: 11, kind: input, shape index: {}]   ;;  %s4808_s12 = inlined_call_operand.vmem [shape: f32[2,1,128], index: 12, kind: input, shape index: {}]   ;;  %s4809_s13 = inlined_call_operand.vmem [shape: bf16[2,128,32], index: 13, kind: input, shape index: {}]   ;;  %s4810_s14 = inlined_call_operand.vmem [shape: f32[2,1,32], index: 14, kind: input, shape index: {}]   ;;  %s4811_s15 = inlined_call_operand.vmem [shape: f32[1,32], index: 15, kind: input, shape index: {}]   ;;  %s4812_s16 = inlined_call_operand.vmem [shape: f32[1,32], index: 16, kind: input, shape index: {}]   ;;  %s4813_s17 = inlined_call_operand.vmem [shape: bf16[32,128], index: 17, kind: input, shape index: {}]   ;;  %s4814_s18 = inlined_call_operand.vmem [shape: f32[1,128], index: 18, kind: input, shape index: {}]   ;;  %s4815_s19 = inlined_call_operand.vmem [shape: f32[2,8,128], index: 19, kind: output, shape index: {}]  }
   0x1   :  { %4843 = sst [smem:[#allocation2_spill]] %s4796_s0  ;;  %s4180_s0 = smov 0  }
   0x2   :  { %4844 = sst [smem:[#allocation3_spill]] %s4797_s1 }
   0x3   :  { %4845 = sst [smem:[#allocation4_spill]] %s4798_s2 }
   0x4   :  { %4846 = sst [smem:[#allocation5_spill]] %s4799_s3 }
   0x5 LB: > { %s3305_s30 = sadd.s32 4294967295, %s4061_s0   ;;  %p3309_p0 = scmp.ge.s32.totalorder %s4061_s0, 1  ;;  %s4061_s0 = sphi %s4180_s0, %s29_s0  }
   0x6   : > { %p537_p1 = scmp.lt.s32.totalorder %s4061_s0, 3 }
   0x8   : > { %p538_p2 = pnand %p3309_p0, %p537_p1 }
   0x9   : > { %s4847_s1 = sld [smem:[#allocation3_spill]] (!%p538_p2)  ;;  %p592_p3 = scmp.lt.s32.totalorder (!%p538_p2), %s3305_s30, 1  ;;  %vm648_vm0 = vcmask (!%p538_p2), 523264   ;;  %vm709_vm1 = vcmask (!%p538_p2), 261120   ;;  %v3891_v34 = vld [vmem:[%s4801_s5] sm:$0xff] (!%p538_p2)   ;;  %v3892_v35 = vld [vmem:[%s4801_s5 + $0x8] sm:$0xff] (!%p538_p2)  }
   0xa   : > { %541 = sbr.rel (%p538_p2) target bundleno = 8710 (0x2206), region = 96  ;;  %s4848_s27 = sld [smem:[#allocation2_spill]] (!%p538_p2)  ;;  %v3321_v53 = vld [vmem:[%s4800_s4] ss:$0 sm:$0xff] (!%p538_p2)  ;;  %vm855_vm2 = vcmask (!%p538_p2), 64512   ;;  %vm916_vm4 = vcmask (!%p538_p2), 195584  }
   0xb   : > { %s4849_s2 = sld [smem:[#allocation4_spill]] (!%p538_p2)  ;;  %s4850_s22 = sld [smem:[#allocation5_spill]] (!%p538_p2)  ;;  %v3322_v61 = vld [vmem:[%s4802_s6] ss:$0 sm:$0xff] (!%p538_p2)  ;;  %vm963_vm5 = vcmask (!%p538_p2), 1043456   ;;  %vm1549_vm6 = vcmask (!%p538_p2), 130048  }
   0xc   : > { %s4063_s26 = smov (!%p538_p2), 96   ;;  %s4067_s29 = smov (!%p538_p2), 88   ;;  %vm4079_vm7 = vmmov (!%p538_p2), 0  }
   0xd   : > { %s4837_s20 = smov (!%p538_p2), 56   ;;  %s4833_s21 = smov (!%p538_p2), 80  }
   0xe   : > { %s4831_s23 = smov (!%p538_p2), 112   ;;  %s4823_s24 = smov (!%p538_p2), 48  }
   0xf   : > { %v3885_v0 = vld [vmem:[%s4847_s1] sm:$0xff] (!%p538_p2)   ;;  %v3886_v1 = vld [vmem:[%s4847_s1 + $0x8] sm:$0xff] (!%p538_p2)   ;;  %v3887_v2 = vld [vmem:[%s4847_s1 + $0x10] sm:$0xff] (!%p538_p2)   ;;  %s4819_s3 = smov (!%p538_p2), 104  }
  0x10   : > { %3569 = vmatprep.subr.bf16.mxu1 (!%p538_p2), %v3885_v0  ;;  %v3888_v3 = vld [vmem:[%s4847_s1 + $0x18] sm:$0xff] (!%p538_p2)  }
  0x11   : > { %s4864_s30 = smov (!%p592_p3, %s3305_s30), 1  ;;  %3570 = vmatpush3.bf16.msra.mxu1 %v3885_v0  ;;  %v615_v6 = vld [vmem:[%s4849_s2 + $0x10] sm:$0xff]  ;;  %v613_v7 = vld [vmem:[%s4849_s2] sm:$0xff]  ;;  %v614_v11 = vld [vmem:[%s4849_s2 + $0x8] sm:$0xff] }
  0x12   : > { %3571 = vmatprep.subr.bf16.mxu1 %v3886_v1  ;;  %s3829_s25 = smul.u32 12, %s4864_s30  ;;  %v3320_v47 = vld [vmem:[%s4850_s22] ss:$0 sm:$0xff] }
  0x14   : > { %s596_s28 = scalar_lea.vmem %s4848_s27, %s3829_s25  ;;  %s4839_s27 = smov 64  }
  0x15   : > { %3572 = vmatpush3.bf16.msra.mxu1 %v3886_v1  ;;  %v3889_v4 = vld [vmem:[%s596_s28] sm:$0xff]   ;;  %v3890_v5 = vld [vmem:[%s596_s28 + $0x8] ss:$0 sps:$4 sm:$0xff]   ;;  %s4841_s28 = smov 120   ;;  %s4821_s25 = smov 72  }
  0x16   : > { %3573 = vmatprep.subr.bf16.mxu1 %v3887_v2  ;;  %3577 = vmatprep.mubr.msk.bf16.mxu1 %vm648_vm0, %v3889_v4 }
  0x19   : > { %3574 = vmatpush3.bf16.msra.mxu1 %v3887_v2 }
  0x1a   : > { %3575 = vmatprep.subr.bf16.mxu1 %v3888_v3 }
  0x1d   : > { %3576 = vmatpush3.bf16.msra.mxu1 %v3888_v3 }
  0x1e   : > { %3581 = vmatprep.subr.bf16.mxu1 %v3891_v34 }
  0x20   : > { %3578 = vmatmul.mubr.msk.bf16.vlgmr.msra.gmra.mrb[0].mxu1 %vm648_vm0, %v3890_v5 }
  0x21   : > { %3582 = vmatpush3.bf16.msra.mxu1 %v3891_v34 }
  0x22   : > { %3583 = vmatprep.subr.bf16.mxu1 %v3892_v35 }
  0x25   : > { %3584 = vmatpush3.bf16.msra.mxu1 %v3892_v35 }
  0xf3   : > { %v3579_v8 = vpop.f32.mrb[0].mxu1 }
  0xf4   : > { %v4212_v9 = vadd.f32 %v3579_v8, %v615_v6  ;;  %v689_v10 = vpop.f32.mrb[1].mxu1 }
  0xf5   : > { %v4217_v12 = vadd.f32 %v689_v10, %v613_v7  ;;  %v3580_v13 = vpop.f32.mrb[2].mxu1 }
  0xf6   : > { %v692_v14 = vpop.f32.mrb[3].mxu1  ;;  %v716_v15 = vsel %vm709_vm1, %v4212_v9, 0.0  ;;  %v703_v13 = vlaneseq }
  0xf7   : > { %v4221_v16 = vadd.f32 %v692_v14, %v614_v11  ;;  %717 = vadd.xlane.f32.xlu1 %v716_v15  ;;  %v710_v17 = vsel %vm709_vm1, %v4217_v12, 0.0  ;;  %v4064_v15 = vmov -1e+09  }
  0xf8   : > { %711 = vadd.xlane.f32.xlu0 %v710_v17  ;;  %v704_v14 = vand.u32 127, %v703_v13 }
  0xf9   : > { %v713_v18 = vsel %vm709_vm1, %v4221_v16, 0.0 }
  0xfa   : > { %vm705_vm3 = vcmp.lt.s32.totalorder %v704_v14, 17 }
  0xfb   : > { %v4266_v17 = vsel %vm705_vm3, 0.0, %v4064_v15 }
  0xfc   : > { %714 = vadd.xlane.f32.xlu0 %v713_v18 }
 0x184   : > { %v718_v19 = vpop.xlane.xlu1 %717 }
 0x185   : > { %v722_v20 = vmul.f32 0.03125, %v718_v19  ;;  %v712_v21 = vpop.xlane.xlu0 %711 }
 0x186   : > { %v720_v22 = vmul.f32 0.03125, %v712_v21 }
 0x187   : > { %v725_v23 = vsub.f32 %v4212_v9, %v722_v20 }
 0x188   : > { %v723_v24 = vsub.f32 %v4217_v12, %v720_v22 }
 0x189   : > { %v715_v25 = vpop.xlane.xlu0 %714  ;;  %v728_v30 = vmul.f32 %v725_v23, %v725_v23 }
 0x18a   : > { %v721_v26 = vmul.f32 0.03125, %v715_v25  ;;  %v726_v27 = vmul.f32 %v723_v24, %v723_v24 }
 0x18b   : > { %v735_v32 = vsel %vm709_vm1, %v728_v30, 0.0 }
 0x18c   : > { %v724_v28 = vsub.f32 %v4221_v16, %v721_v26  ;;  %v729_v29 = vsel %vm709_vm1, %v726_v27, 0.0 }
 0x18d   : > { %730 = vadd.xlane.f32.xlu1 %v729_v29 }
 0x18e   : > { %v727_v31 = vmul.f32 %v724_v28, %v724_v28 }
 0x190   : > { %v732_v33 = vsel %vm709_vm1, %v727_v31, 0.0 }
 0x191   : > { %736 = vadd.xlane.f32.xlu1 %v735_v32  ;;  %733 = vadd.xlane.f32.xlu0 %v732_v33 }
 0x21a   : > { %v731_v36 = vpop.xlane.xlu1 %730 }
 0x21b   : > { %v738_v37 = vmul.f32 0.03125, %v731_v36 }
 0x21d   : > { %v741_v38 = vadd.f32 1e-06, %v738_v37 }
 0x21e   : > { %v737_v39 = vpop.xlane.xlu1 %736  ;;  %v734_v40 = vpop.xlane.xlu0 %733 }
 0x21f   : > { %3921 = vrsqrt.f32 %v741_v38  ;;  %v740_v41 = vmul.f32 0.03125, %v737_v39  ;;  %v739_v42 = vmul.f32 0.03125, %v734_v40 }
 0x221   : > { %v743_v43 = vadd.f32 1e-06, %v740_v41  ;;  %v742_v44 = vadd.f32 1e-06, %v739_v42 }
 0x223   : > { %3923 = vrsqrt.f32 %v743_v43 }
 0x224   : > { %3925 = vrsqrt.f32 %v742_v44 }
 0x229   : > { %v3922_v45 = vpop.eup %3921 }
 0x22a   : > { %v747_v46 = vmul.f32 %v3922_v45, %v723_v24 }
 0x22c   : > { %v756_v52 = vmul.f32 %v3320_v47, %v747_v46 }
 0x22d   : > { %v3924_v48 = vpop.eup %3923 }
 0x22e   : > { %v3926_v49 = vpop.eup %3925  ;;  %v749_v50 = vmul.f32 %v3924_v48, %v725_v23  ;;  %v765_v57 = vadd.f32 %v3321_v53, %v756_v52 }
 0x22f   : > { %v748_v51 = vmul.f32 %v3926_v49, %v724_v28 }
 0x230   : > { %v758_v54 = vmul.f32 %v3320_v47, %v749_v50 }
 0x231   : > { %v757_v55 = vmul.f32 %v3320_v47, %v748_v51 }
 0x232   : > { %v767_v56 = vadd.f32 %v3321_v53, %v758_v54 }
 0x233   : > { %v766_v58 = vadd.f32 %v3321_v53, %v757_v55 }
 0x234   : > { %v769_v59 = vpack.c.bf16 %v767_v56, %v767_v56 }
 0x235   : > { %v768_v60 = vpack.c.bf16 %v766_v58, %v765_v57 }
 0x237   : > { %3585 = vmatprep.mubr.msk.bf16.mxu1 %vm709_vm1, %v768_v60 }
 0x238   : > { %3586 = vmatmul.mubr.msk.bf16.vlgmr.msra.gmra.mrb[4].mxu1 %vm709_vm1, %v769_v59 }
 0x30b   : > { %v3587_v62 = vpop.f32.mrb[4].mxu1 }
 0x30c   : > { %v842_v63 = vadd.f32 %v3587_v62, %v3322_v61  ;;  %v833_v0 = vpop.f32.mrb[5].mxu1 }
 0x30d   : > { %v3588_v1 = vpop.f32.mrb[6].mxu1  ;;  %v834_v4 = vadd.f32 %v3322_v61, %v833_v0 }
 0x30e   : > { %v4250_v2 = vpack.c.bf16 %v842_v63, %v842_v63  ;;  %v836_v3 = vpop.f32.mrb[7].mxu1 }
 0x30f   : > { %v837_v5 = vadd.f32 %v3322_v61, %v836_v3 }
 0x310   : > { %853 = vrot.lane.b32.xlu1 %v4250_v2, %s4063_s26 }
 0x311   : > { %v4254_v6 = vpack.c.bf16 %v837_v5, %v834_v4 }
 0x313   : > { %851 = vrot.lane.b32.xlu0 %v4254_v6, %s4063_s26  ;;  %3593 = vmatprep.mubr.msk.bf16.mxu1 %vm855_vm2, %v4254_v6 }
 0x382   : > { %v854_v10 = vpop.permute.xlu1 %853 }
 0x383   : > { %v866_v11 = vsel %vm855_vm2, %v854_v10, 0 }
 0x385   : > { %v852_v7 = vpop.permute.xlu0 %851 }
 0x386   : > { %3805 = vmatprep.subr.msk.bf16.mxu1 %vm855_vm2, %v852_v7  ;;  %v863_v8 = vsel %vm855_vm2, %v852_v7, 0 }
 0x387   : > { %3590 = vmatpush3.bf16.xpose.msra.mxu1 %v863_v8 }
 0x388   : > { %3806 = vmatprep.subr.msk.bf16.mxu1 %vm855_vm2, %v854_v10 }
 0x38f   : > { %3592 = vmatpush3.bf16.xpose.msra.mxu1 %v866_v11 }
 0x396   : > { %3594 = vmatmul.mubr.msk.bf16.vlgmr.msra.gmra.mrb[8].mxu1 %vm855_vm2, %v4250_v2 }
 0x469   : > { %v3595_v18 = vpop.f32.mrb[8].mxu1 }
 0x46a   : > { %v902_v19 = vpop.f32.mrb[9].mxu1  ;;  %v911_v25 = vadd.f32 %v3595_v18, %v4266_v17 }
 0x46b   : > { %v903_v20 = vadd.f32 %v902_v19, %v4266_v17  ;;  %v3596_v21 = vpop.f32.mrb[10].mxu1 }
 0x46c   : > { %v905_v22 = vpop.f32.mrb[11].mxu1  ;;  %v923_v27 = vsel %vm916_vm4, %v911_v25, -inf }
 0x46d   : > { %v906_v23 = vadd.f32 %v905_v22, %v4266_v17  ;;  %v917_v24 = vsel %vm916_vm4, %v903_v20, -inf }
 0x46e   : > { %918 = vmax.xlane.f32.xlu1 %v917_v24 }
 0x46f   : > { %v920_v26 = vsel %vm916_vm4, %v906_v23, -inf }
 0x470   : > { %921 = vmax.xlane.f32.xlu0 %v920_v26 }
 0x474   : > { %924 = vmax.xlane.f32.xlu0 %v923_v27 }
 0x4fb   : > { %v919_v28 = vpop.xlane.xlu1 %918 }
 0x4fc   : > { %v926_v31 = vsub.f32 %v903_v20, %v919_v28 }
 0x4fd   : > { %v922_v29 = vpop.xlane.xlu0 %921 }
 0x4fe   : > { %v927_v30 = vsub.f32 %v906_v23, %v922_v29  ;;  %v929_v35 = vmul.f32 1.442695, %v926_v31 }
 0x500   : > { %v931_v32 = vmul.f32 1.442695, %v927_v30 }
 0x501   : > { %v925_v33 = vpop.xlane.xlu0 %924 }
 0x502   : > { %3927 = vpow2.f32 %v931_v32  ;;  %v928_v34 = vsub.f32 %v911_v25, %v925_v33 }
 0x504   : > { %v933_v36 = vmul.f32 1.442695, %v928_v34 }
 0x506   : > { %3929 = vpow2.f32 %v933_v36 }
 0x507   : > { %3931 = vpow2.f32 %v929_v35 }
 0x50c   : > { %v3928_v37 = vpop.eup %3927 }
 0x50d   : > { %v938_v38 = vsel %vm916_vm4, %v3928_v37, 0.0 }
 0x50e   : > { %939 = vadd.xlane.f32.xlu0 %v938_v38 }
 0x510   : > { %v3930_v39 = vpop.eup %3929 }
 0x511   : > { %v941_v40 = vsel %vm916_vm4, %v3930_v39, 0.0  ;;  %v3932_v41 = vpop.eup %3931 }
 0x512   : > { %942 = vadd.xlane.f32.xlu1 %v941_v40  ;;  %v935_v42 = vsel %vm916_vm4, %v3932_v41, 0.0 }
 0x516   : > { %936 = vadd.xlane.f32.xlu1 %v935_v42 }
 0x524   : > { %952 = vrot.lane.b32.xlu0 %v4254_v6, %s4839_s27 }
 0x527   : > { %954 = vrot.lane.b32.xlu1 %v4250_v2, %s4839_s27  ;;  %s4851_s27 = smov 120  }
 0x528   : > { %1015 = vrot.lane.b32.xlu0 %v4254_v6, %s4841_s28 }
 0x52b   : > { %1019 = vrot.lane.b32.xlu1 %v4254_v6, %s4067_s29 }
 0x52f   : > { %1021 = vrot.lane.b32.xlu1 %v4250_v2, %s4067_s29 }
 0x533   : > { %1017 = vrot.lane.b32.xlu1 %v4250_v2, %s4841_s28  ;;  %s4854_s28 = smov 80  }
 0x59b   : > { %v940_v43 = vpop.xlane.xlu0 %939 }
 0x59f   : > { %v953_v44 = vpop.permute.xlu0 %952  ;;  %v943_v45 = vpop.xlane.xlu1 %942 }
 0x5a0   : > { %3597 = vmatprep.subr.bf16.mxu0 %v953_v44  ;;  %3933 = vrcp.f32 %v943_v45 }
 0x5a1   : > { %3598 = vmatpush3.bf16.msra.mxu0 %v953_v44  ;;  %3935 = vrcp.f32 %v940_v43 }
 0x5a3   : > { %v937_v46 = vpop.xlane.xlu1 %936  ;;  %v1016_v58 = vpop.permute.xlu0 %1015 }
 0x5a4   : > { %3937 = vrcp.f32 %v937_v46 }
 0x5a7   : > { %v955_v47 = vpop.permute.xlu1 %954 }
 0x5a8   : > { %3807 = vmatprep.subr.msk.bf16.mxu0 %vm963_vm5, %v955_v47  ;;  %v965_v48 = vsel %vm963_vm5, %v955_v47, 0 }
 0x5a9   : > { %3600 = vmatpush3.bf16.msra.mxu0 %v965_v48 }
 0x5aa   : > { %v3934_v49 = vpop.eup %3933 }
 0x5ab   : > { %v1020_v50 = vpop.permute.xlu1 %1019  ;;  %v3936_v51 = vpop.eup %3935  ;;  %v949_v53 = vmul.f32 %v3934_v49, %v3930_v39 }
 0x5ac   : > { %3808 = vmatprep.subr.msk.bf16.mxu0 %vm855_vm2, %v1020_v50  ;;  %v948_v55 = vmul.f32 %v3936_v51, %v3928_v37  ;;  %v1030_v59 = vsel %vm855_vm2, %v1020_v50, 0 }
 0x5ad   : > { %v951_v57 = vpack.c.bf16 %v949_v53, %v949_v53 }
 0x5ae   : > { %v3938_v52 = vpop.eup %3937 }
 0x5af   : > { %v947_v54 = vmul.f32 %v3938_v52, %v3932_v41  ;;  %v1022_v60 = vpop.permute.xlu1 %1021 }
 0x5b0   : > { %v1033_v61 = vsel %vm855_vm2, %v1022_v60, 0 }
 0x5b1   : > { %v950_v56 = vpack.c.bf16 %v948_v55, %v947_v54 }
 0x5b3   : > { %3601 = vmatprep.mubr.msk.bf16.mxu0 %vm916_vm4, %v950_v56  ;;  %v1018_v62 = vpop.permute.xlu1 %1017 }
 0x5b4   : > { %3602 = vmatmul.mubr.msk.bf16.vlgmr.msra.gmra.mrb[0].mxu0 %vm916_vm4, %v951_v57 }
 0x5b5   : > { %3606 = vmatpush3.bf16.xpose.msra.mxu0 %v1030_v59  ;;  %3609 = vmatprep.mubr.msk.bf16.mxu0 %vm855_vm2, %v1016_v58 }
 0x5b6   : > { %3809 = vmatprep.subr.msk.bf16.mxu0 %vm855_vm2, %v1022_v60 }
 0x5bd   : > { %3608 = vmatpush3.bf16.xpose.msra.mxu0 %v1033_v61 }
 0x5c4   : > { %3610 = vmatmul.mubr.msk.bf16.vlgmr.msra.gmra.mrb[4].mxu0 %vm855_vm2, %v1018_v62 }
 0x687   : > { %v4299_v63 = vpop.f32.mrb[0].mxu0 }
 0x688   : > { %v4301_v0 = vpop.f32.mrb[1].mxu0 }
 0x689   : > { %v3604_v1 = vpop.f32.mrb[2].mxu0 }
 0x68a   : > { %v4303_v3 = vpop.f32.mrb[3].mxu0 }
 0x697   : > { %v3611_v4 = vpop.f32.mrb[4].mxu0 }
 0x698   : > { %v1069_v5 = vpop.f32.mrb[5].mxu0  ;;  %v1078_v11 = vadd.f32 %v3611_v4, %v4266_v17 }
 0x699   : > { %v1070_v7 = vadd.f32 %v1069_v5, %v4266_v17  ;;  %v3612_v8 = vpop.f32.mrb[6].mxu0 }
 0x69a   : > { %v1072_v10 = vpop.f32.mrb[7].mxu0  ;;  %v1089_v18 = vsel %vm916_vm4, %v1078_v11, -inf }
 0x69b   : > { %v1073_v13 = vadd.f32 %v1072_v10, %v4266_v17  ;;  %v1083_v14 = vsel %vm916_vm4, %v1070_v7, -inf }
 0x69c   : > { %1084 = vmax.xlane.f32.xlu0 %v1083_v14 }
 0x69d   : > { %v1086_v15 = vsel %vm916_vm4, %v1073_v13, -inf }
 0x69e   : > { %1087 = vmax.xlane.f32.xlu1 %v1086_v15 }
 0x6a0   : > { %1090 = vmax.xlane.f32.xlu0 %v1089_v18 }
 0x729   : > { %v1085_v19 = vpop.xlane.xlu0 %1084 }
 0x72a   : > { %v1092_v20 = vsub.f32 %v1070_v7, %v1085_v19 }
 0x72b   : > { %v1088_v21 = vpop.xlane.xlu1 %1087 }
 0x72c   : > { %v1095_v22 = vmul.f32 1.442695, %v1092_v20  ;;  %v1093_v23 = vsub.f32 %v1073_v13, %v1088_v21 }
 0x72d   : > { %v1091_v24 = vpop.xlane.xlu0 %1090 }
 0x72e   : > { %3939 = vpow2.f32 %v1095_v22  ;;  %v1097_v25 = vmul.f32 1.442695, %v1093_v23  ;;  %v1094_v26 = vsub.f32 %v1078_v11, %v1091_v24 }
 0x730   : > { %3941 = vpow2.f32 %v1097_v25  ;;  %v1099_v27 = vmul.f32 1.442695, %v1094_v26 }
 0x732   : > { %3943 = vpow2.f32 %v1099_v27 }
 0x738   : > { %v3940_v28 = vpop.eup %3939 }
 0x739   : > { %v1101_v29 = vsel %vm916_vm4, %v3940_v28, 0.0 }
 0x73a   : > { %v3942_v30 = vpop.eup %3941  ;;  %1102 = vadd.xlane.f32.xlu0 %v1101_v29 }
 0x73b   : > { %v1104_v32 = vsel %vm916_vm4, %v3942_v30, 0.0 }
 0x73c   : > { %v3944_v31 = vpop.eup %3943 }
 0x73d   : > { %v1107_v33 = vsel %vm916_vm4, %v3944_v31, 0.0 }
 0x73e   : > { %1105 = vadd.xlane.f32.xlu0 %v1104_v32  ;;  %1108 = vadd.xlane.f32.xlu1 %v1107_v33 }
 0x74f   : > { %1120 = vrot.lane.b32.xlu1 %v4250_v2, %s4837_s20 }
 0x753   : > { %1184 = vrot.lane.b32.xlu1 %v4254_v6, %s4833_s21 }
 0x754   : > { %1118 = vrot.lane.b32.xlu0 %v4254_v6, %s4837_s20  ;;  %s4859_s20 = smov 40  }
 0x757   : > { %1186 = vrot.lane.b32.xlu1 %v4250_v2, %s4833_s21  ;;  %s4835_s21 = smov 24  }
 0x758   : > { %1180 = vrot.lane.b32.xlu0 %v4254_v6, %s4831_s23 }
 0x75b   : > { %1182 = vrot.lane.b32.xlu1 %v4250_v2, %s4831_s23  ;;  %s4858_s23 = smov 104  }
 0x7c7   : > { %v1103_v34 = vpop.xlane.xlu0 %1102 }
 0x7c8   : > { %3945 = vrcp.f32 %v1103_v34 }
 0x7cb   : > { %v1109_v35 = vpop.xlane.xlu1 %1108  ;;  %v1106_v36 = vpop.xlane.xlu0 %1105 }
 0x7cc   : > { %3947 = vrcp.f32 %v1109_v35 }
 0x7cd   : > { %3949 = vrcp.f32 %v1106_v36 }
 0x7cf   : > { %v1121_v37 = vpop.permute.xlu1 %1120  ;;  %v1119_v38 = vpop.permute.xlu0 %1118 }
 0x7d0   : > { %3613 = vmatprep.subr.bf16.mxu1 %v1119_v38  ;;  %v1130_v39 = vsel %vm963_vm5, %v1121_v37, 0 }
 0x7d1   : > { %3614 = vmatpush3.bf16.msra.mxu1 %v1119_v38 }
 0x7d2   : > { %3810 = vmatprep.subr.msk.bf16.mxu1 %vm963_vm5, %v1121_v37  ;;  %v3946_v40 = vpop.eup %3945 }
 0x7d3   : > { %v1185_v41 = vpop.permute.xlu1 %1184  ;;  %v1113_v45 = vmul.f32 %v3946_v40, %v3940_v28  ;;  %v1181_v49 = vpop.permute.xlu0 %1180 }
 0x7d4   : > { %v1195_v50 = vsel %vm855_vm2, %v1185_v41, 0 }
 0x7d5   : > { %3616 = vmatpush3.bf16.msra.mxu1 %v1130_v39 }
 0x7d6   : > { %v3948_v42 = vpop.eup %3947  ;;  %3811 = vmatprep.subr.msk.bf16.mxu1 %vm855_vm2, %v1185_v41 }
 0x7d7   : > { %v3950_v43 = vpop.eup %3949  ;;  %v1115_v44 = vmul.f32 %v3948_v42, %v3944_v31  ;;  %v1187_v51 = vpop.permute.xlu1 %1186 }
 0x7d8   : > { %v1114_v46 = vmul.f32 %v3950_v43, %v3942_v30  ;;  %v1198_v52 = vsel %vm855_vm2, %v1187_v51, 0 }
 0x7d9   : > { %v1117_v47 = vpack.c.bf16 %v1115_v44, %v1115_v44 }
 0x7da   : > { %v1116_v48 = vpack.c.bf16 %v1114_v46, %v1113_v45 }
 0x7db   : > { %v1183_v53 = vpop.permute.xlu1 %1182 }
 0x7dc   : > { %3617 = vmatprep.mubr.msk.bf16.mxu1 %vm916_vm4, %v1116_v48 }
 0x7dd   : > { %3618 = vmatmul.mubr.msk.bf16.vlgmr.msra.gmra.mrb[12].mxu1 %vm916_vm4, %v1117_v47 }
 0x7de   : > { %3625 = vmatprep.mubr.msk.bf16.mxu1 %vm855_vm2, %v1181_v49  ;;  %3622 = vmatpush3.bf16.xpose.msra.mxu1 %v1195_v50 }
 0x7df   : > { %3812 = vmatprep.subr.msk.bf16.mxu1 %vm855_vm2, %v1187_v51 }
 0x7e6   : > { %3624 = vmatpush3.bf16.xpose.msra.mxu1 %v1198_v52 }
 0x7ed   : > { %3626 = vmatmul.mubr.msk.bf16.vlgmr.msra.gmra.mrb[16].mxu1 %vm855_vm2, %v1183_v53 }
 0x8b0   : > { %v4336_v54 = vpop.f32.mrb[12].mxu1 }
 0x8b1   : > { %v4338_v55 = vpop.f32.mrb[13].mxu1 }
 0x8b2   : > { %v3620_v56 = vpop.f32.mrb[14].mxu1 }
 0x8b3   : > { %v4340_v57 = vpop.f32.mrb[15].mxu1 }
 0x8b4   : > { %v3855_v58 = vpack.i.bf16 %v4340_v57, %v4338_v55 }
 0x8c0   : > { %v3627_v59 = vpop.f32.mrb[16].mxu1 }
 0x8c1   : > { %v1234_v60 = vpop.f32.mrb[17].mxu1  ;;  %v1243_v4 = vadd.f32 %v3627_v59, %v4266_v17 }
 0x8c2   : > { %v1235_v61 = vadd.f32 %v1234_v60, %v4266_v17  ;;  %v3628_v62 = vpop.f32.mrb[18].mxu1 }
 0x8c3   : > { %v1237_v1 = vpop.f32.mrb[19].mxu1  ;;  %v1254_v10 = vsel %vm916_vm4, %v1243_v4, -inf }
 0x8c4   : > { %v1238_v5 = vadd.f32 %v1237_v1, %v4266_v17  ;;  %v1248_v7 = vsel %vm916_vm4, %v1235_v61, -inf }
 0x8c5   : > { %1249 = vmax.xlane.f32.xlu0 %v1248_v7 }
 0x8c6   : > { %v1251_v8 = vsel %vm916_vm4, %v1238_v5, -inf }
 0x8c7   : > { %1252 = vmax.xlane.f32.xlu1 %v1251_v8 }
 0x8c9   : > { %1255 = vmax.xlane.f32.xlu0 %v1254_v10 }
 0x952   : > { %v1250_v11 = vpop.xlane.xlu0 %1249 }
 0x953   : > { %v1257_v13 = vsub.f32 %v1235_v61, %v1250_v11 }
 0x954   : > { %v1253_v14 = vpop.xlane.xlu1 %1252 }
 0x955   : > { %v1260_v15 = vmul.f32 1.442695, %v1257_v13  ;;  %v1258_v18 = vsub.f32 %v1238_v5, %v1253_v14 }
 0x956   : > { %v1256_v19 = vpop.xlane.xlu0 %1255 }
 0x957   : > { %3951 = vpow2.f32 %v1260_v15  ;;  %v1262_v20 = vmul.f32 1.442695, %v1258_v18  ;;  %v1259_v21 = vsub.f32 %v1243_v4, %v1256_v19 }
 0x959   : > { %3953 = vpow2.f32 %v1262_v20  ;;  %v1264_v22 = vmul.f32 1.442695, %v1259_v21 }
 0x95b   : > { %3955 = vpow2.f32 %v1264_v22 }
 0x961   : > { %v3952_v23 = vpop.eup %3951 }
 0x962   : > { %v1266_v24 = vsel %vm916_vm4, %v3952_v23, 0.0 }
 0x963   : > { %v3954_v25 = vpop.eup %3953  ;;  %1267 = vadd.xlane.f32.xlu0 %v1266_v24 }
 0x964   : > { %v1269_v27 = vsel %vm916_vm4, %v3954_v25, 0.0 }
 0x965   : > { %v3956_v26 = vpop.eup %3955 }
 0x966   : > { %v1272_v28 = vsel %vm916_vm4, %v3956_v26, 0.0 }
 0x967   : > { %1270 = vadd.xlane.f32.xlu0 %v1269_v27  ;;  %1273 = vadd.xlane.f32.xlu1 %v1272_v28 }
 0x978   : > { %1285 = vrot.lane.b32.xlu1 %v4250_v2, %s4823_s24 }
 0x97c   : > { %1349 = vrot.lane.b32.xlu1 %v4254_v6, %s4821_s25 }
 0x97d   : > { %1283 = vrot.lane.b32.xlu0 %v4254_v6, %s4823_s24  ;;  %s4825_s24 = smov 16  }
 0x980   : > { %1351 = vrot.lane.b32.xlu1 %v4250_v2, %s4821_s25  ;;  %s4827_s25 = smov 8  }
 0x981   : > { %1345 = vrot.lane.b32.xlu0 %v4254_v6, %s4819_s3 }
 0x984   : > { %1347 = vrot.lane.b32.xlu1 %v4250_v2, %s4819_s3  ;;  %s4829_s3 = smov 40  }
 0x9f0   : > { %v1268_v29 = vpop.xlane.xlu0 %1267 }
 0x9f1   : > { %3957 = vrcp.f32 %v1268_v29 }
 0x9f4   : > { %v1274_v30 = vpop.xlane.xlu1 %1273  ;;  %v1271_v31 = vpop.xlane.xlu0 %1270 }
 0x9f5   : > { %3959 = vrcp.f32 %v1274_v30 }
 0x9f6   : > { %3961 = vrcp.f32 %v1271_v31 }
 0x9f8   : > { %v1286_v32 = vpop.permute.xlu1 %1285  ;;  %v1284_v33 = vpop.permute.xlu0 %1283 }
 0x9f9   : > { %3629 = vmatprep.subr.bf16.mxu0 %v1284_v33  ;;  %v1295_v34 = vsel %vm963_vm5, %v1286_v32, 0 }
 0x9fa   : > { %3630 = vmatpush3.bf16.msra.mxu0 %v1284_v33 }
 0x9fb   : > { %3813 = vmatprep.subr.msk.bf16.mxu0 %vm963_vm5, %v1286_v32  ;;  %v3958_v35 = vpop.eup %3957 }
 0x9fc   : > { %v1350_v36 = vpop.permute.xlu1 %1349  ;;  %v1278_v40 = vmul.f32 %v3958_v35, %v3952_v23  ;;  %v1346_v45 = vpop.permute.xlu0 %1345 }
 0x9fd   : > { %v1360_v44 = vsel %vm855_vm2, %v1350_v36, 0 }
 0x9fe   : > { %3632 = vmatpush3.bf16.msra.mxu0 %v1295_v34 }
 0x9ff   : > { %v3960_v37 = vpop.eup %3959  ;;  %3814 = vmatprep.subr.msk.bf16.mxu0 %vm855_vm2, %v1350_v36  ;;  %v3893_v36 = vld [vmem:[%s4803_s7] sm:$0xff]  }
 0xa00   : > { %v3962_v38 = vpop.eup %3961  ;;  %v1280_v39 = vmul.f32 %v3960_v37, %v3956_v26  ;;  %v1352_v46 = vpop.permute.xlu1 %1351  ;;  %v3894_v37 = vld [vmem:[%s4803_s7 + $0x8] sm:$0xff]  }
 0xa01   : > { %v1279_v41 = vmul.f32 %v3962_v38, %v3954_v25  ;;  %v1363_v47 = vsel %vm855_vm2, %v1352_v46, 0 }
 0xa02   : > { %v1282_v42 = vpack.c.bf16 %v1280_v39, %v1280_v39 }
 0xa03   : > { %v1281_v43 = vpack.c.bf16 %v1279_v41, %v1278_v40 }
 0xa04   : > { %v1348_v48 = vpop.permute.xlu1 %1347 }
 0xa05   : > { %3633 = vmatprep.mubr.msk.bf16.mxu0 %vm916_vm4, %v1281_v43 }
 0xa06   : > { %3634 = vmatmul.mubr.msk.bf16.vlgmr.msra.gmra.mrb[8].mxu0 %vm916_vm4, %v1282_v42 }
 0xa07   : > { %3641 = vmatprep.mubr.msk.bf16.mxu0 %vm855_vm2, %v1346_v45  ;;  %3638 = vmatpush3.bf16.xpose.msra.mxu0 %v1360_v44 }
 0xa08   : > { %3815 = vmatprep.subr.msk.bf16.mxu0 %vm855_vm2, %v1352_v46 }
 0xa0f   : > { %3640 = vmatpush3.bf16.xpose.msra.mxu0 %v1363_v47 }
 0xa16   : > { %3642 = vmatmul.mubr.msk.bf16.vlgmr.msra.gmra.mrb[12].mxu0 %vm855_vm2, %v1348_v48 }
 0xad9   : > { %v3635_v49 = vpop.f32.mrb[8].mxu0 }
 0xada   : > { %v1331_v50 = vpop.f32.mrb[9].mxu0 }
 0xadb   : > { %v3636_v51 = vpop.f32.mrb[10].mxu0 }
 0xadc   : > { %v1334_v52 = vpop.f32.mrb[11].mxu0 }
 0xadd   : > { %v3860_v53 = vpack.i.bf16 %v1334_v52, %v1331_v50 }
 0xae9   : > { %v3643_v56 = vpop.f32.mrb[12].mxu0 }
 0xaea   : > { %v1399_v59 = vpop.f32.mrb[13].mxu0  ;;  %v1408_v1 = vadd.f32 %v3643_v56, %v4266_v17 }
 0xaeb   : > { %v1400_v60 = vadd.f32 %v1399_v59, %v4266_v17  ;;  %v3644_v61 = vpop.f32.mrb[14].mxu0 }
 0xaec   : > { %v1402_v62 = vpop.f32.mrb[15].mxu0  ;;  %v1419_v8 = vsel %vm916_vm4, %v1408_v1, -inf }
 0xaed   : > { %v1403_v4 = vadd.f32 %v1402_v62, %v4266_v17  ;;  %v1413_v5 = vsel %vm916_vm4, %v1400_v60, -inf }
 0xaee   : > { %1414 = vmax.xlane.f32.xlu0 %v1413_v5 }
 0xaef   : > { %v1416_v7 = vsel %vm916_vm4, %v1403_v4, -inf }
 0xaf0   : > { %1417 = vmax.xlane.f32.xlu1 %v1416_v7 }
 0xaf2   : > { %1420 = vmax.xlane.f32.xlu0 %v1419_v8 }
 0xb7b   : > { %v1415_v10 = vpop.xlane.xlu0 %1414 }
 0xb7c   : > { %v1422_v11 = vsub.f32 %v1400_v60, %v1415_v10  ;;  %v3347_v10 = vld [vmem:[%s4804_s8] ss:$0 sm:$0xff] }
 0xb7d   : > { %v1418_v13 = vpop.xlane.xlu1 %1417 }
 0xb7e   : > { %v1425_v14 = vmul.f32 1.442695, %v1422_v11  ;;  %v1423_v15 = vsub.f32 %v1403_v4, %v1418_v13 }
 0xb7f   : > { %v1421_v18 = vpop.xlane.xlu0 %1420 }
 0xb80   : > { %3963 = vpow2.f32 %v1425_v14  ;;  %v1427_v19 = vmul.f32 1.442695, %v1423_v15  ;;  %v1424_v20 = vsub.f32 %v1408_v1, %v1421_v18 }
 0xb82   : > { %3965 = vpow2.f32 %v1427_v19  ;;  %v1429_v21 = vmul.f32 1.442695, %v1424_v20 }
 0xb84   : > { %3967 = vpow2.f32 %v1429_v21 }
 0xb8a   : > { %v3964_v22 = vpop.eup %3963 }
 0xb8b   : > { %v1431_v23 = vsel %vm916_vm4, %v3964_v22, 0.0 }
 0xb8c   : > { %v3966_v24 = vpop.eup %3965  ;;  %1432 = vadd.xlane.f32.xlu0 %v1431_v23 }
 0xb8d   : > { %v1434_v26 = vsel %vm916_vm4, %v3966_v24, 0.0 }
 0xb8e   : > { %v3968_v25 = vpop.eup %3967 }
 0xb8f   : > { %v1437_v27 = vsel %vm916_vm4, %v3968_v25, 0.0 }
 0xb90   : > { %1435 = vadd.xlane.f32.xlu0 %v1434_v26  ;;  %1438 = vadd.xlane.f32.xlu1 %v1437_v27 }
 0xba1   : > { %1450 = vrot.lane.b32.xlu1 %v4250_v2, %s4829_s3 }
 0xba5   : > { %3856 = vrot.lane.b32.xlu1 %v3855_v58, %s4827_s25 }
 0xba6   : > { %1448 = vrot.lane.b32.xlu0 %v4254_v6, %s4829_s3  ;;  %s4856_s3 = smov 48  }
 0xba9   : > { %1517 = vrot.lane.b32.xlu1 %v4336_v54, %s4827_s25  ;;  %s4855_s25 = smov 112  }
 0xbaa   : > { %3861 = vrot.lane.b32.xlu0 %v3860_v53, %s4825_s24 }
 0xbad   : > { %1529 = vrot.lane.b32.xlu1 %v3635_v49, %s4825_s24  ;;  %s4860_s24 = smov 8  }
 0xc19   : > { %v1433_v28 = vpop.xlane.xlu0 %1432 }
 0xc1a   : > { %3969 = vrcp.f32 %v1433_v28 }
 0xc1d   : > { %v1439_v2 = vpop.xlane.xlu1 %1438  ;;  %v1436_v29 = vpop.xlane.xlu0 %1435 }
 0xc1e   : > { %3971 = vrcp.f32 %v1439_v2 }
 0xc1f   : > { %3973 = vrcp.f32 %v1436_v29 }
 0xc21   : > { %v1449_v30 = vpop.permute.xlu0 %1448  ;;  %v1451_v55 = vpop.permute.xlu1 %1450 }
 0xc22   : > { %3645 = vmatprep.subr.bf16.mxu1 %v1449_v30  ;;  %v1460_v6 = vsel %vm963_vm5, %v1451_v55, 0 }
 0xc23   : > { %3646 = vmatpush3.bf16.msra.mxu1 %v1449_v30 }
 0xc24   : > { %3816 = vmatprep.subr.msk.bf16.mxu1 %vm963_vm5, %v1451_v55  ;;  %v3970_v54 = vpop.eup %3969 }
 0xc25   : > { %v1443_v32 = vmul.f32 %v3970_v54, %v3964_v22  ;;  %v3857_v43 = vpop.permute.xlu1 %3856  ;;  %v3862_v47 = vpop.permute.xlu0 %3861 }
 0xc26   : > { %v3859_v45 = vunpack.i.h.bf16 %v3857_v43  ;;  %v3858_v46 = vunpack.i.l.bf16 %v3857_v43  ;;  %v3864_v49 = vunpack.i.h.bf16 %v3862_v47  ;;  %v3863_v50 = vunpack.i.l.bf16 %v3862_v47 }
 0xc27   : > { %3648 = vmatpush3.bf16.msra.mxu1 %v1460_v6 }
 0xc28   : > { %v3972_v57 = vpop.eup %3971  ;;  %3653 = vmatprep.subr.bf16.mxu1 %v3893_v36  ;;  %v1547_v51 = vsel %vm855_vm2, %v4303_v3, %v3859_v45  ;;  %v1546_v52 = vsel %vm855_vm2, %v4301_v0, %v3858_v46  ;;  %v3348_v45 = vld [vmem:[%s4805_s9] ss:$0 sm:$0xff] }
 0xc29   : > { %v3974_v58 = vpop.eup %3973  ;;  %v1445_v31 = vmul.f32 %v3972_v57, %v3968_v25  ;;  %v1518_v44 = vpop.permute.xlu1 %1517  ;;  %v1551_v1 = vsel %vm1549_vm6, %v1547_v51, %v3864_v49  ;;  %v1550_v4 = vsel %vm1549_vm6, %v1546_v52, %v3863_v50  ;;  %v3349_v51 = vld [vmem:[%s4806_s10] ss:$0 sm:$0xff] }
 0xc2a   : > { %v1444_v33 = vmul.f32 %v3974_v58, %v3966_v24  ;;  %v1548_v56 = vsel %vm855_vm2, %v4299_v63, %v1518_v44 }
 0xc2b   : > { %v1447_v34 = vpack.c.bf16 %v1445_v31, %v1445_v31 }
 0xc2c   : > { %v1446_v35 = vpack.c.bf16 %v1444_v33, %v1443_v32  ;;  %v3895_v32 = vld [vmem:[%s4807_s11] sm:$0xff]   ;;  %v3896_v33 = vld [vmem:[%s4807_s11 + $0x8] sm:$0xff]  }
 0xc2d   : > { %v1530_v48 = vpop.permute.xlu1 %1529  ;;  %3661 = vmatprep.subr.bf16.mxu0 %v3895_v32 }
 0xc2e   : > { %3649 = vmatprep.mubr.msk.bf16.mxu1 %vm916_vm4, %v1446_v35  ;;  %v1552_v60 = vsel %vm1549_vm6, %v1548_v56, %v1530_v48  ;;  %3662 = vmatpush3.bf16.msra.mxu0 %v3895_v32 }
 0xc2f   : > { %3650 = vmatmul.mubr.msk.bf16.vlgmr.msra.gmra.mrb[20].mxu1 %vm916_vm4, %v1447_v34  ;;  %3663 = vmatprep.subr.bf16.mxu0 %v3896_v33 }
 0xc30   : > { %3654 = vmatpush3.bf16.msra.mxu1 %v3893_v36 }
 0xc31   : > { %3655 = vmatprep.subr.bf16.mxu1 %v3894_v37 }
 0xc32   : > { %3664 = vmatpush3.bf16.msra.mxu0 %v3896_v33 }
 0xc34   : > { %3656 = vmatpush3.bf16.msra.mxu1 %v3894_v37 }
 0xd02   : > { %v3651_v38 = vpop.f32.mrb[20].mxu1 }
 0xd03   : > { %1541 = vrot.lane.b32.xlu1 %v3651_v38, %s4835_s21  ;;  %v1496_v39 = vpop.f32.mrb[21].mxu1 }
 0xd04   : > { %v3652_v40 = vpop.f32.mrb[22].mxu1 }
 0xd05   : > { %v1499_v41 = vpop.f32.mrb[23].mxu1 }
 0xd06   : > { %v3865_v42 = vpack.i.bf16 %v1499_v41, %v1496_v39 }
 0xd08   : > { %3866 = vrot.lane.b32.xlu0 %v3865_v42, %s4835_s21  ;;  %s4857_s21 = smov 72  }
 0xd75   : > { %v1542_v53 = vpop.permute.xlu1 %1541 }
 0xd76   : > { %v1555_v5 = vsel %vm916_vm4, %v1552_v60, %v1542_v53 }
 0xd77   : > { %v1557_v8 = vpack.c.bf16 %v1555_v5, %v1555_v5  ;;  %v3899_v5 = vld [vmem:[%s4809_s13 + $0x10] sm:$0xff]  }
 0xd7a   : > { %v3867_v59 = vpop.permute.xlu0 %3866 }
 0xd7b   : > { %v3869_v61 = vunpack.i.h.bf16 %v3867_v59  ;;  %v3868_v62 = vunpack.i.l.bf16 %v3867_v59 }
 0xd7d   : > { %v1553_v3 = vsel %vm916_vm4, %v1550_v4, %v3868_v62  ;;  %v1554_v0 = vsel %vm916_vm4, %v1551_v1, %v3869_v61  ;;  %v3897_v1 = vld [vmem:[%s4809_s13] sm:$0xff]   ;;  %v3898_v4 = vld [vmem:[%s4809_s13 + $0x8] sm:$0xff]  }
 0xd7e   : > { %v1556_v7 = vpack.c.bf16 %v1554_v0, %v1553_v3  ;;  %3669 = vmatprep.subr.bf16.mxu1 %v3897_v1  ;;  %v3900_v3 = vld [vmem:[%s4809_s13 + $0x18] sm:$0xff]   ;;  %v3901_v0 = vld [vmem:[%s4809_s13 + $0x20] sm:$0xff]  }
 0xd80   : > { %3657 = vmatprep.mubr.msk.bf16.mxu1 %vm709_vm1, %v1556_v7  ;;  %v3902_v7 = vld [vmem:[%s4809_s13 + $0x28] sm:$0xff]  }
 0xd81   : > { %3658 = vmatmul.mubr.msk.bf16.vlgmr.msra.gmra.mrb[24].mxu1 %vm709_vm1, %v1557_v8  ;;  %v3903_v8 = vld [vmem:[%s4809_s13 + $0x30] sm:$0xff]  }
 0xd82   : > { %3670 = vmatpush3.bf16.msra.mxu1 %v3897_v1 }
 0xd83   : > { %3671 = vmatprep.subr.bf16.mxu1 %v3898_v4 }
 0xd86   : > { %3672 = vmatpush3.bf16.msra.mxu1 %v3898_v4 }
 0xd87   : > { %3673 = vmatprep.subr.bf16.mxu1 %v3899_v5 }
 0xd8a   : > { %3674 = vmatpush3.bf16.msra.mxu1 %v3899_v5 }
 0xd8b   : > { %3675 = vmatprep.subr.bf16.mxu1 %v3900_v3 }
 0xd8e   : > { %3676 = vmatpush3.bf16.msra.mxu1 %v3900_v3 }
 0xd8f   : > { %3677 = vmatprep.subr.bf16.mxu1 %v3901_v0 }
 0xd92   : > { %3678 = vmatpush3.bf16.msra.mxu1 %v3901_v0 }
 0xd93   : > { %3679 = vmatprep.subr.bf16.mxu1 %v3902_v7 }
 0xd96   : > { %3680 = vmatpush3.bf16.msra.mxu1 %v3902_v7 }
 0xd97   : > { %3681 = vmatprep.subr.bf16.mxu1 %v3903_v8 }
 0xd9a   : > { %3682 = vmatpush3.bf16.msra.mxu1 %v3903_v8 }
 0xe54   : > { %v3659_v63 = vpop.f32.mrb[24].mxu1 }
 0xe55   : > { %v1614_v11 = vpop.f32.mrb[25].mxu1  ;;  %v1630_v13 = vadd.f32 %v3659_v63, %v4212_v9  ;;  %v3904_v63 = vld [vmem:[%s4809_s13 + $0x38] sm:$0xff]  }
 0xe56   : > { %v1628_v14 = vadd.f32 %v1614_v11, %v4217_v12  ;;  %v3660_v15 = vpop.f32.mrb[26].mxu1  ;;  %3683 = vmatprep.subr.bf16.mxu1 %v3904_v63 }
 0xe57   : > { %v1617_v18 = vpop.f32.mrb[27].mxu1  ;;  %v4430_v21 = vadd.f32 %v3347_v10, %v1630_v13  ;;  %3684 = vmatpush3.bf16.msra.mxu1 %v3904_v63 }
 0xe58   : > { %v4427_v19 = vadd.f32 %v3347_v10, %v1628_v14  ;;  %v1629_v20 = vadd.f32 %v1617_v18, %v4221_v16 }
 0xe59   : > { %v1649_v9 = vsel %vm709_vm1, %v4430_v21, 0.0 }
 0xe5a   : > { %v4432_v22 = vadd.f32 %v3347_v10, %v1629_v20  ;;  %v1643_v23 = vsel %vm709_vm1, %v4427_v19, 0.0  ;;  %v3350_v10 = vld [vmem:[%s4808_s12] ss:$0 sm:$0xff] }
 0xe5b   : > { %1644 = vadd.xlane.f32.xlu0 %v1643_v23 }
 0xe5c   : > { %v1646_v24 = vsel %vm709_vm1, %v4432_v22, 0.0 }
 0xe5d   : > { %1647 = vadd.xlane.f32.xlu1 %v1646_v24 }
 0xe5f   : > { %1650 = vadd.xlane.f32.xlu0 %v1649_v9 }
 0xee8   : > { %v1645_v12 = vpop.xlane.xlu0 %1644 }
 0xee9   : > { %v1652_v25 = vmul.f32 0.03125, %v1645_v12 }
 0xeea   : > { %v1648_v26 = vpop.xlane.xlu1 %1647 }
 0xeeb   : > { %v1655_v16 = vsub.f32 %v4427_v19, %v1652_v25  ;;  %v1653_v27 = vmul.f32 0.03125, %v1648_v26 }
 0xeec   : > { %v1651_v28 = vpop.xlane.xlu0 %1650 }
 0xeed   : > { %v1656_v2 = vsub.f32 %v4432_v22, %v1653_v27  ;;  %v1654_v29 = vmul.f32 0.03125, %v1651_v28  ;;  %v1658_v30 = vmul.f32 %v1655_v16, %v1655_v16 }
 0xeef   : > { %v1657_v55 = vsub.f32 %v4430_v21, %v1654_v29  ;;  %v1661_v6 = vsel %vm709_vm1, %v1658_v30, 0.0  ;;  %v1659_v54 = vmul.f32 %v1656_v2, %v1656_v2 }
 0xef0   : > { %1662 = vadd.xlane.f32.xlu0 %v1661_v6 }
 0xef1   : > { %v1660_v57 = vmul.f32 %v1657_v55, %v1657_v55  ;;  %v1664_v31 = vsel %vm709_vm1, %v1659_v54, 0.0 }
 0xef3   : > { %v1667_v58 = vsel %vm709_vm1, %v1660_v57, 0.0 }
 0xef4   : > { %1668 = vadd.xlane.f32.xlu1 %v1667_v58  ;;  %1665 = vadd.xlane.f32.xlu0 %v1664_v31 }
 0xf7d   : > { %v1663_v34 = vpop.xlane.xlu0 %1662 }
 0xf7e   : > { %v1670_v35 = vmul.f32 0.03125, %v1663_v34 }
 0xf80   : > { %v1673_v36 = vadd.f32 1e-06, %v1670_v35 }
 0xf81   : > { %v1666_v37 = vpop.xlane.xlu0 %1665  ;;  %v1669_v38 = vpop.xlane.xlu1 %1668 }
 0xf82   : > { %3975 = vrsqrt.f32 %v1673_v36  ;;  %v1671_v39 = vmul.f32 0.03125, %v1666_v37  ;;  %v1672_v40 = vmul.f32 0.03125, %v1669_v38 }
 0xf84   : > { %v1674_v41 = vadd.f32 1e-06, %v1671_v39  ;;  %v1675_v42 = vadd.f32 1e-06, %v1672_v40 }
 0xf86   : > { %3977 = vrsqrt.f32 %v1674_v41 }
 0xf87   : > { %3979 = vrsqrt.f32 %v1675_v42 }
 0xf8c   : > { %v3976_v43 = vpop.eup %3975 }
 0xf8d   : > { %v1679_v44 = vmul.f32 %v3976_v43, %v1655_v16 }
 0xf8f   : > { %v1688_v49 = vmul.f32 %v3348_v45, %v1679_v44  ;;  %v3355_v44 = vld [vmem:[%s4810_s14] ss:$0 sm:$0xff] }
 0xf90   : > { %v3978_v46 = vpop.eup %3977 }
 0xf91   : > { %v3980_v47 = vpop.eup %3979  ;;  %v1680_v48 = vmul.f32 %v3978_v46, %v1656_v2  ;;  %v1697_v56 = vadd.f32 %v3349_v51, %v1688_v49 }
 0xf92   : > { %v1681_v50 = vmul.f32 %v3980_v47, %v1657_v55 }
 0xf93   : > { %v1689_v52 = vmul.f32 %v3348_v45, %v1680_v48 }
 0xf94   : > { %v1690_v53 = vmul.f32 %v3348_v45, %v1681_v50 }
 0xf95   : > { %v1698_v59 = vadd.f32 %v3349_v51, %v1689_v52 }
 0xf96   : > { %v1699_v60 = vadd.f32 %v3349_v51, %v1690_v53 }
 0xf97   : > { %v1700_v61 = vpack.c.bf16 %v1698_v59, %v1697_v56 }
 0xf98   : > { %v1701_v62 = vpack.c.bf16 %v1699_v60, %v1699_v60 }
 0xf99   : > { %3665 = vmatprep.mubr.msk.bf16.mxu0 %vm709_vm1, %v1700_v61 }
 0xf9a   : > { %3666 = vmatmul.mubr.msk.bf16.vlgmr.msra.gmra.mrb[16].mxu0 %vm709_vm1, %v1701_v62 }
0x106d   : > { %v3667_v11 = vpop.f32.mrb[16].mxu0 }
0x106e   : > { %v1774_v13 = vadd.f32 %v3667_v11, %v3350_v10  ;;  %v1765_v14 = vpop.f32.mrb[17].mxu0 }
0x106f   : > { %v1766_v15 = vadd.f32 %v3350_v10, %v1765_v14  ;;  %v3668_v18 = vpop.f32.mrb[18].mxu0  ;;  %v3905_v14 = vld [vmem:[%s4801_s5 + $0x10] sm:$0xff]  }
0x1070   : > { %v1784_v20 = vmul.f32 0.044715, %v1774_v13  ;;  %v1768_v23 = vpop.f32.mrb[19].mxu0  ;;  %v1781_v35 = vmul.f32 0.5, %v1774_v13  ;;  %3689 = vmatprep.subr.bf16.mxu0 %v3905_v14 }
0x1071   : > { %v1782_v24 = vmul.f32 0.044715, %v1766_v15  ;;  %v1769_v9 = vadd.f32 %v3350_v10, %v1768_v23  ;;  %v1779_v36 = vmul.f32 0.5, %v1766_v15  ;;  %3690 = vmatpush3.bf16.msra.mxu0 %v3905_v14 }
0x1072   : > { %v1787_v12 = vmul.f32 %v1784_v20, %v1774_v13 }
0x1073   : > { %v1785_v25 = vmul.f32 %v1782_v24, %v1766_v15  ;;  %v1783_v26 = vmul.f32 0.044715, %v1769_v9  ;;  %v1780_v37 = vmul.f32 0.5, %v1769_v9 }
0x1074   : > { %v1790_v16 = vmul.f32 %v1787_v12, %v1774_v13 }
0x1075   : > { %v1788_v27 = vmul.f32 %v1785_v25, %v1766_v15  ;;  %v1786_v28 = vmul.f32 %v1783_v26, %v1769_v9 }
0x1076   : > { %v1793_v2 = vadd.f32 %v1790_v16, %v1774_v13 }
0x1077   : > { %v1789_v29 = vmul.f32 %v1786_v28, %v1769_v9  ;;  %v1791_v30 = vadd.f32 %v1788_v27, %v1766_v15  ;;  %v3906_v15 = vld [vmem:[%s4801_s5 + $0x18] sm:$0xff]   ;;  %v3366_v28 = vld [vmem:[%s4850_s22 + $0x1] ss:$0 sm:$0xff] }
0x1078   : > { %v1796_v55 = vmul.f32 0.7978846, %v1793_v2  ;;  %3691 = vmatprep.subr.bf16.mxu0 %v3906_v15 }
0x1079   : > { %v1792_v6 = vadd.f32 %v1789_v29, %v1769_v9  ;;  %v1794_v54 = vmul.f32 0.7978846, %v1791_v30  ;;  %3692 = vmatpush3.bf16.msra.mxu0 %v3906_v15 }
0x107a   : > { %3981 = vtanh.f32 %v1796_v55 }
0x107b   : > { %v1795_v57 = vmul.f32 0.7978846, %v1792_v6  ;;  %3983 = vtanh.f32 %v1794_v54  ;;  %v3367_v54 = vld [vmem:[%s4800_s4 + $0x1] ss:$0 sm:$0xff] }
0x107d   : > { %3985 = vtanh.f32 %v1795_v57 }
0x1084   : > { %v3982_v58 = vpop.eup %3981 }
0x1085   : > { %v3984_v31 = vpop.eup %3983  ;;  %v1802_v32 = vadd.f32 1.0, %v3982_v58 }
0x1086   : > { %v1800_v33 = vadd.f32 1.0, %v3984_v31 }
0x1087   : > { %v3986_v34 = vpop.eup %3985  ;;  %v1805_v39 = vmul.f32 %v1802_v32, %v1781_v35 }
0x1088   : > { %v1801_v38 = vadd.f32 1.0, %v3986_v34  ;;  %v1803_v40 = vmul.f32 %v1800_v33, %v1779_v36 }
0x1089   : > { %v1807_v43 = vpack.c.bf16 %v1805_v39, %v1805_v39 }
0x108a   : > { %v1804_v41 = vmul.f32 %v1801_v38, %v1780_v37  ;;  %v3373_v37 = vld [vmem:[%s4802_s6 + $0x1] ss:$0 sm:$0xff] }
0x108c   : > { %v1806_v42 = vpack.c.bf16 %v1804_v41, %v1803_v40 }
0x108e   : > { %3685 = vmatprep.mubr.bf16.mxu1 %v1806_v42 }
0x108f   : > { %3686 = vmatmul.mubr.bf16.vlgmr.msra.gmra.mrb[28].mxu1 %v1807_v43 }
0x1162   : > { %v3687_v45 = vpop.f32.mrb[28].mxu1 }
0x1163   : > { %v1913_v46 = vpop.f32.mrb[29].mxu1  ;;  %v1922_v47 = vadd.f32 %v3687_v45, %v3355_v44 }
0x1164   : > { %v1914_v48 = vadd.f32 %v3355_v44, %v1913_v46  ;;  %v3688_v49 = vpop.f32.mrb[30].mxu1 }
0x1165   : > { %v1916_v50 = vpop.f32.mrb[31].mxu1  ;;  %v4494_v53 = vadd.f32 %v1922_v47, %v4430_v21 }
0x1166   : > { %v4491_v51 = vadd.f32 %v1914_v48, %v4427_v19  ;;  %v1917_v52 = vadd.f32 %v3355_v44, %v1916_v50 }
0x1167   : > { %v1940_v61 = vsel %vm709_vm1, %v4494_v53, 0.0 }
0x1168   : > { %v4497_v56 = vadd.f32 %v1917_v52, %v4432_v22  ;;  %v1934_v59 = vsel %vm709_vm1, %v4491_v51, 0.0 }
0x1169   : > { %1935 = vadd.xlane.f32.xlu0 %v1934_v59 }
0x116a   : > { %v1937_v60 = vsel %vm709_vm1, %v4497_v56, 0.0 }
0x116b   : > { %1938 = vadd.xlane.f32.xlu1 %v1937_v60 }
0x116d   : > { %1941 = vadd.xlane.f32.xlu0 %v1940_v61 }
0x11f6   : > { %v1936_v19 = vpop.xlane.xlu0 %1935 }
0x11f7   : > { %v1943_v62 = vmul.f32 0.03125, %v1936_v19 }
0x11f8   : > { %v1939_v1 = vpop.xlane.xlu1 %1938 }
0x11f9   : > { %v1946_v21 = vsub.f32 %v4491_v51, %v1943_v62  ;;  %v1944_v4 = vmul.f32 0.03125, %v1939_v1 }
0x11fa   : > { %v1942_v22 = vpop.xlane.xlu0 %1941 }
0x11fb   : > { %v1947_v5 = vsub.f32 %v4497_v56, %v1944_v4  ;;  %v1945_v3 = vmul.f32 0.03125, %v1942_v22  ;;  %v1949_v0 = vmul.f32 %v1946_v21, %v1946_v21 }
0x11fd   : > { %v1948_v7 = vsub.f32 %v4494_v53, %v1945_v3  ;;  %v1952_v8 = vsel %vm709_vm1, %v1949_v0, 0.0  ;;  %v1950_v63 = vmul.f32 %v1947_v5, %v1947_v5 }
0x11fe   : > { %1953 = vadd.xlane.f32.xlu1 %v1952_v8 }
0x11ff   : > { %v1955_v10 = vsel %vm709_vm1, %v1950_v63, 0.0  ;;  %v1951_v11 = vmul.f32 %v1948_v7, %v1948_v7 }
0x1200   : > { %1956 = vadd.xlane.f32.xlu0 %v1955_v10 }
0x1201   : > { %v1958_v13 = vsel %vm709_vm1, %v1951_v11, 0.0 }
0x1202   : > { %1959 = vadd.xlane.f32.xlu1 %v1958_v13 }
0x128b   : > { %v1954_v18 = vpop.xlane.xlu1 %1953 }
0x128c   : > { %v1961_v20 = vmul.f32 0.03125, %v1954_v18 }
0x128d   : > { %v1957_v23 = vpop.xlane.xlu0 %1956 }
0x128e   : > { %v1964_v24 = vadd.f32 1e-06, %v1961_v20  ;;  %v1962_v9 = vmul.f32 0.03125, %v1957_v23 }
0x128f   : > { %v1960_v12 = vpop.xlane.xlu1 %1959 }
0x1290   : > { %3987 = vrsqrt.f32 %v1964_v24  ;;  %v1965_v25 = vadd.f32 1e-06, %v1962_v9  ;;  %v1963_v26 = vmul.f32 0.03125, %v1960_v12 }
0x1292   : > { %3989 = vrsqrt.f32 %v1965_v25  ;;  %v1966_v16 = vadd.f32 1e-06, %v1963_v26 }
0x1294   : > { %3991 = vrsqrt.f32 %v1966_v16 }
0x129a   : > { %v3988_v27 = vpop.eup %3987 }
0x129b   : > { %v1970_v2 = vmul.f32 %v3988_v27, %v1946_v21 }
0x129c   : > { %v3990_v29 = vpop.eup %3989 }
0x129d   : > { %v1971_v30 = vmul.f32 %v3990_v29, %v1947_v5  ;;  %v1979_v55 = vmul.f32 %v3366_v28, %v1970_v2 }
0x129e   : > { %v3992_v6 = vpop.eup %3991 }
0x129f   : > { %v1972_v57 = vmul.f32 %v3992_v6, %v1948_v7  ;;  %v1980_v58 = vmul.f32 %v3366_v28, %v1971_v30  ;;  %v1988_v31 = vadd.f32 %v3367_v54, %v1979_v55 }
0x12a1   : > { %v1989_v32 = vadd.f32 %v3367_v54, %v1980_v58  ;;  %v1981_v33 = vmul.f32 %v3366_v28, %v1972_v57 }
0x12a3   : > { %v1991_v34 = vpack.c.bf16 %v1989_v32, %v1988_v31  ;;  %v1990_v35 = vadd.f32 %v3367_v54, %v1981_v33 }
0x12a5   : > { %3693 = vmatprep.mubr.msk.bf16.mxu0 %vm709_vm1, %v1991_v34  ;;  %v1992_v36 = vpack.c.bf16 %v1990_v35, %v1990_v35 }
0x12a7   : > { %3694 = vmatmul.mubr.msk.bf16.vlgmr.msra.gmra.mrb[20].mxu0 %vm709_vm1, %v1992_v36 }
0x137a   : > { %v3695_v38 = vpop.f32.mrb[20].mxu0 }
0x137b   : > { %v2067_v39 = vadd.f32 %v3695_v38, %v3373_v37  ;;  %v2058_v40 = vpop.f32.mrb[21].mxu0 }
0x137c   : > { %v3696_v41 = vpop.f32.mrb[22].mxu0  ;;  %v2059_v44 = vadd.f32 %v3373_v37, %v2058_v40 }
0x137d   : > { %v4528_v42 = vpack.c.bf16 %v2067_v39, %v2067_v39  ;;  %v2061_v43 = vpop.f32.mrb[23].mxu0 }
0x137e   : > { %v2062_v45 = vadd.f32 %v3373_v37, %v2061_v43 }
0x137f   : > { %2078 = vrot.lane.b32.xlu1 %v4528_v42, %s4063_s26 }
0x1380   : > { %v4532_v46 = vpack.c.bf16 %v2062_v45, %v2059_v44 }
0x1382   : > { %2076 = vrot.lane.b32.xlu0 %v4532_v46, %s4063_s26  ;;  %3701 = vmatprep.mubr.msk.bf16.mxu0 %vm855_vm2, %v4532_v46  ;;  %s4852_s26 = smov 64  }
0x1383   : > { %2241 = vrot.lane.b32.xlu1 %v4532_v46, %s4067_s29 }
0x1386   : > { %2237 = vrot.lane.b32.xlu0 %v4532_v46, %s4851_s27 }
0x1387   : > { %2243 = vrot.lane.b32.xlu1 %v4528_v42, %s4067_s29  ;;  %s4853_s29 = smov 56  }
0x138b   : > { %2239 = vrot.lane.b32.xlu1 %v4528_v42, %s4851_s27  ;;  %s4861_s27 = smov 16  }
0x13f1   : > { %v2079_v47 = vpop.permute.xlu1 %2078 }
0x13f2   : > { %v2090_v61 = vsel %vm855_vm2, %v2079_v47, 0 }
0x13f4   : > { %v2077_v48 = vpop.permute.xlu0 %2076 }
0x13f5   : > { %v2087_v49 = vsel %vm855_vm2, %v2077_v48, 0  ;;  %v2242_v50 = vpop.permute.xlu1 %2241  ;;  %3817 = vmatprep.subr.msk.bf16.mxu0 %vm855_vm2, %v2077_v48 }
0x13f6   : > { %v2252_v52 = vsel %vm855_vm2, %v2242_v50, 0  ;;  %3698 = vmatpush3.bf16.xpose.msra.mxu0 %v2087_v49  ;;  %3820 = vmatprep.subr.msk.bf16.mxu1 %vm855_vm2, %v2242_v50 }
0x13f7   : > { %3818 = vmatprep.subr.msk.bf16.mxu0 %vm855_vm2, %v2079_v47  ;;  %3714 = vmatpush3.bf16.xpose.msra.mxu1 %v2252_v52 }
0x13f8   : > { %v2238_v59 = vpop.permute.xlu0 %2237 }
0x13f9   : > { %v2244_v60 = vpop.permute.xlu1 %2243  ;;  %3717 = vmatprep.mubr.msk.bf16.mxu1 %vm855_vm2, %v2238_v59 }
0x13fa   : > { %3821 = vmatprep.subr.msk.bf16.mxu1 %vm855_vm2, %v2244_v60  ;;  %v2255_v19 = vsel %vm855_vm2, %v2244_v60, 0 }
0x13fd   : > { %v2240_v62 = vpop.permute.xlu1 %2239 }
0x13fe   : > { %3700 = vmatpush3.bf16.xpose.msra.mxu0 %v2090_v61 }
0x13ff   : > { %3716 = vmatpush3.bf16.xpose.msra.mxu1 %v2255_v19 }
0x1405   : > { %3702 = vmatmul.mubr.msk.bf16.vlgmr.msra.gmra.mrb[24].mxu0 %vm855_vm2, %v4528_v42 }
0x1406   : > { %3718 = vmatmul.mubr.msk.bf16.vlgmr.msra.gmra.mrb[32].mxu1 %vm855_vm2, %v2240_v62 }
0x14d8   : > { %v3703_v1 = vpop.f32.mrb[24].mxu0 }
0x14d9   : > { %v2126_v21 = vpop.f32.mrb[25].mxu0  ;;  %v3719_v4 = vpop.f32.mrb[32].mxu1  ;;  %v2135_v8 = vadd.f32 %v3703_v1, %v4266_v17 }
0x14da   : > { %v2127_v22 = vadd.f32 %v2126_v21, %v4266_v17  ;;  %v3704_v5 = vpop.f32.mrb[26].mxu0  ;;  %v2291_v3 = vpop.f32.mrb[33].mxu1  ;;  %v2300_v13 = vadd.f32 %v3719_v4, %v4266_v17 }
0x14db   : > { %v2129_v0 = vpop.f32.mrb[27].mxu0  ;;  %v3720_v7 = vpop.f32.mrb[34].mxu1  ;;  %v2292_v15 = vadd.f32 %v2291_v3, %v4266_v17  ;;  %v2146_v18 = vsel %vm916_vm4, %v2135_v8, -inf }
0x14dc   : > { %v2130_v63 = vadd.f32 %v2129_v0, %v4266_v17  ;;  %v2294_v10 = vpop.f32.mrb[35].mxu1  ;;  %v2140_v11 = vsel %vm916_vm4, %v2127_v22, -inf  ;;  %v2311_v20 = vsel %vm916_vm4, %v2300_v13, -inf }
0x14dd   : > { %2141 = vmax.xlane.f32.xlu0 %v2140_v11  ;;  %v2295_v23 = vadd.f32 %v2294_v10, %v4266_v17  ;;  %v2305_v24 = vsel %vm916_vm4, %v2292_v15, -inf }
0x14de   : > { %v2143_v14 = vsel %vm916_vm4, %v2130_v63, -inf }
0x14df   : > { %2144 = vmax.xlane.f32.xlu1 %v2143_v14  ;;  %v2308_v9 = vsel %vm916_vm4, %v2295_v23, -inf }
0x14e1   : > { %2147 = vmax.xlane.f32.xlu0 %v2146_v18 }
0x14e3   : > { %2312 = vmax.xlane.f32.xlu1 %v2311_v20 }
0x14e5   : > { %2306 = vmax.xlane.f32.xlu0 %v2305_v24 }
0x14e9   : > { %2309 = vmax.xlane.f32.xlu0 %v2308_v9 }
0x156a   : > { %v2142_v12 = vpop.xlane.xlu0 %2141 }
0x156b   : > { %v2149_v25 = vsub.f32 %v2127_v22, %v2142_v12 }
0x156c   : > { %v2145_v26 = vpop.xlane.xlu1 %2144 }
0x156d   : > { %v2152_v28 = vmul.f32 1.442695, %v2149_v25  ;;  %v2150_v38 = vsub.f32 %v2130_v63, %v2145_v26 }
0x156e   : > { %v2148_v16 = vpop.xlane.xlu0 %2147 }
0x156f   : > { %v2151_v27 = vsub.f32 %v2135_v8, %v2148_v16  ;;  %v2154_v40 = vmul.f32 1.442695, %v2150_v38 }
0x1570   : > { %v2313_v2 = vpop.xlane.xlu1 %2312 }
0x1571   : > { %v2156_v29 = vmul.f32 1.442695, %v2151_v27  ;;  %v2316_v30 = vsub.f32 %v2300_v13, %v2313_v2 }
0x1572   : > { %v2307_v33 = vpop.xlane.xlu0 %2306 }
0x1573   : > { %3993 = vpow2.f32 %v2156_v29  ;;  %v2321_v55 = vmul.f32 1.442695, %v2316_v30  ;;  %v2314_v36 = vsub.f32 %v2292_v15, %v2307_v33 }
0x1574   : > { %3995 = vpow2.f32 %v2152_v28 }
0x1575   : > { %3997 = vpow2.f32 %v2321_v55  ;;  %v2317_v39 = vmul.f32 1.442695, %v2314_v36 }
0x1576   : > { %v2310_v34 = vpop.xlane.xlu0 %2309 }
0x1577   : > { %v2315_v35 = vsub.f32 %v2295_v23, %v2310_v34 }
0x1579   : > { %v2319_v37 = vmul.f32 1.442695, %v2315_v35 }
0x157b   : > { %3999 = vpow2.f32 %v2319_v37 }
0x157c   : > { %4001 = vpow2.f32 %v2317_v39 }
0x157d   : > { %v4570_v6 = vpop.eup %3993  ;;  %4003 = vpow2.f32 %v2154_v40 }
0x157e   : > { %v4572_v54 = vpop.eup %3995  ;;  %v2164_v57 = vsel %vm916_vm4, %v4570_v6, 0.0 }
0x157f   : > { %v4576_v58 = vpop.eup %3997  ;;  %2165 = vadd.xlane.f32.xlu0 %v2164_v57  ;;  %v2158_v32 = vsel %vm916_vm4, %v4572_v54, 0.0 }
0x1580   : > { %v2329_v31 = vsel %vm916_vm4, %v4576_v58, 0.0 }
0x1581   : > { %2330 = vadd.xlane.f32.xlu1 %v2329_v31 }
0x1583   : > { %2159 = vadd.xlane.f32.xlu0 %v2158_v32 }
0x1585   : > { %v4000_v41 = vpop.eup %3999 }
0x1586   : > { %v4002_v43 = vpop.eup %4001  ;;  %v2326_v44 = vsel %vm916_vm4, %v4000_v41, 0.0 }
0x1587   : > { %v2323_v45 = vsel %vm916_vm4, %v4002_v43, 0.0  ;;  %v4004_v47 = vpop.eup %4003 }
0x1588   : > { %v2161_v48 = vsel %vm916_vm4, %v4004_v47, 0.0 }
0x1592   : > { %2177 = vrot.lane.b32.xlu1 %v4528_v42, %s4852_s26 }
0x1596   : > { %2340 = vrot.lane.b32.xlu1 %v4532_v46, %s4853_s29 }
0x1599   : > { %2175 = vrot.lane.b32.xlu0 %v4532_v46, %s4852_s26 }
0x15b8   : > { %2327 = vadd.xlane.f32.xlu0 %v2326_v44 }
0x15ba   : > { %2324 = vadd.xlane.f32.xlu1 %v2323_v45 }
0x15be   : > { %2162 = vadd.xlane.f32.xlu1 %v2161_v48 }
0x15ce   : > { %2406 = vrot.lane.b32.xlu0 %v4532_v46, %s4854_s28 }
0x15cf   : > { %2342 = vrot.lane.b32.xlu1 %v4528_v42, %s4853_s29 }
0x15d2   : > { %2402 = vrot.lane.b32.xlu0 %v4532_v46, %s4855_s25 }
0x15d3   : > { %2408 = vrot.lane.b32.xlu1 %v4528_v42, %s4854_s28 }
0x15d7   : > { %2404 = vrot.lane.b32.xlu1 %v4528_v42, %s4855_s25  ;;  %s3311_s25 = sshll.u32 %s4864_s30, 3 }
0x160c   : > { %v2166_v49 = vpop.xlane.xlu0 %2165 }
0x160d   : > { %4005 = vrcp.f32 %v2166_v49 }
0x160e   : > { %v2331_v50 = vpop.xlane.xlu1 %2330 }
0x1610   : > { %v2160_v52 = vpop.xlane.xlu0 %2159 }
0x1611   : > { %4007 = vrcp.f32 %v2160_v52 }
0x1612   : > { %v2178_v59 = vpop.permute.xlu1 %2177 }
0x1613   : > { %v2187_v61 = vsel %vm963_vm5, %v2178_v59, 0 }
0x1614   : > { %v2176_v60 = vpop.permute.xlu0 %2175 }
0x1615   : > { %3705 = vmatprep.subr.bf16.mxu0 %v2176_v60 }
0x1616   : > { %3706 = vmatpush3.bf16.msra.mxu0 %v2176_v60  ;;  %v2341_v19 = vpop.permute.xlu1 %2340 }
0x1617   : > { %3819 = vmatprep.subr.msk.bf16.mxu0 %vm963_vm5, %v2178_v59  ;;  %v4006_v4 = vpop.eup %4005 }
0x1618   : > { %v2172_v7 = vmul.f32 %v4006_v4, %v4570_v6 }
0x161a   : > { %3708 = vmatpush3.bf16.msra.mxu0 %v2187_v61  ;;  %v2174_v14 = vpack.c.bf16 %v2172_v7, %v2172_v7 }
0x161b   : > { %3721 = vmatprep.subr.bf16.mxu0 %v2341_v19  ;;  %v4008_v22 = vpop.eup %4007 }
0x161c   : > { %v2170_v8 = vmul.f32 %v4008_v22, %v4572_v54 }
0x1645   : > { %v2328_v1 = vpop.xlane.xlu0 %2327 }
0x1647   : > { %v2325_v62 = vpop.xlane.xlu1 %2324 }
0x1648   : > { %4009 = vrcp.f32 %v2325_v62 }
0x1649   : > { %4011 = vrcp.f32 %v2328_v1  ;;  %v2407_v24 = vpop.permute.xlu0 %2406 }
0x164a   : > { %v2417_v26 = vsel %vm855_vm2, %v2407_v24, 0 }
0x164b   : > { %v2163_v21 = vpop.xlane.xlu1 %2162 }
0x164c   : > { %4013 = vrcp.f32 %v2163_v21 }
0x164d   : > { %4015 = vrcp.f32 %v2331_v50  ;;  %v2403_v25 = vpop.permute.xlu0 %2402 }
0x164f   : > { %v2343_v20 = vpop.permute.xlu1 %2342 }
0x1650   : > { %v2352_v9 = vsel %vm963_vm5, %v2343_v20, 0 }
0x1652   : > { %v4010_v5 = vpop.eup %4009 }
0x1653   : > { %v4012_v3 = vpop.eup %4011  ;;  %v2335_v10 = vmul.f32 %v4010_v5, %v4002_v43  ;;  %v2409_v16 = vpop.permute.xlu1 %2408 }
0x1654   : > { %v2336_v13 = vmul.f32 %v4012_v3, %v4000_v41  ;;  %v2420_v27 = vsel %vm855_vm2, %v2409_v16, 0 }
0x1656   : > { %v4014_v0 = vpop.eup %4013  ;;  %v2338_v18 = vpack.c.bf16 %v2336_v13, %v2335_v10 }
0x1657   : > { %v2171_v63 = vmul.f32 %v4014_v0, %v4004_v47  ;;  %v4016_v15 = vpop.eup %4015  ;;  %v2405_v28 = vpop.permute.xlu1 %2404 }
0x1658   : > { %v2337_v23 = vmul.f32 %v4016_v15, %v4576_v58 }
0x1659   : > { %v2173_v11 = vpack.c.bf16 %v2171_v63, %v2170_v8 }
0x165a   : > { %v2339_v12 = vpack.c.bf16 %v2337_v23, %v2337_v23 }
0x165b   : > { %3709 = vmatprep.mubr.msk.bf16.mxu0 %vm916_vm4, %v2173_v11 }
0x165c   : > { %3710 = vmatmul.mubr.msk.bf16.vlgmr.msra.gmra.mrb[28].mxu0 %vm916_vm4, %v2174_v14 }
0x165d   : > { %3722 = vmatpush3.bf16.msra.mxu0 %v2341_v19  ;;  %3725 = vmatprep.mubr.msk.bf16.mxu0 %vm916_vm4, %v2338_v18 }
0x165e   : > { %3822 = vmatprep.subr.msk.bf16.mxu0 %vm963_vm5, %v2343_v20 }
0x1661   : > { %3724 = vmatpush3.bf16.msra.mxu0 %v2352_v9 }
0x1662   : > { %3823 = vmatprep.subr.msk.bf16.mxu0 %vm855_vm2, %v2407_v24 }
0x1664   : > { %3726 = vmatmul.mubr.msk.bf16.vlgmr.msra.gmra.mrb[32].mxu0 %vm916_vm4, %v2339_v12 }
0x1665   : > { %3733 = vmatprep.mubr.msk.bf16.mxu0 %vm855_vm2, %v2403_v25 }
0x166a   : > { %3730 = vmatpush3.bf16.xpose.msra.mxu0 %v2417_v26 }
0x166b   : > { %3824 = vmatprep.subr.msk.bf16.mxu0 %vm855_vm2, %v2409_v16 }
0x1672   : > { %3732 = vmatpush3.bf16.xpose.msra.mxu0 %v2420_v27 }
0x1679   : > { %3734 = vmatmul.mubr.msk.bf16.vlgmr.msra.gmra.mrb[36].mxu0 %vm855_vm2, %v2405_v28 }
0x172f   : > { %v4618_v2 = vpop.f32.mrb[28].mxu0 }
0x1730   : > { %v4620_v29 = vpop.f32.mrb[29].mxu0 }
0x1731   : > { %v3712_v30 = vpop.f32.mrb[30].mxu0 }
0x1732   : > { %v4622_v55 = vpop.f32.mrb[31].mxu0 }
0x1737   : > { %v4624_v6 = vpop.f32.mrb[32].mxu0 }
0x1738   : > { %v4626_v54 = vpop.f32.mrb[33].mxu0 }
0x1739   : > { %v3728_v57 = vpop.f32.mrb[34].mxu0 }
0x173a   : > { %v4628_v58 = vpop.f32.mrb[35].mxu0 }
0x173b   : > { %v3870_v31 = vpack.i.bf16 %v4628_v58, %v4626_v54 }
0x174c   : > { %v3735_v32 = vpop.f32.mrb[36].mxu0 }
0x174d   : > { %v2456_v33 = vpop.f32.mrb[37].mxu0  ;;  %v2465_v37 = vadd.f32 %v3735_v32, %v4266_v17 }
0x174e   : > { %v2457_v34 = vadd.f32 %v2456_v33, %v4266_v17  ;;  %v3736_v35 = vpop.f32.mrb[38].mxu0 }
0x174f   : > { %v2459_v36 = vpop.f32.mrb[39].mxu0  ;;  %v2476_v41 = vsel %vm916_vm4, %v2465_v37, -inf }
0x1750   : > { %v2460_v38 = vadd.f32 %v2459_v36, %v4266_v17  ;;  %v2470_v39 = vsel %vm916_vm4, %v2457_v34, -inf }
0x1751   : > { %2471 = vmax.xlane.f32.xlu0 %v2470_v39 }
0x1752   : > { %v2473_v40 = vsel %vm916_vm4, %v2460_v38, -inf }
0x1753   : > { %2474 = vmax.xlane.f32.xlu1 %v2473_v40 }
0x1755   : > { %2477 = vmax.xlane.f32.xlu0 %v2476_v41 }
0x17de   : > { %v2472_v43 = vpop.xlane.xlu0 %2471 }
0x17df   : > { %v2479_v44 = vsub.f32 %v2457_v34, %v2472_v43 }
0x17e0   : > { %v2475_v45 = vpop.xlane.xlu1 %2474 }
0x17e1   : > { %v2482_v47 = vmul.f32 1.442695, %v2479_v44  ;;  %v2480_v48 = vsub.f32 %v2460_v38, %v2475_v45 }
0x17e2   : > { %v2478_v49 = vpop.xlane.xlu0 %2477 }
0x17e3   : > { %4017 = vpow2.f32 %v2482_v47  ;;  %v2484_v50 = vmul.f32 1.442695, %v2480_v48  ;;  %v2481_v52 = vsub.f32 %v2465_v37, %v2478_v49 }
0x17e5   : > { %4019 = vpow2.f32 %v2484_v50  ;;  %v2486_v59 = vmul.f32 1.442695, %v2481_v52 }
0x17e7   : > { %4021 = vpow2.f32 %v2486_v59 }
0x17ed   : > { %v4018_v60 = vpop.eup %4017 }
0x17ee   : > { %v2488_v61 = vsel %vm916_vm4, %v4018_v60, 0.0 }
0x17ef   : > { %v4020_v19 = vpop.eup %4019  ;;  %2489 = vadd.xlane.f32.xlu0 %v2488_v61 }
0x17f0   : > { %v2491_v1 = vsel %vm916_vm4, %v4020_v19, 0.0 }
0x17f1   : > { %v4022_v62 = vpop.eup %4021 }
0x17f2   : > { %v2494_v21 = vsel %vm916_vm4, %v4022_v62, 0.0 }
0x17f3   : > { %2492 = vadd.xlane.f32.xlu0 %v2491_v1  ;;  %2495 = vadd.xlane.f32.xlu1 %v2494_v21 }
0x1804   : > { %2507 = vrot.lane.b32.xlu1 %v4528_v42, %s4856_s3 }
0x1808   : > { %2571 = vrot.lane.b32.xlu1 %v4532_v46, %s4857_s21 }
0x1809   : > { %2505 = vrot.lane.b32.xlu0 %v4532_v46, %s4856_s3  ;;  %s4862_s3 = smov 24  }
0x180c   : > { %2573 = vrot.lane.b32.xlu1 %v4528_v42, %s4857_s21 }
0x180d   : > { %2567 = vrot.lane.b32.xlu0 %v4532_v46, %s4858_s23 }
0x1810   : > { %2569 = vrot.lane.b32.xlu1 %v4528_v42, %s4858_s23 }
0x187c   : > { %v2490_v4 = vpop.xlane.xlu0 %2489 }
0x187d   : > { %4023 = vrcp.f32 %v2490_v4 }
0x1880   : > { %v2496_v22 = vpop.xlane.xlu1 %2495  ;;  %v2493_v5 = vpop.xlane.xlu0 %2492 }
0x1881   : > { %4025 = vrcp.f32 %v2496_v22 }
0x1882   : > { %4027 = vrcp.f32 %v2493_v5 }
0x1884   : > { %v2508_v3 = vpop.permute.xlu1 %2507  ;;  %v2506_v0 = vpop.permute.xlu0 %2505 }
0x1885   : > { %3737 = vmatprep.subr.bf16.mxu1 %v2506_v0  ;;  %v2517_v7 = vsel %vm963_vm5, %v2508_v3, 0 }
0x1886   : > { %3738 = vmatpush3.bf16.msra.mxu1 %v2506_v0 }
0x1887   : > { %3825 = vmatprep.subr.msk.bf16.mxu1 %vm963_vm5, %v2508_v3  ;;  %v4024_v8 = vpop.eup %4023 }
0x1888   : > { %v2572_v63 = vpop.permute.xlu1 %2571  ;;  %v2500_v14 = vmul.f32 %v4024_v8, %v4018_v60  ;;  %v2568_v24 = vpop.permute.xlu0 %2567  ;;  %v3907_v8 = vld [vmem:[%s4803_s7 + $0x10] sm:$0xff]  }
0x1889   : > { %v2582_v23 = vsel %vm855_vm2, %v2572_v63, 0 }
0x188a   : > { %3740 = vmatpush3.bf16.msra.mxu1 %v2517_v7 }
0x188b   : > { %v4026_v10 = vpop.eup %4025  ;;  %3826 = vmatprep.subr.msk.bf16.mxu1 %vm855_vm2, %v2572_v63  ;;  %v3908_v63 = vld [vmem:[%s4803_s7 + $0x18] sm:$0xff]  }
0x188c   : > { %v4028_v11 = vpop.eup %4027  ;;  %v2502_v13 = vmul.f32 %v4026_v10, %v4022_v62  ;;  %v2574_v9 = vpop.permute.xlu1 %2573 }
0x188d   : > { %v2501_v15 = vmul.f32 %v4028_v11, %v4020_v19  ;;  %v2585_v12 = vsel %vm855_vm2, %v2574_v9, 0 }
0x188e   : > { %v2504_v18 = vpack.c.bf16 %v2502_v13, %v2502_v13 }
0x188f   : > { %v2503_v20 = vpack.c.bf16 %v2501_v15, %v2500_v14 }
0x1890   : > { %v2570_v25 = vpop.permute.xlu1 %2569 }
0x1891   : > { %3741 = vmatprep.mubr.msk.bf16.mxu1 %vm916_vm4, %v2503_v20 }
0x1892   : > { %3742 = vmatmul.mubr.msk.bf16.vlgmr.msra.gmra.mrb[36].mxu1 %vm916_vm4, %v2504_v18 }
0x1893   : > { %3749 = vmatprep.mubr.msk.bf16.mxu1 %vm855_vm2, %v2568_v24  ;;  %3746 = vmatpush3.bf16.xpose.msra.mxu1 %v2582_v23 }
0x1894   : > { %3827 = vmatprep.subr.msk.bf16.mxu1 %vm855_vm2, %v2574_v9 }
0x189b   : > { %3748 = vmatpush3.bf16.xpose.msra.mxu1 %v2585_v12 }
0x18a2   : > { %3750 = vmatmul.mubr.msk.bf16.vlgmr.msra.gmra.mrb[40].mxu1 %vm855_vm2, %v2570_v25 }
0x1965   : > { %v3743_v26 = vpop.f32.mrb[36].mxu1 }
0x1966   : > { %v2553_v16 = vpop.f32.mrb[37].mxu1 }
0x1967   : > { %v3744_v27 = vpop.f32.mrb[38].mxu1 }
0x1968   : > { %v2556_v28 = vpop.f32.mrb[39].mxu1 }
0x1969   : > { %v3875_v30 = vpack.i.bf16 %v2556_v28, %v2553_v16 }
0x1975   : > { %v3751_v57 = vpop.f32.mrb[40].mxu1 }
0x1976   : > { %v2621_v32 = vpop.f32.mrb[41].mxu1  ;;  %v2630_v36 = vadd.f32 %v3751_v57, %v4266_v17 }
0x1977   : > { %v2622_v33 = vadd.f32 %v2621_v32, %v4266_v17  ;;  %v3752_v34 = vpop.f32.mrb[42].mxu1 }
0x1978   : > { %v2624_v35 = vpop.f32.mrb[43].mxu1  ;;  %v2641_v40 = vsel %vm916_vm4, %v2630_v36, -inf }
0x1979   : > { %v2625_v37 = vadd.f32 %v2624_v35, %v4266_v17  ;;  %v2635_v38 = vsel %vm916_vm4, %v2622_v33, -inf }
0x197a   : > { %2636 = vmax.xlane.f32.xlu0 %v2635_v38 }
0x197b   : > { %v2638_v39 = vsel %vm916_vm4, %v2625_v37, -inf }
0x197c   : > { %2639 = vmax.xlane.f32.xlu1 %v2638_v39 }
0x197e   : > { %2642 = vmax.xlane.f32.xlu0 %v2641_v40  ;;  %v3403_v40 = vld [vmem:[%s4804_s8 + $0x1] ss:$0 sm:$0xff] }
0x1a07   : > { %v2637_v41 = vpop.xlane.xlu0 %2636 }
0x1a08   : > { %v2644_v43 = vsub.f32 %v2622_v33, %v2637_v41 }
0x1a09   : > { %v2640_v44 = vpop.xlane.xlu1 %2639 }
0x1a0a   : > { %v2647_v45 = vmul.f32 1.442695, %v2644_v43  ;;  %v2645_v47 = vsub.f32 %v2625_v37, %v2640_v44 }
0x1a0b   : > { %v2643_v48 = vpop.xlane.xlu0 %2642 }
0x1a0c   : > { %4029 = vpow2.f32 %v2647_v45  ;;  %v2649_v49 = vmul.f32 1.442695, %v2645_v47  ;;  %v2646_v50 = vsub.f32 %v2630_v36, %v2643_v48 }
0x1a0e   : > { %4031 = vpow2.f32 %v2649_v49  ;;  %v2651_v17 = vmul.f32 1.442695, %v2646_v50 }
0x1a10   : > { %4033 = vpow2.f32 %v2651_v17 }
0x1a16   : > { %v4030_v52 = vpop.eup %4029 }
0x1a17   : > { %v2653_v59 = vsel %vm916_vm4, %v4030_v52, 0.0 }
0x1a18   : > { %v4032_v60 = vpop.eup %4031  ;;  %2654 = vadd.xlane.f32.xlu0 %v2653_v59 }
0x1a19   : > { %v2656_v19 = vsel %vm916_vm4, %v4032_v60, 0.0 }
0x1a1a   : > { %v4034_v61 = vpop.eup %4033 }
0x1a1b   : > { %v2659_v62 = vsel %vm916_vm4, %v4034_v61, 0.0 }
0x1a1c   : > { %2657 = vadd.xlane.f32.xlu0 %v2656_v19  ;;  %2660 = vadd.xlane.f32.xlu1 %v2659_v62 }
0x1a2d   : > { %2672 = vrot.lane.b32.xlu1 %v4528_v42, %s4859_s20 }
0x1a31   : > { %3871 = vrot.lane.b32.xlu1 %v3870_v31, %s4860_s24 }
0x1a32   : > { %2670 = vrot.lane.b32.xlu0 %v4532_v46, %s4859_s20 }
0x1a35   : > { %2739 = vrot.lane.b32.xlu1 %v4624_v6, %s4860_s24  ;;  %s600_s24 = scalar_lea.vmem %s4815_s19, %s3311_s25 }
0x1a36   : > { %3876 = vrot.lane.b32.xlu0 %v3875_v30, %s4861_s27 }
0x1a39   : > { %2751 = vrot.lane.b32.xlu1 %v3743_v26, %s4861_s27 }
0x1aa5   : > { %v2655_v1 = vpop.xlane.xlu0 %2654 }
0x1aa6   : > { %4035 = vrcp.f32 %v2655_v1 }
0x1aa9   : > { %v2661_v21 = vpop.xlane.xlu1 %2660  ;;  %v2658_v4 = vpop.xlane.xlu0 %2657 }
0x1aaa   : > { %4037 = vrcp.f32 %v2661_v21 }
0x1aab   : > { %4039 = vrcp.f32 %v2658_v4 }
0x1aad   : > { %v2671_v42 = vpop.permute.xlu0 %2670  ;;  %v2673_v54 = vpop.permute.xlu1 %2672 }
0x1aae   : > { %3753 = vmatprep.subr.bf16.mxu0 %v2671_v42  ;;  %v2682_v46 = vsel %vm963_vm5, %v2673_v54, 0 }
0x1aaf   : > { %3754 = vmatpush3.bf16.msra.mxu0 %v2671_v42 }
0x1ab0   : > { %3828 = vmatprep.subr.msk.bf16.mxu0 %vm963_vm5, %v2673_v54  ;;  %v4036_v58 = vpop.eup %4035 }
0x1ab1   : > { %v2665_v5 = vmul.f32 %v4036_v58, %v4030_v52  ;;  %v3872_v18 = vpop.permute.xlu1 %3871  ;;  %v3877_v9 = vpop.permute.xlu0 %3876 }
0x1ab2   : > { %v3874_v23 = vunpack.i.h.bf16 %v3872_v18  ;;  %v3873_v24 = vunpack.i.l.bf16 %v3872_v18  ;;  %v3879_v25 = vunpack.i.h.bf16 %v3877_v9  ;;  %v3878_v26 = vunpack.i.l.bf16 %v3877_v9 }
0x1ab3   : > { %3756 = vmatpush3.bf16.msra.mxu0 %v2682_v46 }
0x1ab4   : > { %v4038_v6 = vpop.eup %4037  ;;  %3761 = vmatprep.subr.bf16.mxu0 %v3907_v8  ;;  %v2769_v16 = vsel %vm855_vm2, %v4622_v55, %v3874_v23  ;;  %v2768_v27 = vsel %vm855_vm2, %v4620_v29, %v3873_v24 }
0x1ab5   : > { %v4040_v31 = vpop.eup %4039  ;;  %v2667_v22 = vmul.f32 %v4038_v6, %v4034_v61  ;;  %v2740_v20 = vpop.permute.xlu1 %2739  ;;  %v2772_v35 = vsel %vm1549_vm6, %v2769_v16, %v3879_v25  ;;  %v2771_v36 = vsel %vm1549_vm6, %v2768_v27, %v3878_v26  ;;  %v3407_v26 = vld [vmem:[%s4806_s10 + $0x1] ss:$0 sm:$0xff] }
0x1ab6   : > { %v2666_v3 = vmul.f32 %v4040_v31, %v4032_v60  ;;  %v2770_v30 = vsel %vm855_vm2, %v4618_v2, %v2740_v20  ;;  %v3406_v20 = vld [vmem:[%s4805_s9 + $0x1] ss:$0 sm:$0xff] }
0x1ab7   : > { %v2669_v0 = vpack.c.bf16 %v2667_v22, %v2667_v22  ;;  %v3909_v22 = vld [vmem:[%s4807_s11 + $0x10] sm:$0xff]  }
0x1ab8   : > { %v2668_v7 = vpack.c.bf16 %v2666_v3, %v2665_v5  ;;  %v3910_v5 = vld [vmem:[%s4807_s11 + $0x18] sm:$0xff]   ;;  %3769 = vmatprep.subr.bf16.mxu1 %v3909_v22 }
0x1ab9   : > { %v2752_v12 = vpop.permute.xlu1 %2751  ;;  %3770 = vmatpush3.bf16.msra.mxu1 %v3909_v22 }
0x1aba   : > { %3757 = vmatprep.mubr.msk.bf16.mxu0 %vm916_vm4, %v2668_v7  ;;  %v2773_v32 = vsel %vm1549_vm6, %v2770_v30, %v2752_v12  ;;  %3771 = vmatprep.subr.bf16.mxu1 %v3910_v5 }
0x1abb   : > { %3758 = vmatmul.mubr.msk.bf16.vlgmr.msra.gmra.mrb[40].mxu0 %vm916_vm4, %v2669_v0 }
0x1abc   : > { %3762 = vmatpush3.bf16.msra.mxu0 %v3907_v8 }
0x1abd   : > { %3763 = vmatprep.subr.bf16.mxu0 %v3908_v63  ;;  %3772 = vmatpush3.bf16.msra.mxu1 %v3910_v5 }
0x1ac0   : > { %3764 = vmatpush3.bf16.msra.mxu0 %v3908_v63 }
0x1b8e   : > { %v3759_v10 = vpop.f32.mrb[40].mxu0 }
0x1b8f   : > { %2763 = vrot.lane.b32.xlu1 %v3759_v10, %s4862_s3  ;;  %v2718_v11 = vpop.f32.mrb[41].mxu0 }
0x1b90   : > { %v3760_v13 = vpop.f32.mrb[42].mxu0 }
0x1b91   : > { %v2721_v14 = vpop.f32.mrb[43].mxu0 }
0x1b92   : > { %v3880_v15 = vpack.i.bf16 %v2721_v14, %v2718_v11 }
0x1b94   : > { %3881 = vrot.lane.b32.xlu0 %v3880_v15, %s4862_s3 }
0x1c01   : > { %v2764_v28 = vpop.permute.xlu1 %2763 }
0x1c02   : > { %v2776_v37 = vsel %vm916_vm4, %v2773_v32, %v2764_v28 }
0x1c03   : > { %v2778_v39 = vpack.c.bf16 %v2776_v37, %v2776_v37  ;;  %v3914_v37 = vld [vmem:[%s4809_s13 + $0x58] sm:$0xff]  }
0x1c06   : > { %v3882_v57 = vpop.permute.xlu0 %3881 }
0x1c07   : > { %v3884_v33 = vunpack.i.h.bf16 %v3882_v57  ;;  %v3883_v34 = vunpack.i.l.bf16 %v3882_v57 }
0x1c09   : > { %v2774_v55 = vsel %vm916_vm4, %v2771_v36, %v3883_v34  ;;  %v2775_v38 = vsel %vm916_vm4, %v2772_v35, %v3884_v33  ;;  %v3911_v34 = vld [vmem:[%s4809_s13 + $0x40] sm:$0xff]   ;;  %v3912_v35 = vld [vmem:[%s4809_s13 + $0x48] sm:$0xff]   ;;  %v3913_v36 = vld [vmem:[%s4809_s13 + $0x50] sm:$0xff]  }
0x1c0a   : > { %v2777_v29 = vpack.c.bf16 %v2775_v38, %v2774_v55  ;;  %3777 = vmatprep.subr.bf16.mxu0 %v3911_v34  ;;  %v3915_v55 = vld [vmem:[%s4809_s13 + $0x60] sm:$0xff]   ;;  %v3916_v38 = vld [vmem:[%s4809_s13 + $0x68] sm:$0xff]  }
0x1c0c   : > { %3765 = vmatprep.mubr.msk.bf16.mxu0 %vm709_vm1, %v2777_v29  ;;  %v3917_v29 = vld [vmem:[%s4809_s13 + $0x70] sm:$0xff]  }
0x1c0d   : > { %3766 = vmatmul.mubr.msk.bf16.vlgmr.msra.gmra.mrb[44].mxu0 %vm709_vm1, %v2778_v39  ;;  %v3918_v39 = vld [vmem:[%s4809_s13 + $0x78] sm:$0xff]  }
0x1c0e   : > { %3778 = vmatpush3.bf16.msra.mxu0 %v3911_v34 }
0x1c0f   : > { %3779 = vmatprep.subr.bf16.mxu0 %v3912_v35 }
0x1c12   : > { %3780 = vmatpush3.bf16.msra.mxu0 %v3912_v35  ;;  %v3444_v35 = vld [vmem:[%s4811_s15] ss:$0 sm:$0xff] }
0x1c13   : > { %3781 = vmatprep.subr.bf16.mxu0 %v3913_v36 }
0x1c16   : > { %3782 = vmatpush3.bf16.msra.mxu0 %v3913_v36 }
0x1c17   : > { %3783 = vmatprep.subr.bf16.mxu0 %v3914_v37 }
0x1c1a   : > { %3784 = vmatpush3.bf16.msra.mxu0 %v3914_v37  ;;  %v3445_v37 = vld [vmem:[%s4812_s16] ss:$0 sm:$0xff] }
0x1c1b   : > { %3785 = vmatprep.subr.bf16.mxu0 %v3915_v55 }
0x1c1e   : > { %3786 = vmatpush3.bf16.msra.mxu0 %v3915_v55 }
0x1c1f   : > { %3787 = vmatprep.subr.bf16.mxu0 %v3916_v38 }
0x1c22   : > { %3788 = vmatpush3.bf16.msra.mxu0 %v3916_v38 }
0x1c23   : > { %3789 = vmatprep.subr.bf16.mxu0 %v3917_v29 }
0x1c26   : > { %3790 = vmatpush3.bf16.msra.mxu0 %v3917_v29 }
0x1c27   : > { %3791 = vmatprep.subr.bf16.mxu0 %v3918_v39 }
0x1c2a   : > { %3792 = vmatpush3.bf16.msra.mxu0 %v3918_v39  ;;  %v3446_v39 = vld [vmem:[%s4814_s18] ss:$0 sm:$0xff] }
0x1ce0   : > { %v3767_v2 = vpop.f32.mrb[44].mxu0 }
0x1ce1   : > { %v2836_v41 = vpop.f32.mrb[45].mxu0  ;;  %v2852_v43 = vadd.f32 %v3767_v2, %v4494_v53  ;;  %v3413_v2 = vld [vmem:[%s4808_s12 + $0x1] ss:$0 sm:$0xff] }
0x1ce2   : > { %v2850_v44 = vadd.f32 %v2836_v41, %v4491_v51  ;;  %v3768_v45 = vpop.f32.mrb[46].mxu0 }
0x1ce3   : > { %v2839_v47 = vpop.f32.mrb[47].mxu0  ;;  %v2863_v50 = vadd.f32 %v3403_v40, %v2852_v43 }
0x1ce4   : > { %v4715_v48 = vadd.f32 %v3403_v40, %v2850_v44  ;;  %v2851_v49 = vadd.f32 %v2839_v47, %v4497_v56 }
0x1ce5   : > { %v2874_v60 = vsel %vm709_vm1, %v2863_v50, 0.0 }
0x1ce6   : > { %v2862_v17 = vadd.f32 %v3403_v40, %v2851_v49  ;;  %v2868_v52 = vsel %vm709_vm1, %v4715_v48, 0.0 }
0x1ce7   : > { %2869 = vadd.xlane.f32.xlu0 %v2868_v52 }
0x1ce8   : > { %v2871_v59 = vsel %vm709_vm1, %v2862_v17, 0.0 }
0x1ce9   : > { %2872 = vadd.xlane.f32.xlu1 %v2871_v59 }
0x1ceb   : > { %2875 = vadd.xlane.f32.xlu0 %v2874_v60 }
0x1d74   : > { %v2870_v53 = vpop.xlane.xlu0 %2869 }
0x1d75   : > { %v2877_v51 = vmul.f32 0.03125, %v2870_v53 }
0x1d76   : > { %v2873_v61 = vpop.xlane.xlu1 %2872 }
0x1d77   : > { %v2880_v19 = vsub.f32 %v4715_v48, %v2877_v51  ;;  %v2878_v62 = vmul.f32 0.03125, %v2873_v61 }
0x1d78   : > { %v2876_v1 = vpop.xlane.xlu0 %2875 }
0x1d79   : > { %v2881_v56 = vsub.f32 %v2862_v17, %v2878_v62  ;;  %v2879_v21 = vmul.f32 0.03125, %v2876_v1  ;;  %v2883_v4 = vmul.f32 %v2880_v19, %v2880_v19 }
0x1d7b   : > { %v2882_v42 = vsub.f32 %v2863_v50, %v2879_v21  ;;  %v2886_v54 = vsel %vm709_vm1, %v2883_v4, 0.0  ;;  %v2884_v46 = vmul.f32 %v2881_v56, %v2881_v56 }
0x1d7c   : > { %2887 = vadd.xlane.f32.xlu0 %v2886_v54 }
0x1d7d   : > { %v2885_v58 = vmul.f32 %v2882_v42, %v2882_v42  ;;  %v2889_v31 = vsel %vm709_vm1, %v2884_v46, 0.0 }
0x1d7f   : > { %v2892_v6 = vsel %vm709_vm1, %v2885_v58, 0.0 }
0x1d80   : > { %2893 = vadd.xlane.f32.xlu1 %v2892_v6  ;;  %2890 = vadd.xlane.f32.xlu0 %v2889_v31 }
0x1e09   : > { %v2888_v3 = vpop.xlane.xlu0 %2887 }
0x1e0a   : > { %v2895_v0 = vmul.f32 0.03125, %v2888_v3 }
0x1e0c   : > { %v2898_v7 = vadd.f32 1e-06, %v2895_v0 }
0x1e0d   : > { %v2891_v8 = vpop.xlane.xlu0 %2890  ;;  %v2894_v63 = vpop.xlane.xlu1 %2893 }
0x1e0e   : > { %4041 = vrsqrt.f32 %v2898_v7  ;;  %v2896_v10 = vmul.f32 0.03125, %v2891_v8  ;;  %v2897_v11 = vmul.f32 0.03125, %v2894_v63 }
0x1e10   : > { %v2899_v13 = vadd.f32 1e-06, %v2896_v10  ;;  %v2900_v14 = vadd.f32 1e-06, %v2897_v11 }
0x1e12   : > { %4043 = vrsqrt.f32 %v2899_v13  ;;  %v3435_v13 = vld [vmem:[%s4810_s14 + $0x1] ss:$0 sm:$0xff] }
0x1e13   : > { %4045 = vrsqrt.f32 %v2900_v14 }
0x1e18   : > { %v4042_v15 = vpop.eup %4041 }
0x1e19   : > { %v2904_v18 = vmul.f32 %v4042_v15, %v2880_v19 }
0x1e1b   : > { %v2913_v12 = vmul.f32 %v3406_v20, %v2904_v18 }
0x1e1c   : > { %v4044_v23 = vpop.eup %4043 }
0x1e1d   : > { %v4046_v24 = vpop.eup %4045  ;;  %v2905_v9 = vmul.f32 %v4044_v23, %v2881_v56  ;;  %v2922_v28 = vadd.f32 %v3407_v26, %v2913_v12 }
0x1e1e   : > { %v2906_v25 = vmul.f32 %v4046_v24, %v2882_v42 }
0x1e1f   : > { %v2914_v16 = vmul.f32 %v3406_v20, %v2905_v9 }
0x1e20   : > { %v2915_v27 = vmul.f32 %v3406_v20, %v2906_v25 }
0x1e21   : > { %v2923_v30 = vadd.f32 %v3407_v26, %v2914_v16 }
0x1e22   : > { %v2924_v57 = vadd.f32 %v3407_v26, %v2915_v27 }
0x1e23   : > { %v2925_v32 = vpack.c.bf16 %v2923_v30, %v2922_v28  ;;  %v3919_v28 = vld [vmem:[%s4813_s17] sm:$0xff]   ;;  %v4078_v30 = vmov 0.0  }
0x1e24   : > { %v2926_v33 = vpack.c.bf16 %v2924_v57, %v2924_v57  ;;  %3797 = vmatprep.subr.bf16.mxu1 %v4078_v30 }
0x1e25   : > { %3773 = vmatprep.mubr.msk.bf16.mxu1 %vm709_vm1, %v2925_v32 }
0x1e26   : > { %3774 = vmatmul.mubr.msk.bf16.vlgmr.msra.gmra.mrb[44].mxu1 %vm709_vm1, %v2926_v33 }
0x1e27   : > { %3798 = vmatpush3.bf16.msra.mxu1 %v3919_v28  ;;  %3801 = vmatprep.mubr.msk.bf16.mxu1 %vm4079_vm7, %v4078_v30 }
0x1e28   : > { %3799 = vmatprep.subr.bf16.mxu1 %v4078_v30 }
0x1ef9   : > { %v3775_v40 = vpop.f32.mrb[44].mxu1 }
0x1efa   : > { %v3001_v41 = vadd.f32 %v3775_v40, %v3413_v2  ;;  %v2992_v43 = vpop.f32.mrb[45].mxu1 }
0x1efb   : > { %v2993_v44 = vadd.f32 %v3413_v2, %v2992_v43  ;;  %v3776_v45 = vpop.f32.mrb[46].mxu1 }
0x1efc   : > { %v3011_v47 = vmul.f32 0.044715, %v3001_v41  ;;  %v2995_v49 = vpop.f32.mrb[47].mxu1  ;;  %v3008_v22 = vmul.f32 0.5, %v3001_v41 }
0x1efd   : > { %v3009_v50 = vmul.f32 0.044715, %v2993_v44  ;;  %v2996_v17 = vadd.f32 %v3413_v2, %v2995_v49  ;;  %v3006_v5 = vmul.f32 0.5, %v2993_v44 }
0x1efe   : > { %v3014_v52 = vmul.f32 %v3011_v47, %v3001_v41 }
0x1eff   : > { %v3012_v59 = vmul.f32 %v3009_v50, %v2993_v44  ;;  %v3010_v60 = vmul.f32 0.044715, %v2996_v17  ;;  %v3007_v3 = vmul.f32 0.5, %v2996_v17 }
0x1f00   : > { %v3017_v53 = vmul.f32 %v3014_v52, %v3001_v41 }
0x1f01   : > { %v3015_v51 = vmul.f32 %v3012_v59, %v2993_v44  ;;  %v3013_v61 = vmul.f32 %v3010_v60, %v2996_v17 }
0x1f02   : > { %v3020_v19 = vadd.f32 %v3017_v53, %v3001_v41 }
0x1f03   : > { %v3016_v62 = vmul.f32 %v3013_v61, %v2996_v17  ;;  %v3018_v1 = vadd.f32 %v3015_v51, %v2993_v44 }
0x1f04   : > { %v3023_v56 = vmul.f32 0.7978846, %v3020_v19 }
0x1f05   : > { %v3019_v21 = vadd.f32 %v3016_v62, %v2996_v17  ;;  %v3021_v4 = vmul.f32 0.7978846, %v3018_v1 }
0x1f06   : > { %4047 = vtanh.f32 %v3023_v56 }
0x1f07   : > { %v3022_v42 = vmul.f32 0.7978846, %v3019_v21  ;;  %4049 = vtanh.f32 %v3021_v4 }
0x1f09   : > { %4051 = vtanh.f32 %v3022_v42 }
0x1f10   : > { %v4048_v54 = vpop.eup %4047 }
0x1f11   : > { %v4050_v46 = vpop.eup %4049  ;;  %v3029_v58 = vadd.f32 1.0, %v4048_v54 }
0x1f12   : > { %v3027_v6 = vadd.f32 1.0, %v4050_v46 }
0x1f13   : > { %v4052_v31 = vpop.eup %4051  ;;  %v3032_v7 = vmul.f32 %v3029_v58, %v3008_v22 }
0x1f14   : > { %v3028_v0 = vadd.f32 1.0, %v4052_v31  ;;  %v3030_v8 = vmul.f32 %v3027_v6, %v3006_v5 }
0x1f15   : > { %v3034_v11 = vpack.c.bf16 %v3032_v7, %v3032_v7 }
0x1f16   : > { %v3031_v63 = vmul.f32 %v3028_v0, %v3007_v3 }
0x1f18   : > { %v3033_v10 = vpack.c.bf16 %v3031_v63, %v3030_v8 }
0x1f1a   : > { %3793 = vmatprep.mubr.bf16.mxu0 %v3033_v10 }
0x1f1b   : > { %3794 = vmatmul.mubr.bf16.vlgmr.msra.gmra.mrb[48].mxu0 %v3034_v11 }
0x1fee   : > { %v3795_v14 = vpop.f32.mrb[48].mxu0 }
0x1fef   : > { %v3142_v15 = vpop.f32.mrb[49].mxu0 }
0x1ff0   : > { %v3143_v18 = vadd.f32 %v3435_v13, %v3142_v15  ;;  %v3796_v20 = vpop.f32.mrb[50].mxu0 }
0x1ff1   : > { %v3145_v23 = vpop.f32.mrb[51].mxu0 }
0x1ff2   : > { %v3154_v24 = vadd.f32 %v3143_v18, %v4715_v48  ;;  %v3920_v48 = vld [vmem:[%s4813_s17 + $0x8] sm:$0xff]  }
0x1ff3   : > { %3800 = vmatpush3.bf16.msra.mxu1 %v3920_v48 }
0x1ff4   : > { %v3157_v9 = vsel %vm709_vm1, %v3154_v24, 0.0 }
0x1ff5   : > { %3158 = vadd.xlane.f32.xlu0 %v3157_v9 }
0x2082   : > { %v3159_v12 = vpop.xlane.xlu0 %3158 }
0x2083   : > { %v3160_v25 = vmul.f32 0.03125, %v3159_v12 }
0x2085   : > { %v3161_v26 = vsub.f32 %v3154_v24, %v3160_v25 }
0x2087   : > { %v3162_v16 = vmul.f32 %v3161_v26, %v3161_v26 }
0x2089   : > { %v3163_v27 = vsel %vm709_vm1, %v3162_v16, 0.0 }
0x208a   : > { %3164 = vadd.xlane.f32.xlu1 %v3163_v27 }
0x2117   : > { %v3165_v57 = vpop.xlane.xlu1 %3164 }
0x2118   : > { %v3166_v32 = vmul.f32 0.03125, %v3165_v57 }
0x211a   : > { %v3167_v33 = vadd.f32 1e-06, %v3166_v32 }
0x211c   : > { %4053 = vrsqrt.f32 %v3167_v33 }
0x2126   : > { %v4054_v34 = vpop.eup %4053 }
0x2127   : > { %v3169_v36 = vmul.f32 %v4054_v34, %v3161_v26 }
0x2129   : > { %v3176_v55 = vmul.f32 %v3444_v35, %v3169_v36 }
0x212b   : > { %v3183_v38 = vadd.f32 %v3445_v37, %v3176_v55 }
0x212d   : > { %v3184_v29 = vpack.c.bf16 %v3183_v38, %v3183_v38 }
0x212f   : > { %3802 = vmatmul.mubr.msk.bf16.vlgmr.msra.gmra.mrb[48].mxu1 %vm709_vm1, %v3184_v29 }
0x2202   : > { %v3245_v2 = vpop.f32.mrb[48].mxu1 }
0x2203   : > { %v3246_v40 = vadd.f32 %v3446_v39, %v3245_v2  ;;  %v3803_v41 = vpop.f32.mrb[49].mxu1 }
0x2204   : > { %v3248_v43 = vpop.f32.mrb[50].mxu1 }
0x2205   : > { %3251 = vst [vmem:[%s600_s24] sm:$0xff] %v3246_v40  ;;  %v3804_v44 = vpop.f32.mrb[51].mxu1 }
0x2206 PF: > { %s29_s0 = sadd.s32 1, %s4061_s0  }
0x2207   : > { %p26_p4 = scmp.ge.s32.totalorder %s29_s0, 4  }
0x2209   :  { %28 = sbr.rel (!%p26_p4) target bundleno = 5 (0x5), region = 138 }

</bundles_post_ra>
